<compile_context>
chip_gen: v6e
topology: v6e:2x2x1
jax: 0.10.0
libtpu: 0.0.40
codegen_flags: <defaults>
</compile_context>

<pallas_src>
import functools

import jax
import jax.numpy as jnp
from jax.experimental import pallas as pl
from jax.experimental.pallas import tpu as pltpu

HIDDEN_SIZE = 64
INPUT_SIZE = 26
NUM_CLASSES = 2
NUM_LAYERS = 2


# ----------------------------- Pallas kernel ------------------------------- #
def fused_lstm_fc_kernel(xw0_ref, whh0_ref, w1_ref, b1_ref, wfc_ref, bfc_ref,
                         out_ref, *, batch, seq):
    """Fused 2-layer LSTM recurrence + FC head.

    xw0_ref : (4, T*B, H) f32   hoisted layer-0 input projection + bias, per gate
    whh0_ref: (4, H, H)   bf16  layer-0 recurrent weights (h @ W), per gate
    w1_ref  : (4, 2H, H)  bf16  layer-1 packed [W_ih ; W_hh] weights, per gate
    b1_ref  : (4, 1, H)   f32   layer-1 combined bias (b_ih + b_hh), per gate
    wfc_ref : (H, C)      bf16  FC weight (transposed)
    bfc_ref : (1, C)      f32   FC bias
    out_ref : (T*B, C)    f32   FC output, time-major rows (t*B + b)
    """
    B, T = batch, seq
    H = whh0_ref.shape[-1]
    C = out_ref.shape[-1]
    f32, bf16 = jnp.float32, jnp.bfloat16

    # Hoist every weight/bias read out of the unrolled loop (loaded once).
    whh0 = [whh0_ref[k] for k in range(4)]                           # (H, H)
    w1 = [w1_ref[k] for k in range(4)]                               # (2H, H)
    b1 = [jnp.broadcast_to(b1_ref[k], (B, H)) for k in range(4)]     # (B, H)

    def lstm_gates(pre_i, pre_f, pre_g, pre_o, c):
        # Single EUP tanh dispatch for all four gates:
        #   sigmoid(x) = 0.5 * tanh(0.5 * x) + 0.5
        pre = jnp.concatenate(
            [pre_i * 0.5, pre_f * 0.5, pre_o * 0.5, pre_g], axis=0)  # (4B, H)
        th = jnp.tanh(pre)
        i_g = th[0 * B:1 * B] * 0.5 + 0.5
        f_g = th[1 * B:2 * B] * 0.5 + 0.5
        o_g = th[2 * B:3 * B] * 0.5 + 0.5
        g_g = th[3 * B:4 * B]
        c_new = f_g * c + i_g * g_g
        h_new = o_g * jnp.tanh(c_new)
        return h_new, c_new

    h0 = jnp.zeros((B, H), f32)
    c0 = jnp.zeros((B, H), f32)
    h1 = jnp.zeros((B, H), f32)
    c1 = jnp.zeros((B, H), f32)
    h1_steps = []

    # T is a compile-time constant -> fully unrolled recurrence.
    for t in range(T):
        # ---- layer 0: x-projection hoisted; only h @ W_hh per gate here.
        h0b = h0.astype(bf16)
        g0 = [xw0_ref[k, t * B:(t + 1) * B, :]
              + jnp.dot(h0b, whh0[k], preferred_element_type=f32)
              for k in range(4)]
        h0, c0 = lstm_gates(g0[0], g0[1], g0[2], g0[3], c0)

        # ---- layer 1: K-concat -> one (B,2H)@(2H,H) dot per gate (4 vs 8).
        h01b = jnp.concatenate([h0, h1], axis=-1).astype(bf16)        # (B, 2H)
        g1 = [jnp.dot(h01b, w1[k], preferred_element_type=f32) + b1[k]
              for k in range(4)]
        h1, c1 = lstm_gates(g1[0], g1[1], g1[2], g1[3], c1)
        h1_steps.append(h1)

    # ---- FC head once over all timesteps (off the recurrent path entirely).
    hs = jnp.concatenate(h1_steps, axis=0).astype(bf16)               # (T*B, H)
    out_ref[...] = (jnp.dot(hs, wfc_ref[...], preferred_element_type=f32)
                    + jnp.broadcast_to(bfc_ref[...], (T * B, C)))


# ------------------------------- Wrapper ------------------------------------ #
def _vmem():
    return pl.BlockSpec(memory_space=pltpu.MemorySpace.VMEM)


@jax.jit
def rnn_forward(x, params):
    """x: (B, T, INPUT_SIZE) -> (B*T, NUM_CLASSES); matches the torch module."""
    B, T, _ = x.shape
    H, C = HIDDEN_SIZE, NUM_CLASSES
    l0, l1, fc = params["l0"], params["l1"], params["fc"]

    # Hoisted layer-0 input projection: one batched bf16 matmul over all T*B
    # rows per gate, densified to (4, T*B, H) lane/sublane-dense slabs.
    x_tm = jnp.transpose(x, (1, 0, 2)).astype(jnp.bfloat16)           # (T, B, D)
    xw0 = jnp.einsum("tbd,gdh->gtbh", x_tm, l0["wih"],
                     preferred_element_type=jnp.float32)
    xw0 = (xw0 + l0["bias"][:, None, :, :]).reshape(4, T * B, H)

    kernel = functools.partial(fused_lstm_fc_kernel, batch=B, seq=T)
    out_tm = pl.pallas_call(
        kernel,
        out_shape=jax.ShapeDtypeStruct((T * B, C), jnp.float32),
        in_specs=[_vmem()] * 6,
        out_specs=_vmem(),
    )(xw0, l0["whh"], l1["w"], l1["bias"], fc["w_t"], fc["b"])

    # Tiny (16, 2) reorder from time-major rows to torch's batch_first layout.
    return jnp.transpose(out_tm.reshape(T, B, C), (1, 0, 2)).reshape(B * T, C)


# ------------------------- Parameter construction --------------------------- #
def init_params(key):
    params = {}
    bound = 1.0 / (HIDDEN_SIZE ** 0.5)
    for layer in range(NUM_LAYERS):
        d_in = INPUT_SIZE if layer == 0 else HIDDEN_SIZE
        key, k1, k2, k3, k4 = jax.random.split(key, 5)
        w_ih = jax.random.uniform(k1, (4 * HIDDEN_SIZE, d_in), jnp.float32,
                                  -bound, bound)
        w_hh = jax.random.uniform(k2, (4 * HIDDEN_SIZE, HIDDEN_SIZE),
                                  jnp.float32, -bound, bound)
        b_ih = jax.random.uniform(k3, (4 * HIDDEN_SIZE,), jnp.float32,
                                  -bound, bound)
        b_hh = jax.random.uniform(k4, (4 * HIDDEN_SIZE,), jnp.float32,
                                  -bound, bound)
        # Split per gate (torch order i, f, g, o) and transpose for x @ W.
        wih_g = jnp.transpose(w_ih.reshape(4, HIDDEN_SIZE, d_in), (0, 2, 1))
        whh_g = jnp.transpose(w_hh.reshape(4, HIDDEN_SIZE, HIDDEN_SIZE),
                              (0, 2, 1))
        bias_g = (b_ih + b_hh).reshape(4, 1, HIDDEN_SIZE)
        if layer == 0:
            params["l0"] = {
                "wih": wih_g.astype(jnp.bfloat16),    # (4, D, H)  MXU operand
                "whh": whh_g.astype(jnp.bfloat16),    # (4, H, H)  MXU operand
                "bias": bias_g,                       # (4, 1, H)  f32
            }
        else:
            # K-concat: [W_ih (input = h of layer 0) ; W_hh (recurrent)].
            w_packed = jnp.concatenate([wih_g, whh_g], axis=1)  # (4, 2H, H)
            params["l1"] = {
                "w": w_packed.astype(jnp.bfloat16),   # (4, 2H, H) MXU operand
                "bias": bias_g,                       # (4, 1, H)  f32
            }
    key, k5, k6 = jax.random.split(key, 3)
    w_fc = jax.random.uniform(k5, (NUM_CLASSES, HIDDEN_SIZE), jnp.float32,
                              -bound, bound)
    b_fc = jax.random.uniform(k6, (NUM_CLASSES,), jnp.float32, -bound, bound)
    params["fc"] = {"w_t": w_fc.T.astype(jnp.bfloat16),  # (H, C) MXU operand
                    "b": b_fc[None, :]}                  # (1, C) f32
    return params


# ----------------------------- Pure-JAX reference --------------------------- #
def rnn_reference(x, params):
    """Per-timestep LSTM reference mirroring the kernel's bf16-MXU / f32 math."""
    B, T, _ = x.shape
    H = HIDDEN_SIZE
    f32, bf16 = jnp.float32, jnp.bfloat16
    l0, l1, fc = params["l0"], params["l1"], params["fc"]

    h0 = jnp.zeros((B, H), f32)
    c0 = jnp.zeros((B, H), f32)
    h1 = jnp.zeros((B, H), f32)
    c1 = jnp.zeros((B, H), f32)
    outs = []
    for t in range(T):
        # layer 0
        xt = x[:, t, :].astype(bf16)
        g0 = [jnp.dot(xt, l0["wih"][k], preferred_element_type=f32)
              + jnp.dot(h0.astype(bf16), l0["whh"][k],
                        preferred_element_type=f32)
              + l0["bias"][k]
              for k in range(4)]
        c0 = (jax.nn.sigmoid(g0[1]) * c0
              + jax.nn.sigmoid(g0[0]) * jnp.tanh(g0[2]))
        h0 = jax.nn.sigmoid(g0[3]) * jnp.tanh(c0)

        # layer 1 (packed [W_ih ; W_hh] weights)
        h01 = jnp.concatenate([h0, h1], axis=-1).astype(bf16)
        g1 = [jnp.dot(h01, l1["w"][k], preferred_element_type=f32)
              + l1["bias"][k]
              for k in range(4)]
        c1 = (jax.nn.sigmoid(g1[1]) * c1
              + jax.nn.sigmoid(g1[0]) * jnp.tanh(g1[2]))
        h1 = jax.nn.sigmoid(g1[3]) * jnp.tanh(c1)
        outs.append(h1)

    hs = jnp.stack(outs, axis=1).reshape(B * T, H)        # batch_first flatten
    return (jnp.dot(hs.astype(bf16), fc["w_t"], preferred_element_type=f32)
            + fc["b"])


if __name__ == "__main__":
    key = jax.random.PRNGKey(0)
    key, pkey, xkey = jax.random.split(key, 3)
    params = init_params(pkey)

    batch, seq = 2, 8
    x = jax.random.normal(xkey, (batch, seq, INPUT_SIZE), jnp.float32)

    out = jax.block_until_ready(rnn_forward(x, params))
    ref = rnn_reference(x, params)

    assert out.shape == (batch * seq, NUM_CLASSES), out.shape
    assert jnp.allclose(out, ref, atol=1e-3, rtol=1e-3), (
        "mismatch vs reference, max abs err = "
        f"{float(jnp.max(jnp.abs(out - ref)))}")

    print("KERNEL_OK")
</pallas_src>

<mosaic_0001>
module attributes {stable_mosaic.version = 11 : i64} {
  func.func @fused_lstm_fc_kernel(%arg0: memref<4x16x64xf32, #tpu.memory_space<vmem>>, %arg1: memref<4x64x64xbf16, #tpu.memory_space<vmem>>, %arg2: memref<4x128x64xbf16, #tpu.memory_space<vmem>>, %arg3: memref<4x1x64xf32, #tpu.memory_space<vmem>>, %arg4: memref<64x2xbf16, #tpu.memory_space<vmem>>, %arg5: memref<1x2xf32, #tpu.memory_space<vmem>>, %arg6: memref<16x2xf32, #tpu.memory_space<vmem>>) attributes {dimension_semantics = [], scalar_prefetch = 0 : i64, scratch_operands = 0 : i64, tpu.core_type = #tpu.core_type<tc>} {
    %c0 = arith.constant 0 : index
    %c0_0 = arith.constant 0 : index
    %c0_1 = arith.constant 0 : index
    %0 = vector.load %arg1[%c0, %c0_0, %c0_1] : memref<4x64x64xbf16, #tpu.memory_space<vmem>>, vector<1x64x64xbf16>
    %1 = vector.shape_cast %0 : vector<1x64x64xbf16> to vector<64x64xbf16>
    %c1 = arith.constant 1 : index
    %c0_2 = arith.constant 0 : index
    %c0_3 = arith.constant 0 : index
    %2 = vector.load %arg1[%c1, %c0_2, %c0_3] : memref<4x64x64xbf16, #tpu.memory_space<vmem>>, vector<1x64x64xbf16>
    %3 = vector.shape_cast %2 : vector<1x64x64xbf16> to vector<64x64xbf16>
    %c2 = arith.constant 2 : index
    %c0_4 = arith.constant 0 : index
    %c0_5 = arith.constant 0 : index
    %4 = vector.load %arg1[%c2, %c0_4, %c0_5] : memref<4x64x64xbf16, #tpu.memory_space<vmem>>, vector<1x64x64xbf16>
    %5 = vector.shape_cast %4 : vector<1x64x64xbf16> to vector<64x64xbf16>
    %c3 = arith.constant 3 : index
    %c0_6 = arith.constant 0 : index
    %c0_7 = arith.constant 0 : index
    %6 = vector.load %arg1[%c3, %c0_6, %c0_7] : memref<4x64x64xbf16, #tpu.memory_space<vmem>>, vector<1x64x64xbf16>
    %7 = vector.shape_cast %6 : vector<1x64x64xbf16> to vector<64x64xbf16>
    %c0_8 = arith.constant 0 : index
    %c0_9 = arith.constant 0 : index
    %c0_10 = arith.constant 0 : index
    %8 = vector.load %arg2[%c0_8, %c0_9, %c0_10] : memref<4x128x64xbf16, #tpu.memory_space<vmem>>, vector<1x128x64xbf16>
    %9 = vector.shape_cast %8 : vector<1x128x64xbf16> to vector<128x64xbf16>
    %c1_11 = arith.constant 1 : index
    %c0_12 = arith.constant 0 : index
    %c0_13 = arith.constant 0 : index
    %10 = vector.load %arg2[%c1_11, %c0_12, %c0_13] : memref<4x128x64xbf16, #tpu.memory_space<vmem>>, vector<1x128x64xbf16>
    %11 = vector.shape_cast %10 : vector<1x128x64xbf16> to vector<128x64xbf16>
    %c2_14 = arith.constant 2 : index
    %c0_15 = arith.constant 0 : index
    %c0_16 = arith.constant 0 : index
    %12 = vector.load %arg2[%c2_14, %c0_15, %c0_16] : memref<4x128x64xbf16, #tpu.memory_space<vmem>>, vector<1x128x64xbf16>
    %13 = vector.shape_cast %12 : vector<1x128x64xbf16> to vector<128x64xbf16>
    %c3_17 = arith.constant 3 : index
    %c0_18 = arith.constant 0 : index
    %c0_19 = arith.constant 0 : index
    %14 = vector.load %arg2[%c3_17, %c0_18, %c0_19] : memref<4x128x64xbf16, #tpu.memory_space<vmem>>, vector<1x128x64xbf16>
    %15 = vector.shape_cast %14 : vector<1x128x64xbf16> to vector<128x64xbf16>
    %c0_20 = arith.constant 0 : index
    %c0_21 = arith.constant 0 : index
    %c0_22 = arith.constant 0 : index
    %16 = vector.load %arg3[%c0_20, %c0_21, %c0_22] : memref<4x1x64xf32, #tpu.memory_space<vmem>>, vector<1x1x64xf32>
    %17 = vector.shape_cast %16 : vector<1x1x64xf32> to vector<1x64xf32>
    %18 = vector.shape_cast %17 : vector<1x64xf32> to vector<1x64xf32>
    %19 = vector.broadcast %18 : vector<1x64xf32> to vector<2x64xf32>
    %c1_23 = arith.constant 1 : index
    %c0_24 = arith.constant 0 : index
    %c0_25 = arith.constant 0 : index
    %20 = vector.load %arg3[%c1_23, %c0_24, %c0_25] : memref<4x1x64xf32, #tpu.memory_space<vmem>>, vector<1x1x64xf32>
    %21 = vector.shape_cast %20 : vector<1x1x64xf32> to vector<1x64xf32>
    %22 = vector.shape_cast %21 : vector<1x64xf32> to vector<1x64xf32>
    %23 = vector.broadcast %22 : vector<1x64xf32> to vector<2x64xf32>
    %c2_26 = arith.constant 2 : index
    %c0_27 = arith.constant 0 : index
    %c0_28 = arith.constant 0 : index
    %24 = vector.load %arg3[%c2_26, %c0_27, %c0_28] : memref<4x1x64xf32, #tpu.memory_space<vmem>>, vector<1x1x64xf32>
    %25 = vector.shape_cast %24 : vector<1x1x64xf32> to vector<1x64xf32>
    %26 = vector.shape_cast %25 : vector<1x64xf32> to vector<1x64xf32>
    %27 = vector.broadcast %26 : vector<1x64xf32> to vector<2x64xf32>
    %c3_29 = arith.constant 3 : index
    %c0_30 = arith.constant 0 : index
    %c0_31 = arith.constant 0 : index
    %28 = vector.load %arg3[%c3_29, %c0_30, %c0_31] : memref<4x1x64xf32, #tpu.memory_space<vmem>>, vector<1x1x64xf32>
    %29 = vector.shape_cast %28 : vector<1x1x64xf32> to vector<1x64xf32>
    %30 = vector.shape_cast %29 : vector<1x64xf32> to vector<1x64xf32>
    %31 = vector.broadcast %30 : vector<1x64xf32> to vector<2x64xf32>
    %cst = arith.constant 0.000000e+00 : f32
    %32 = vector.broadcast %cst : f32 to vector<2x64xf32>
    %cst_32 = arith.constant 0.000000e+00 : f32
    %33 = vector.broadcast %cst_32 : f32 to vector<2x64xf32>
    %cst_33 = arith.constant 0.000000e+00 : f32
    %34 = vector.broadcast %cst_33 : f32 to vector<2x64xf32>
    %cst_34 = arith.constant 0.000000e+00 : f32
    %35 = vector.broadcast %cst_34 : f32 to vector<2x64xf32>
    %36 = arith.truncf %32 : vector<2x64xf32> to vector<2x64xbf16>
    %c0_35 = arith.constant 0 : index
    %c0_36 = arith.constant 0 : index
    %c0_37 = arith.constant 0 : index
    %37 = vector.load %arg0[%c0_35, %c0_36, %c0_37] : memref<4x16x64xf32, #tpu.memory_space<vmem>>, vector<1x2x64xf32>
    %38 = vector.shape_cast %37 : vector<1x2x64xf32> to vector<2x64xf32>
    %cst_38 = arith.constant dense<0.000000e+00> : vector<2x64xf32>
    %39 = tpu.matmul %36, %1, %cst_38 {dimension_numbers = #tpu.dot_dimension_numbers<[1], [0], [0], [1], [0, 0, 1, 1], [], []>} : vector<2x64xbf16>, vector<64x64xbf16>, vector<2x64xf32> -> vector<2x64xf32>
    %40 = arith.addf %38, %39 : vector<2x64xf32>
    %c1_39 = arith.constant 1 : index
    %c0_40 = arith.constant 0 : index
    %c0_41 = arith.constant 0 : index
    %41 = vector.load %arg0[%c1_39, %c0_40, %c0_41] : memref<4x16x64xf32, #tpu.memory_space<vmem>>, vector<1x2x64xf32>
    %42 = vector.shape_cast %41 : vector<1x2x64xf32> to vector<2x64xf32>
    %cst_42 = arith.constant dense<0.000000e+00> : vector<2x64xf32>
    %43 = tpu.matmul %36, %3, %cst_42 {dimension_numbers = #tpu.dot_dimension_numbers<[1], [0], [0], [1], [0, 0, 1, 1], [], []>} : vector<2x64xbf16>, vector<64x64xbf16>, vector<2x64xf32> -> vector<2x64xf32>
    %44 = arith.addf %42, %43 : vector<2x64xf32>
    %c2_43 = arith.constant 2 : index
    %c0_44 = arith.constant 0 : index
    %c0_45 = arith.constant 0 : index
    %45 = vector.load %arg0[%c2_43, %c0_44, %c0_45] : memref<4x16x64xf32, #tpu.memory_space<vmem>>, vector<1x2x64xf32>
    %46 = vector.shape_cast %45 : vector<1x2x64xf32> to vector<2x64xf32>
    %cst_46 = arith.constant dense<0.000000e+00> : vector<2x64xf32>
    %47 = tpu.matmul %36, %5, %cst_46 {dimension_numbers = #tpu.dot_dimension_numbers<[1], [0], [0], [1], [0, 0, 1, 1], [], []>} : vector<2x64xbf16>, vector<64x64xbf16>, vector<2x64xf32> -> vector<2x64xf32>
    %48 = arith.addf %46, %47 : vector<2x64xf32>
    %c3_47 = arith.constant 3 : index
    %c0_48 = arith.constant 0 : index
    %c0_49 = arith.constant 0 : index
    %49 = vector.load %arg0[%c3_47, %c0_48, %c0_49] : memref<4x16x64xf32, #tpu.memory_space<vmem>>, vector<1x2x64xf32>
    %50 = vector.shape_cast %49 : vector<1x2x64xf32> to vector<2x64xf32>
    %cst_50 = arith.constant dense<0.000000e+00> : vector<2x64xf32>
    %51 = tpu.matmul %36, %7, %cst_50 {dimension_numbers = #tpu.dot_dimension_numbers<[1], [0], [0], [1], [0, 0, 1, 1], [], []>} : vector<2x64xbf16>, vector<64x64xbf16>, vector<2x64xf32> -> vector<2x64xf32>
    %52 = arith.addf %50, %51 : vector<2x64xf32>
    %cst_51 = arith.constant 5.000000e-01 : f32
    %53 = vector.broadcast %cst_51 : f32 to vector<2x64xf32>
    %54 = arith.mulf %40, %53 : vector<2x64xf32>
    %cst_52 = arith.constant 5.000000e-01 : f32
    %55 = vector.broadcast %cst_52 : f32 to vector<2x64xf32>
    %56 = arith.mulf %44, %55 : vector<2x64xf32>
    %cst_53 = arith.constant 5.000000e-01 : f32
    %57 = vector.broadcast %cst_53 : f32 to vector<2x64xf32>
    %58 = arith.mulf %52, %57 : vector<2x64xf32>
    %59 = tpu.concatenate %54, %56, %58, %48 in 0 : vector<2x64xf32>, vector<2x64xf32>, vector<2x64xf32>, vector<2x64xf32> -> vector<8x64xf32>
    %60 = math.tanh %59 : vector<8x64xf32>
    %61 = vector.extract_strided_slice %60 {offsets = [0, 0], sizes = [2, 64], strides = [1, 1]} : vector<8x64xf32> to vector<2x64xf32>
    %cst_54 = arith.constant 5.000000e-01 : f32
    %62 = vector.broadcast %cst_54 : f32 to vector<2x64xf32>
    %63 = arith.mulf %61, %62 : vector<2x64xf32>
    %cst_55 = arith.constant 5.000000e-01 : f32
    %64 = vector.broadcast %cst_55 : f32 to vector<2x64xf32>
    %65 = arith.addf %63, %64 : vector<2x64xf32>
    %66 = vector.extract_strided_slice %60 {offsets = [2, 0], sizes = [2, 64], strides = [1, 1]} : vector<8x64xf32> to vector<2x64xf32>
    %cst_56 = arith.constant 5.000000e-01 : f32
    %67 = vector.broadcast %cst_56 : f32 to vector<2x64xf32>
    %68 = arith.mulf %66, %67 : vector<2x64xf32>
    %cst_57 = arith.constant 5.000000e-01 : f32
    %69 = vector.broadcast %cst_57 : f32 to vector<2x64xf32>
    %70 = arith.addf %68, %69 : vector<2x64xf32>
    %71 = vector.extract_strided_slice %60 {offsets = [4, 0], sizes = [2, 64], strides = [1, 1]} : vector<8x64xf32> to vector<2x64xf32>
    %cst_58 = arith.constant 5.000000e-01 : f32
    %72 = vector.broadcast %cst_58 : f32 to vector<2x64xf32>
    %73 = arith.mulf %71, %72 : vector<2x64xf32>
    %cst_59 = arith.constant 5.000000e-01 : f32
    %74 = vector.broadcast %cst_59 : f32 to vector<2x64xf32>
    %75 = arith.addf %73, %74 : vector<2x64xf32>
    %76 = vector.extract_strided_slice %60 {offsets = [6, 0], sizes = [2, 64], strides = [1, 1]} : vector<8x64xf32> to vector<2x64xf32>
    %77 = arith.mulf %70, %33 : vector<2x64xf32>
    %78 = arith.mulf %65, %76 : vector<2x64xf32>
    %79 = arith.addf %77, %78 : vector<2x64xf32>
    %80 = math.tanh %79 : vector<2x64xf32>
    %81 = arith.mulf %75, %80 : vector<2x64xf32>
    %82 = tpu.concatenate %81, %34 in 1 : vector<2x64xf32>, vector<2x64xf32> -> vector<2x128xf32>
    %83 = arith.truncf %82 : vector<2x128xf32> to vector<2x128xbf16>
    %cst_60 = arith.constant dense<0.000000e+00> : vector<2x64xf32>
    %84 = tpu.matmul %83, %9, %cst_60 {dimension_numbers = #tpu.dot_dimension_numbers<[1], [0], [0], [1], [0, 0, 1, 1], [], []>} : vector<2x128xbf16>, vector<128x64xbf16>, vector<2x64xf32> -> vector<2x64xf32>
    %85 = arith.addf %84, %19 : vector<2x64xf32>
    %cst_61 = arith.constant dense<0.000000e+00> : vector<2x64xf32>
    %86 = tpu.matmul %83, %11, %cst_61 {dimension_numbers = #tpu.dot_dimension_numbers<[1], [0], [0], [1], [0, 0, 1, 1], [], []>} : vector<2x128xbf16>, vector<128x64xbf16>, vector<2x64xf32> -> vector<2x64xf32>
    %87 = arith.addf %86, %23 : vector<2x64xf32>
    %cst_62 = arith.constant dense<0.000000e+00> : vector<2x64xf32>
    %88 = tpu.matmul %83, %13, %cst_62 {dimension_numbers = #tpu.dot_dimension_numbers<[1], [0], [0], [1], [0, 0, 1, 1], [], []>} : vector<2x128xbf16>, vector<128x64xbf16>, vector<2x64xf32> -> vector<2x64xf32>
    %89 = arith.addf %88, %27 : vector<2x64xf32>
    %cst_63 = arith.constant dense<0.000000e+00> : vector<2x64xf32>
    %90 = tpu.matmul %83, %15, %cst_63 {dimension_numbers = #tpu.dot_dimension_numbers<[1], [0], [0], [1], [0, 0, 1, 1], [], []>} : vector<2x128xbf16>, vector<128x64xbf16>, vector<2x64xf32> -> vector<2x64xf32>
    %91 = arith.addf %90, %31 : vector<2x64xf32>
    %cst_64 = arith.constant 5.000000e-01 : f32
    %92 = vector.broadcast %cst_64 : f32 to vector<2x64xf32>
    %93 = arith.mulf %85, %92 : vector<2x64xf32>
    %cst_65 = arith.constant 5.000000e-01 : f32
    %94 = vector.broadcast %cst_65 : f32 to vector<2x64xf32>
    %95 = arith.mulf %87, %94 : vector<2x64xf32>
    %cst_66 = arith.constant 5.000000e-01 : f32
    %96 = vector.broadcast %cst_66 : f32 to vector<2x64xf32>
    %97 = arith.mulf %91, %96 : vector<2x64xf32>
    %98 = tpu.concatenate %93, %95, %97, %89 in 0 : vector<2x64xf32>, vector<2x64xf32>, vector<2x64xf32>, vector<2x64xf32> -> vector<8x64xf32>
    %99 = math.tanh %98 : vector<8x64xf32>
    %100 = vector.extract_strided_slice %99 {offsets = [0, 0], sizes = [2, 64], strides = [1, 1]} : vector<8x64xf32> to vector<2x64xf32>
    %cst_67 = arith.constant 5.000000e-01 : f32
    %101 = vector.broadcast %cst_67 : f32 to vector<2x64xf32>
    %102 = arith.mulf %100, %101 : vector<2x64xf32>
    %cst_68 = arith.constant 5.000000e-01 : f32
    %103 = vector.broadcast %cst_68 : f32 to vector<2x64xf32>
    %104 = arith.addf %102, %103 : vector<2x64xf32>
    %105 = vector.extract_strided_slice %99 {offsets = [2, 0], sizes = [2, 64], strides = [1, 1]} : vector<8x64xf32> to vector<2x64xf32>
    %cst_69 = arith.constant 5.000000e-01 : f32
    %106 = vector.broadcast %cst_69 : f32 to vector<2x64xf32>
    %107 = arith.mulf %105, %106 : vector<2x64xf32>
    %cst_70 = arith.constant 5.000000e-01 : f32
    %108 = vector.broadcast %cst_70 : f32 to vector<2x64xf32>
    %109 = arith.addf %107, %108 : vector<2x64xf32>
    %110 = vector.extract_strided_slice %99 {offsets = [4, 0], sizes = [2, 64], strides = [1, 1]} : vector<8x64xf32> to vector<2x64xf32>
    %cst_71 = arith.constant 5.000000e-01 : f32
    %111 = vector.broadcast %cst_71 : f32 to vector<2x64xf32>
    %112 = arith.mulf %110, %111 : vector<2x64xf32>
    %cst_72 = arith.constant 5.000000e-01 : f32
    %113 = vector.broadcast %cst_72 : f32 to vector<2x64xf32>
    %114 = arith.addf %112, %113 : vector<2x64xf32>
    %115 = vector.extract_strided_slice %99 {offsets = [6, 0], sizes = [2, 64], strides = [1, 1]} : vector<8x64xf32> to vector<2x64xf32>
    %116 = arith.mulf %109, %35 : vector<2x64xf32>
    %117 = arith.mulf %104, %115 : vector<2x64xf32>
    %118 = arith.addf %116, %117 : vector<2x64xf32>
    %119 = math.tanh %118 : vector<2x64xf32>
    %120 = arith.mulf %114, %119 : vector<2x64xf32>
    %121 = arith.truncf %81 : vector<2x64xf32> to vector<2x64xbf16>
    %c0_73 = arith.constant 0 : index
    %c2_74 = arith.constant 2 : index
    %c0_75 = arith.constant 0 : index
    %122 = vector.load %arg0[%c0_73, %c2_74, %c0_75] : memref<4x16x64xf32, #tpu.memory_space<vmem>>, vector<1x2x64xf32>
    %123 = vector.shape_cast %122 : vector<1x2x64xf32> to vector<2x64xf32>
    %cst_76 = arith.constant dense<0.000000e+00> : vector<2x64xf32>
    %124 = tpu.matmul %121, %1, %cst_76 {dimension_numbers = #tpu.dot_dimension_numbers<[1], [0], [0], [1], [0, 0, 1, 1], [], []>} : vector<2x64xbf16>, vector<64x64xbf16>, vector<2x64xf32> -> vector<2x64xf32>
    %125 = arith.addf %123, %124 : vector<2x64xf32>
    %c1_77 = arith.constant 1 : index
    %c2_78 = arith.constant 2 : index
    %c0_79 = arith.constant 0 : index
    %126 = vector.load %arg0[%c1_77, %c2_78, %c0_79] : memref<4x16x64xf32, #tpu.memory_space<vmem>>, vector<1x2x64xf32>
    %127 = vector.shape_cast %126 : vector<1x2x64xf32> to vector<2x64xf32>
    %cst_80 = arith.constant dense<0.000000e+00> : vector<2x64xf32>
    %128 = tpu.matmul %121, %3, %cst_80 {dimension_numbers = #tpu.dot_dimension_numbers<[1], [0], [0], [1], [0, 0, 1, 1], [], []>} : vector<2x64xbf16>, vector<64x64xbf16>, vector<2x64xf32> -> vector<2x64xf32>
    %129 = arith.addf %127, %128 : vector<2x64xf32>
    %c2_81 = arith.constant 2 : index
    %c2_82 = arith.constant 2 : index
    %c0_83 = arith.constant 0 : index
    %130 = vector.load %arg0[%c2_81, %c2_82, %c0_83] : memref<4x16x64xf32, #tpu.memory_space<vmem>>, vector<1x2x64xf32>
    %131 = vector.shape_cast %130 : vector<1x2x64xf32> to vector<2x64xf32>
    %cst_84 = arith.constant dense<0.000000e+00> : vector<2x64xf32>
    %132 = tpu.matmul %121, %5, %cst_84 {dimension_numbers = #tpu.dot_dimension_numbers<[1], [0], [0], [1], [0, 0, 1, 1], [], []>} : vector<2x64xbf16>, vector<64x64xbf16>, vector<2x64xf32> -> vector<2x64xf32>
    %133 = arith.addf %131, %132 : vector<2x64xf32>
    %c3_85 = arith.constant 3 : index
    %c2_86 = arith.constant 2 : index
    %c0_87 = arith.constant 0 : index
    %134 = vector.load %arg0[%c3_85, %c2_86, %c0_87] : memref<4x16x64xf32, #tpu.memory_space<vmem>>, vector<1x2x64xf32>
    %135 = vector.shape_cast %134 : vector<1x2x64xf32> to vector<2x64xf32>
    %cst_88 = arith.constant dense<0.000000e+00> : vector<2x64xf32>
    %136 = tpu.matmul %121, %7, %cst_88 {dimension_numbers = #tpu.dot_dimension_numbers<[1], [0], [0], [1], [0, 0, 1, 1], [], []>} : vector<2x64xbf16>, vector<64x64xbf16>, vector<2x64xf32> -> vector<2x64xf32>
    %137 = arith.addf %135, %136 : vector<2x64xf32>
    %cst_89 = arith.constant 5.000000e-01 : f32
    %138 = vector.broadcast %cst_89 : f32 to vector<2x64xf32>
    %139 = arith.mulf %125, %138 : vector<2x64xf32>
    %cst_90 = arith.constant 5.000000e-01 : f32
    %140 = vector.broadcast %cst_90 : f32 to vector<2x64xf32>
    %141 = arith.mulf %129, %140 : vector<2x64xf32>
    %cst_91 = arith.constant 5.000000e-01 : f32
    %142 = vector.broadcast %cst_91 : f32 to vector<2x64xf32>
    %143 = arith.mulf %137, %142 : vector<2x64xf32>
    %144 = tpu.concatenate %139, %141, %143, %133 in 0 : vector<2x64xf32>, vector<2x64xf32>, vector<2x64xf32>, vector<2x64xf32> -> vector<8x64xf32>
    %145 = math.tanh %144 : vector<8x64xf32>
    %146 = vector.extract_strided_slice %145 {offsets = [0, 0], sizes = [2, 64], strides = [1, 1]} : vector<8x64xf32> to vector<2x64xf32>
    %cst_92 = arith.constant 5.000000e-01 : f32
    %147 = vector.broadcast %cst_92 : f32 to vector<2x64xf32>
    %148 = arith.mulf %146, %147 : vector<2x64xf32>
    %cst_93 = arith.constant 5.000000e-01 : f32
    %149 = vector.broadcast %cst_93 : f32 to vector<2x64xf32>
    %150 = arith.addf %148, %149 : vector<2x64xf32>
    %151 = vector.extract_strided_slice %145 {offsets = [2, 0], sizes = [2, 64], strides = [1, 1]} : vector<8x64xf32> to vector<2x64xf32>
    %cst_94 = arith.constant 5.000000e-01 : f32
    %152 = vector.broadcast %cst_94 : f32 to vector<2x64xf32>
    %153 = arith.mulf %151, %152 : vector<2x64xf32>
    %cst_95 = arith.constant 5.000000e-01 : f32
    %154 = vector.broadcast %cst_95 : f32 to vector<2x64xf32>
    %155 = arith.addf %153, %154 : vector<2x64xf32>
    %156 = vector.extract_strided_slice %145 {offsets = [4, 0], sizes = [2, 64], strides = [1, 1]} : vector<8x64xf32> to vector<2x64xf32>
    %cst_96 = arith.constant 5.000000e-01 : f32
    %157 = vector.broadcast %cst_96 : f32 to vector<2x64xf32>
    %158 = arith.mulf %156, %157 : vector<2x64xf32>
    %cst_97 = arith.constant 5.000000e-01 : f32
    %159 = vector.broadcast %cst_97 : f32 to vector<2x64xf32>
    %160 = arith.addf %158, %159 : vector<2x64xf32>
    %161 = vector.extract_strided_slice %145 {offsets = [6, 0], sizes = [2, 64], strides = [1, 1]} : vector<8x64xf32> to vector<2x64xf32>
    %162 = arith.mulf %155, %79 : vector<2x64xf32>
    %163 = arith.mulf %150, %161 : vector<2x64xf32>
    %164 = arith.addf %162, %163 : vector<2x64xf32>
    %165 = math.tanh %164 : vector<2x64xf32>
    %166 = arith.mulf %160, %165 : vector<2x64xf32>
    %167 = tpu.concatenate %166, %120 in 1 : vector<2x64xf32>, vector<2x64xf32> -> vector<2x128xf32>
    %168 = arith.truncf %167 : vector<2x128xf32> to vector<2x128xbf16>
    %cst_98 = arith.constant dense<0.000000e+00> : vector<2x64xf32>
    %169 = tpu.matmul %168, %9, %cst_98 {dimension_numbers = #tpu.dot_dimension_numbers<[1], [0], [0], [1], [0, 0, 1, 1], [], []>} : vector<2x128xbf16>, vector<128x64xbf16>, vector<2x64xf32> -> vector<2x64xf32>
    %170 = arith.addf %169, %19 : vector<2x64xf32>
    %cst_99 = arith.constant dense<0.000000e+00> : vector<2x64xf32>
    %171 = tpu.matmul %168, %11, %cst_99 {dimension_numbers = #tpu.dot_dimension_numbers<[1], [0], [0], [1], [0, 0, 1, 1], [], []>} : vector<2x128xbf16>, vector<128x64xbf16>, vector<2x64xf32> -> vector<2x64xf32>
    %172 = arith.addf %171, %23 : vector<2x64xf32>
    %cst_100 = arith.constant dense<0.000000e+00> : vector<2x64xf32>
    %173 = tpu.matmul %168, %13, %cst_100 {dimension_numbers = #tpu.dot_dimension_numbers<[1], [0], [0], [1], [0, 0, 1, 1], [], []>} : vector<2x128xbf16>, vector<128x64xbf16>, vector<2x64xf32> -> vector<2x64xf32>
    %174 = arith.addf %173, %27 : vector<2x64xf32>
    %cst_101 = arith.constant dense<0.000000e+00> : vector<2x64xf32>
    %175 = tpu.matmul %168, %15, %cst_101 {dimension_numbers = #tpu.dot_dimension_numbers<[1], [0], [0], [1], [0, 0, 1, 1], [], []>} : vector<2x128xbf16>, vector<128x64xbf16>, vector<2x64xf32> -> vector<2x64xf32>
    %176 = arith.addf %175, %31 : vector<2x64xf32>
    %cst_102 = arith.constant 5.000000e-01 : f32
    %177 = vector.broadcast %cst_102 : f32 to vector<2x64xf32>
    %178 = arith.mulf %170, %177 : vector<2x64xf32>
    %cst_103 = arith.constant 5.000000e-01 : f32
    %179 = vector.broadcast %cst_103 : f32 to vector<2x64xf32>
    %180 = arith.mulf %172, %179 : vector<2x64xf32>
    %cst_104 = arith.constant 5.000000e-01 : f32
    %181 = vector.broadcast %cst_104 : f32 to vector<2x64xf32>
    %182 = arith.mulf %176, %181 : vector<2x64xf32>
    %183 = tpu.concatenate %178, %180, %182, %174 in 0 : vector<2x64xf32>, vector<2x64xf32>, vector<2x64xf32>, vector<2x64xf32> -> vector<8x64xf32>
    %184 = math.tanh %183 : vector<8x64xf32>
    %185 = vector.extract_strided_slice %184 {offsets = [0, 0], sizes = [2, 64], strides = [1, 1]} : vector<8x64xf32> to vector<2x64xf32>
    %cst_105 = arith.constant 5.000000e-01 : f32
    %186 = vector.broadcast %cst_105 : f32 to vector<2x64xf32>
    %187 = arith.mulf %185, %186 : vector<2x64xf32>
    %cst_106 = arith.constant 5.000000e-01 : f32
    %188 = vector.broadcast %cst_106 : f32 to vector<2x64xf32>
    %189 = arith.addf %187, %188 : vector<2x64xf32>
    %190 = vector.extract_strided_slice %184 {offsets = [2, 0], sizes = [2, 64], strides = [1, 1]} : vector<8x64xf32> to vector<2x64xf32>
    %cst_107 = arith.constant 5.000000e-01 : f32
    %191 = vector.broadcast %cst_107 : f32 to vector<2x64xf32>
    %192 = arith.mulf %190, %191 : vector<2x64xf32>
    %cst_108 = arith.constant 5.000000e-01 : f32
    %193 = vector.broadcast %cst_108 : f32 to vector<2x64xf32>
    %194 = arith.addf %192, %193 : vector<2x64xf32>
    %195 = vector.extract_strided_slice %184 {offsets = [4, 0], sizes = [2, 64], strides = [1, 1]} : vector<8x64xf32> to vector<2x64xf32>
    %cst_109 = arith.constant 5.000000e-01 : f32
    %196 = vector.broadcast %cst_109 : f32 to vector<2x64xf32>
    %197 = arith.mulf %195, %196 : vector<2x64xf32>
    %cst_110 = arith.constant 5.000000e-01 : f32
    %198 = vector.broadcast %cst_110 : f32 to vector<2x64xf32>
    %199 = arith.addf %197, %198 : vector<2x64xf32>
    %200 = vector.extract_strided_slice %184 {offsets = [6, 0], sizes = [2, 64], strides = [1, 1]} : vector<8x64xf32> to vector<2x64xf32>
    %201 = arith.mulf %194, %118 : vector<2x64xf32>
    %202 = arith.mulf %189, %200 : vector<2x64xf32>
    %203 = arith.addf %201, %202 : vector<2x64xf32>
    %204 = math.tanh %203 : vector<2x64xf32>
    %205 = arith.mulf %199, %204 : vector<2x64xf32>
    %206 = arith.truncf %166 : vector<2x64xf32> to vector<2x64xbf16>
    %c0_111 = arith.constant 0 : index
    %c4 = arith.constant 4 : index
    %c0_112 = arith.constant 0 : index
    %207 = vector.load %arg0[%c0_111, %c4, %c0_112] : memref<4x16x64xf32, #tpu.memory_space<vmem>>, vector<1x2x64xf32>
    %208 = vector.shape_cast %207 : vector<1x2x64xf32> to vector<2x64xf32>
    %cst_113 = arith.constant dense<0.000000e+00> : vector<2x64xf32>
    %209 = tpu.matmul %206, %1, %cst_113 {dimension_numbers = #tpu.dot_dimension_numbers<[1], [0], [0], [1], [0, 0, 1, 1], [], []>} : vector<2x64xbf16>, vector<64x64xbf16>, vector<2x64xf32> -> vector<2x64xf32>
    %210 = arith.addf %208, %209 : vector<2x64xf32>
    %c1_114 = arith.constant 1 : index
    %c4_115 = arith.constant 4 : index
    %c0_116 = arith.constant 0 : index
    %211 = vector.load %arg0[%c1_114, %c4_115, %c0_116] : memref<4x16x64xf32, #tpu.memory_space<vmem>>, vector<1x2x64xf32>
    %212 = vector.shape_cast %211 : vector<1x2x64xf32> to vector<2x64xf32>
    %cst_117 = arith.constant dense<0.000000e+00> : vector<2x64xf32>
    %213 = tpu.matmul %206, %3, %cst_117 {dimension_numbers = #tpu.dot_dimension_numbers<[1], [0], [0], [1], [0, 0, 1, 1], [], []>} : vector<2x64xbf16>, vector<64x64xbf16>, vector<2x64xf32> -> vector<2x64xf32>
    %214 = arith.addf %212, %213 : vector<2x64xf32>
    %c2_118 = arith.constant 2 : index
    %c4_119 = arith.constant 4 : index
    %c0_120 = arith.constant 0 : index
    %215 = vector.load %arg0[%c2_118, %c4_119, %c0_120] : memref<4x16x64xf32, #tpu.memory_space<vmem>>, vector<1x2x64xf32>
    %216 = vector.shape_cast %215 : vector<1x2x64xf32> to vector<2x64xf32>
    %cst_121 = arith.constant dense<0.000000e+00> : vector<2x64xf32>
    %217 = tpu.matmul %206, %5, %cst_121 {dimension_numbers = #tpu.dot_dimension_numbers<[1], [0], [0], [1], [0, 0, 1, 1], [], []>} : vector<2x64xbf16>, vector<64x64xbf16>, vector<2x64xf32> -> vector<2x64xf32>
    %218 = arith.addf %216, %217 : vector<2x64xf32>
    %c3_122 = arith.constant 3 : index
    %c4_123 = arith.constant 4 : index
    %c0_124 = arith.constant 0 : index
    %219 = vector.load %arg0[%c3_122, %c4_123, %c0_124] : memref<4x16x64xf32, #tpu.memory_space<vmem>>, vector<1x2x64xf32>
    %220 = vector.shape_cast %219 : vector<1x2x64xf32> to vector<2x64xf32>
    %cst_125 = arith.constant dense<0.000000e+00> : vector<2x64xf32>
    %221 = tpu.matmul %206, %7, %cst_125 {dimension_numbers = #tpu.dot_dimension_numbers<[1], [0], [0], [1], [0, 0, 1, 1], [], []>} : vector<2x64xbf16>, vector<64x64xbf16>, vector<2x64xf32> -> vector<2x64xf32>
    %222 = arith.addf %220, %221 : vector<2x64xf32>
    %cst_126 = arith.constant 5.000000e-01 : f32
    %223 = vector.broadcast %cst_126 : f32 to vector<2x64xf32>
    %224 = arith.mulf %210, %223 : vector<2x64xf32>
    %cst_127 = arith.constant 5.000000e-01 : f32
    %225 = vector.broadcast %cst_127 : f32 to vector<2x64xf32>
    %226 = arith.mulf %214, %225 : vector<2x64xf32>
    %cst_128 = arith.constant 5.000000e-01 : f32
    %227 = vector.broadcast %cst_128 : f32 to vector<2x64xf32>
    %228 = arith.mulf %222, %227 : vector<2x64xf32>
    %229 = tpu.concatenate %224, %226, %228, %218 in 0 : vector<2x64xf32>, vector<2x64xf32>, vector<2x64xf32>, vector<2x64xf32> -> vector<8x64xf32>
    %230 = math.tanh %229 : vector<8x64xf32>
    %231 = vector.extract_strided_slice %230 {offsets = [0, 0], sizes = [2, 64], strides = [1, 1]} : vector<8x64xf32> to vector<2x64xf32>
    %cst_129 = arith.constant 5.000000e-01 : f32
    %232 = vector.broadcast %cst_129 : f32 to vector<2x64xf32>
    %233 = arith.mulf %231, %232 : vector<2x64xf32>
    %cst_130 = arith.constant 5.000000e-01 : f32
    %234 = vector.broadcast %cst_130 : f32 to vector<2x64xf32>
    %235 = arith.addf %233, %234 : vector<2x64xf32>
    %236 = vector.extract_strided_slice %230 {offsets = [2, 0], sizes = [2, 64], strides = [1, 1]} : vector<8x64xf32> to vector<2x64xf32>
    %cst_131 = arith.constant 5.000000e-01 : f32
    %237 = vector.broadcast %cst_131 : f32 to vector<2x64xf32>
    %238 = arith.mulf %236, %237 : vector<2x64xf32>
    %cst_132 = arith.constant 5.000000e-01 : f32
    %239 = vector.broadcast %cst_132 : f32 to vector<2x64xf32>
    %240 = arith.addf %238, %239 : vector<2x64xf32>
    %241 = vector.extract_strided_slice %230 {offsets = [4, 0], sizes = [2, 64], strides = [1, 1]} : vector<8x64xf32> to vector<2x64xf32>
    %cst_133 = arith.constant 5.000000e-01 : f32
    %242 = vector.broadcast %cst_133 : f32 to vector<2x64xf32>
    %243 = arith.mulf %241, %242 : vector<2x64xf32>
    %cst_134 = arith.constant 5.000000e-01 : f32
    %244 = vector.broadcast %cst_134 : f32 to vector<2x64xf32>
    %245 = arith.addf %243, %244 : vector<2x64xf32>
    %246 = vector.extract_strided_slice %230 {offsets = [6, 0], sizes = [2, 64], strides = [1, 1]} : vector<8x64xf32> to vector<2x64xf32>
    %247 = arith.mulf %240, %164 : vector<2x64xf32>
    %248 = arith.mulf %235, %246 : vector<2x64xf32>
    %249 = arith.addf %247, %248 : vector<2x64xf32>
    %250 = math.tanh %249 : vector<2x64xf32>
    %251 = arith.mulf %245, %250 : vector<2x64xf32>
    %252 = tpu.concatenate %251, %205 in 1 : vector<2x64xf32>, vector<2x64xf32> -> vector<2x128xf32>
    %253 = arith.truncf %252 : vector<2x128xf32> to vector<2x128xbf16>
    %cst_135 = arith.constant dense<0.000000e+00> : vector<2x64xf32>
    %254 = tpu.matmul %253, %9, %cst_135 {dimension_numbers = #tpu.dot_dimension_numbers<[1], [0], [0], [1], [0, 0, 1, 1], [], []>} : vector<2x128xbf16>, vector<128x64xbf16>, vector<2x64xf32> -> vector<2x64xf32>
    %255 = arith.addf %254, %19 : vector<2x64xf32>
    %cst_136 = arith.constant dense<0.000000e+00> : vector<2x64xf32>
    %256 = tpu.matmul %253, %11, %cst_136 {dimension_numbers = #tpu.dot_dimension_numbers<[1], [0], [0], [1], [0, 0, 1, 1], [], []>} : vector<2x128xbf16>, vector<128x64xbf16>, vector<2x64xf32> -> vector<2x64xf32>
    %257 = arith.addf %256, %23 : vector<2x64xf32>
    %cst_137 = arith.constant dense<0.000000e+00> : vector<2x64xf32>
    %258 = tpu.matmul %253, %13, %cst_137 {dimension_numbers = #tpu.dot_dimension_numbers<[1], [0], [0], [1], [0, 0, 1, 1], [], []>} : vector<2x128xbf16>, vector<128x64xbf16>, vector<2x64xf32> -> vector<2x64xf32>
    %259 = arith.addf %258, %27 : vector<2x64xf32>
    %cst_138 = arith.constant dense<0.000000e+00> : vector<2x64xf32>
    %260 = tpu.matmul %253, %15, %cst_138 {dimension_numbers = #tpu.dot_dimension_numbers<[1], [0], [0], [1], [0, 0, 1, 1], [], []>} : vector<2x128xbf16>, vector<128x64xbf16>, vector<2x64xf32> -> vector<2x64xf32>
    %261 = arith.addf %260, %31 : vector<2x64xf32>
    %cst_139 = arith.constant 5.000000e-01 : f32
    %262 = vector.broadcast %cst_139 : f32 to vector<2x64xf32>
    %263 = arith.mulf %255, %262 : vector<2x64xf32>
    %cst_140 = arith.constant 5.000000e-01 : f32
    %264 = vector.broadcast %cst_140 : f32 to vector<2x64xf32>
    %265 = arith.mulf %257, %264 : vector<2x64xf32>
    %cst_141 = arith.constant 5.000000e-01 : f32
    %266 = vector.broadcast %cst_141 : f32 to vector<2x64xf32>
    %267 = arith.mulf %261, %266 : vector<2x64xf32>
    %268 = tpu.concatenate %263, %265, %267, %259 in 0 : vector<2x64xf32>, vector<2x64xf32>, vector<2x64xf32>, vector<2x64xf32> -> vector<8x64xf32>
    %269 = math.tanh %268 : vector<8x64xf32>
    %270 = vector.extract_strided_slice %269 {offsets = [0, 0], sizes = [2, 64], strides = [1, 1]} : vector<8x64xf32> to vector<2x64xf32>
    %cst_142 = arith.constant 5.000000e-01 : f32
    %271 = vector.broadcast %cst_142 : f32 to vector<2x64xf32>
    %272 = arith.mulf %270, %271 : vector<2x64xf32>
    %cst_143 = arith.constant 5.000000e-01 : f32
    %273 = vector.broadcast %cst_143 : f32 to vector<2x64xf32>
    %274 = arith.addf %272, %273 : vector<2x64xf32>
    %275 = vector.extract_strided_slice %269 {offsets = [2, 0], sizes = [2, 64], strides = [1, 1]} : vector<8x64xf32> to vector<2x64xf32>
    %cst_144 = arith.constant 5.000000e-01 : f32
    %276 = vector.broadcast %cst_144 : f32 to vector<2x64xf32>
    %277 = arith.mulf %275, %276 : vector<2x64xf32>
    %cst_145 = arith.constant 5.000000e-01 : f32
    %278 = vector.broadcast %cst_145 : f32 to vector<2x64xf32>
    %279 = arith.addf %277, %278 : vector<2x64xf32>
    %280 = vector.extract_strided_slice %269 {offsets = [4, 0], sizes = [2, 64], strides = [1, 1]} : vector<8x64xf32> to vector<2x64xf32>
    %cst_146 = arith.constant 5.000000e-01 : f32
    %281 = vector.broadcast %cst_146 : f32 to vector<2x64xf32>
    %282 = arith.mulf %280, %281 : vector<2x64xf32>
    %cst_147 = arith.constant 5.000000e-01 : f32
    %283 = vector.broadcast %cst_147 : f32 to vector<2x64xf32>
    %284 = arith.addf %282, %283 : vector<2x64xf32>
    %285 = vector.extract_strided_slice %269 {offsets = [6, 0], sizes = [2, 64], strides = [1, 1]} : vector<8x64xf32> to vector<2x64xf32>
    %286 = arith.mulf %279, %203 : vector<2x64xf32>
    %287 = arith.mulf %274, %285 : vector<2x64xf32>
    %288 = arith.addf %286, %287 : vector<2x64xf32>
    %289 = math.tanh %288 : vector<2x64xf32>
    %290 = arith.mulf %284, %289 : vector<2x64xf32>
    %291 = arith.truncf %251 : vector<2x64xf32> to vector<2x64xbf16>
    %c0_148 = arith.constant 0 : index
    %c6 = arith.constant 6 : index
    %c0_149 = arith.constant 0 : index
    %292 = vector.load %arg0[%c0_148, %c6, %c0_149] : memref<4x16x64xf32, #tpu.memory_space<vmem>>, vector<1x2x64xf32>
    %293 = vector.shape_cast %292 : vector<1x2x64xf32> to vector<2x64xf32>
    %cst_150 = arith.constant dense<0.000000e+00> : vector<2x64xf32>
    %294 = tpu.matmul %291, %1, %cst_150 {dimension_numbers = #tpu.dot_dimension_numbers<[1], [0], [0], [1], [0, 0, 1, 1], [], []>} : vector<2x64xbf16>, vector<64x64xbf16>, vector<2x64xf32> -> vector<2x64xf32>
    %295 = arith.addf %293, %294 : vector<2x64xf32>
    %c1_151 = arith.constant 1 : index
    %c6_152 = arith.constant 6 : index
    %c0_153 = arith.constant 0 : index
    %296 = vector.load %arg0[%c1_151, %c6_152, %c0_153] : memref<4x16x64xf32, #tpu.memory_space<vmem>>, vector<1x2x64xf32>
    %297 = vector.shape_cast %296 : vector<1x2x64xf32> to vector<2x64xf32>
    %cst_154 = arith.constant dense<0.000000e+00> : vector<2x64xf32>
    %298 = tpu.matmul %291, %3, %cst_154 {dimension_numbers = #tpu.dot_dimension_numbers<[1], [0], [0], [1], [0, 0, 1, 1], [], []>} : vector<2x64xbf16>, vector<64x64xbf16>, vector<2x64xf32> -> vector<2x64xf32>
    %299 = arith.addf %297, %298 : vector<2x64xf32>
    %c2_155 = arith.constant 2 : index
    %c6_156 = arith.constant 6 : index
    %c0_157 = arith.constant 0 : index
    %300 = vector.load %arg0[%c2_155, %c6_156, %c0_157] : memref<4x16x64xf32, #tpu.memory_space<vmem>>, vector<1x2x64xf32>
    %301 = vector.shape_cast %300 : vector<1x2x64xf32> to vector<2x64xf32>
    %cst_158 = arith.constant dense<0.000000e+00> : vector<2x64xf32>
    %302 = tpu.matmul %291, %5, %cst_158 {dimension_numbers = #tpu.dot_dimension_numbers<[1], [0], [0], [1], [0, 0, 1, 1], [], []>} : vector<2x64xbf16>, vector<64x64xbf16>, vector<2x64xf32> -> vector<2x64xf32>
    %303 = arith.addf %301, %302 : vector<2x64xf32>
    %c3_159 = arith.constant 3 : index
    %c6_160 = arith.constant 6 : index
    %c0_161 = arith.constant 0 : index
    %304 = vector.load %arg0[%c3_159, %c6_160, %c0_161] : memref<4x16x64xf32, #tpu.memory_space<vmem>>, vector<1x2x64xf32>
    %305 = vector.shape_cast %304 : vector<1x2x64xf32> to vector<2x64xf32>
    %cst_162 = arith.constant dense<0.000000e+00> : vector<2x64xf32>
    %306 = tpu.matmul %291, %7, %cst_162 {dimension_numbers = #tpu.dot_dimension_numbers<[1], [0], [0], [1], [0, 0, 1, 1], [], []>} : vector<2x64xbf16>, vector<64x64xbf16>, vector<2x64xf32> -> vector<2x64xf32>
    %307 = arith.addf %305, %306 : vector<2x64xf32>
    %cst_163 = arith.constant 5.000000e-01 : f32
    %308 = vector.broadcast %cst_163 : f32 to vector<2x64xf32>
    %309 = arith.mulf %295, %308 : vector<2x64xf32>
    %cst_164 = arith.constant 5.000000e-01 : f32
    %310 = vector.broadcast %cst_164 : f32 to vector<2x64xf32>
    %311 = arith.mulf %299, %310 : vector<2x64xf32>
    %cst_165 = arith.constant 5.000000e-01 : f32
    %312 = vector.broadcast %cst_165 : f32 to vector<2x64xf32>
    %313 = arith.mulf %307, %312 : vector<2x64xf32>
    %314 = tpu.concatenate %309, %311, %313, %303 in 0 : vector<2x64xf32>, vector<2x64xf32>, vector<2x64xf32>, vector<2x64xf32> -> vector<8x64xf32>
    %315 = math.tanh %314 : vector<8x64xf32>
    %316 = vector.extract_strided_slice %315 {offsets = [0, 0], sizes = [2, 64], strides = [1, 1]} : vector<8x64xf32> to vector<2x64xf32>
    %cst_166 = arith.constant 5.000000e-01 : f32
    %317 = vector.broadcast %cst_166 : f32 to vector<2x64xf32>
    %318 = arith.mulf %316, %317 : vector<2x64xf32>
    %cst_167 = arith.constant 5.000000e-01 : f32
    %319 = vector.broadcast %cst_167 : f32 to vector<2x64xf32>
    %320 = arith.addf %318, %319 : vector<2x64xf32>
    %321 = vector.extract_strided_slice %315 {offsets = [2, 0], sizes = [2, 64], strides = [1, 1]} : vector<8x64xf32> to vector<2x64xf32>
    %cst_168 = arith.constant 5.000000e-01 : f32
    %322 = vector.broadcast %cst_168 : f32 to vector<2x64xf32>
    %323 = arith.mulf %321, %322 : vector<2x64xf32>
    %cst_169 = arith.constant 5.000000e-01 : f32
    %324 = vector.broadcast %cst_169 : f32 to vector<2x64xf32>
    %325 = arith.addf %323, %324 : vector<2x64xf32>
    %326 = vector.extract_strided_slice %315 {offsets = [4, 0], sizes = [2, 64], strides = [1, 1]} : vector<8x64xf32> to vector<2x64xf32>
    %cst_170 = arith.constant 5.000000e-01 : f32
    %327 = vector.broadcast %cst_170 : f32 to vector<2x64xf32>
    %328 = arith.mulf %326, %327 : vector<2x64xf32>
    %cst_171 = arith.constant 5.000000e-01 : f32
    %329 = vector.broadcast %cst_171 : f32 to vector<2x64xf32>
    %330 = arith.addf %328, %329 : vector<2x64xf32>
    %331 = vector.extract_strided_slice %315 {offsets = [6, 0], sizes = [2, 64], strides = [1, 1]} : vector<8x64xf32> to vector<2x64xf32>
    %332 = arith.mulf %325, %249 : vector<2x64xf32>
    %333 = arith.mulf %320, %331 : vector<2x64xf32>
    %334 = arith.addf %332, %333 : vector<2x64xf32>
    %335 = math.tanh %334 : vector<2x64xf32>
    %336 = arith.mulf %330, %335 : vector<2x64xf32>
    %337 = tpu.concatenate %336, %290 in 1 : vector<2x64xf32>, vector<2x64xf32> -> vector<2x128xf32>
    %338 = arith.truncf %337 : vector<2x128xf32> to vector<2x128xbf16>
    %cst_172 = arith.constant dense<0.000000e+00> : vector<2x64xf32>
    %339 = tpu.matmul %338, %9, %cst_172 {dimension_numbers = #tpu.dot_dimension_numbers<[1], [0], [0], [1], [0, 0, 1, 1], [], []>} : vector<2x128xbf16>, vector<128x64xbf16>, vector<2x64xf32> -> vector<2x64xf32>
    %340 = arith.addf %339, %19 : vector<2x64xf32>
    %cst_173 = arith.constant dense<0.000000e+00> : vector<2x64xf32>
    %341 = tpu.matmul %338, %11, %cst_173 {dimension_numbers = #tpu.dot_dimension_numbers<[1], [0], [0], [1], [0, 0, 1, 1], [], []>} : vector<2x128xbf16>, vector<128x64xbf16>, vector<2x64xf32> -> vector<2x64xf32>
    %342 = arith.addf %341, %23 : vector<2x64xf32>
    %cst_174 = arith.constant dense<0.000000e+00> : vector<2x64xf32>
    %343 = tpu.matmul %338, %13, %cst_174 {dimension_numbers = #tpu.dot_dimension_numbers<[1], [0], [0], [1], [0, 0, 1, 1], [], []>} : vector<2x128xbf16>, vector<128x64xbf16>, vector<2x64xf32> -> vector<2x64xf32>
    %344 = arith.addf %343, %27 : vector<2x64xf32>
    %cst_175 = arith.constant dense<0.000000e+00> : vector<2x64xf32>
    %345 = tpu.matmul %338, %15, %cst_175 {dimension_numbers = #tpu.dot_dimension_numbers<[1], [0], [0], [1], [0, 0, 1, 1], [], []>} : vector<2x128xbf16>, vector<128x64xbf16>, vector<2x64xf32> -> vector<2x64xf32>
    %346 = arith.addf %345, %31 : vector<2x64xf32>
    %cst_176 = arith.constant 5.000000e-01 : f32
    %347 = vector.broadcast %cst_176 : f32 to vector<2x64xf32>
    %348 = arith.mulf %340, %347 : vector<2x64xf32>
    %cst_177 = arith.constant 5.000000e-01 : f32
    %349 = vector.broadcast %cst_177 : f32 to vector<2x64xf32>
    %350 = arith.mulf %342, %349 : vector<2x64xf32>
    %cst_178 = arith.constant 5.000000e-01 : f32
    %351 = vector.broadcast %cst_178 : f32 to vector<2x64xf32>
    %352 = arith.mulf %346, %351 : vector<2x64xf32>
    %353 = tpu.concatenate %348, %350, %352, %344 in 0 : vector<2x64xf32>, vector<2x64xf32>, vector<2x64xf32>, vector<2x64xf32> -> vector<8x64xf32>
    %354 = math.tanh %353 : vector<8x64xf32>
    %355 = vector.extract_strided_slice %354 {offsets = [0, 0], sizes = [2, 64], strides = [1, 1]} : vector<8x64xf32> to vector<2x64xf32>
    %cst_179 = arith.constant 5.000000e-01 : f32
    %356 = vector.broadcast %cst_179 : f32 to vector<2x64xf32>
    %357 = arith.mulf %355, %356 : vector<2x64xf32>
    %cst_180 = arith.constant 5.000000e-01 : f32
    %358 = vector.broadcast %cst_180 : f32 to vector<2x64xf32>
    %359 = arith.addf %357, %358 : vector<2x64xf32>
    %360 = vector.extract_strided_slice %354 {offsets = [2, 0], sizes = [2, 64], strides = [1, 1]} : vector<8x64xf32> to vector<2x64xf32>
    %cst_181 = arith.constant 5.000000e-01 : f32
    %361 = vector.broadcast %cst_181 : f32 to vector<2x64xf32>
    %362 = arith.mulf %360, %361 : vector<2x64xf32>
    %cst_182 = arith.constant 5.000000e-01 : f32
    %363 = vector.broadcast %cst_182 : f32 to vector<2x64xf32>
    %364 = arith.addf %362, %363 : vector<2x64xf32>
    %365 = vector.extract_strided_slice %354 {offsets = [4, 0], sizes = [2, 64], strides = [1, 1]} : vector<8x64xf32> to vector<2x64xf32>
    %cst_183 = arith.constant 5.000000e-01 : f32
    %366 = vector.broadcast %cst_183 : f32 to vector<2x64xf32>
    %367 = arith.mulf %365, %366 : vector<2x64xf32>
    %cst_184 = arith.constant 5.000000e-01 : f32
    %368 = vector.broadcast %cst_184 : f32 to vector<2x64xf32>
    %369 = arith.addf %367, %368 : vector<2x64xf32>
    %370 = vector.extract_strided_slice %354 {offsets = [6, 0], sizes = [2, 64], strides = [1, 1]} : vector<8x64xf32> to vector<2x64xf32>
    %371 = arith.mulf %364, %288 : vector<2x64xf32>
    %372 = arith.mulf %359, %370 : vector<2x64xf32>
    %373 = arith.addf %371, %372 : vector<2x64xf32>
    %374 = math.tanh %373 : vector<2x64xf32>
    %375 = arith.mulf %369, %374 : vector<2x64xf32>
    %376 = arith.truncf %336 : vector<2x64xf32> to vector<2x64xbf16>
    %c0_185 = arith.constant 0 : index
    %c8 = arith.constant 8 : index
    %c0_186 = arith.constant 0 : index
    %377 = vector.load %arg0[%c0_185, %c8, %c0_186] : memref<4x16x64xf32, #tpu.memory_space<vmem>>, vector<1x2x64xf32>
    %378 = vector.shape_cast %377 : vector<1x2x64xf32> to vector<2x64xf32>
    %cst_187 = arith.constant dense<0.000000e+00> : vector<2x64xf32>
    %379 = tpu.matmul %376, %1, %cst_187 {dimension_numbers = #tpu.dot_dimension_numbers<[1], [0], [0], [1], [0, 0, 1, 1], [], []>} : vector<2x64xbf16>, vector<64x64xbf16>, vector<2x64xf32> -> vector<2x64xf32>
    %380 = arith.addf %378, %379 : vector<2x64xf32>
    %c1_188 = arith.constant 1 : index
    %c8_189 = arith.constant 8 : index
    %c0_190 = arith.constant 0 : index
    %381 = vector.load %arg0[%c1_188, %c8_189, %c0_190] : memref<4x16x64xf32, #tpu.memory_space<vmem>>, vector<1x2x64xf32>
    %382 = vector.shape_cast %381 : vector<1x2x64xf32> to vector<2x64xf32>
    %cst_191 = arith.constant dense<0.000000e+00> : vector<2x64xf32>
    %383 = tpu.matmul %376, %3, %cst_191 {dimension_numbers = #tpu.dot_dimension_numbers<[1], [0], [0], [1], [0, 0, 1, 1], [], []>} : vector<2x64xbf16>, vector<64x64xbf16>, vector<2x64xf32> -> vector<2x64xf32>
    %384 = arith.addf %382, %383 : vector<2x64xf32>
    %c2_192 = arith.constant 2 : index
    %c8_193 = arith.constant 8 : index
    %c0_194 = arith.constant 0 : index
    %385 = vector.load %arg0[%c2_192, %c8_193, %c0_194] : memref<4x16x64xf32, #tpu.memory_space<vmem>>, vector<1x2x64xf32>
    %386 = vector.shape_cast %385 : vector<1x2x64xf32> to vector<2x64xf32>
    %cst_195 = arith.constant dense<0.000000e+00> : vector<2x64xf32>
    %387 = tpu.matmul %376, %5, %cst_195 {dimension_numbers = #tpu.dot_dimension_numbers<[1], [0], [0], [1], [0, 0, 1, 1], [], []>} : vector<2x64xbf16>, vector<64x64xbf16>, vector<2x64xf32> -> vector<2x64xf32>
    %388 = arith.addf %386, %387 : vector<2x64xf32>
    %c3_196 = arith.constant 3 : index
    %c8_197 = arith.constant 8 : index
    %c0_198 = arith.constant 0 : index
    %389 = vector.load %arg0[%c3_196, %c8_197, %c0_198] : memref<4x16x64xf32, #tpu.memory_space<vmem>>, vector<1x2x64xf32>
    %390 = vector.shape_cast %389 : vector<1x2x64xf32> to vector<2x64xf32>
    %cst_199 = arith.constant dense<0.000000e+00> : vector<2x64xf32>
    %391 = tpu.matmul %376, %7, %cst_199 {dimension_numbers = #tpu.dot_dimension_numbers<[1], [0], [0], [1], [0, 0, 1, 1], [], []>} : vector<2x64xbf16>, vector<64x64xbf16>, vector<2x64xf32> -> vector<2x64xf32>
    %392 = arith.addf %390, %391 : vector<2x64xf32>
    %cst_200 = arith.constant 5.000000e-01 : f32
    %393 = vector.broadcast %cst_200 : f32 to vector<2x64xf32>
    %394 = arith.mulf %380, %393 : vector<2x64xf32>
    %cst_201 = arith.constant 5.000000e-01 : f32
    %395 = vector.broadcast %cst_201 : f32 to vector<2x64xf32>
    %396 = arith.mulf %384, %395 : vector<2x64xf32>
    %cst_202 = arith.constant 5.000000e-01 : f32
    %397 = vector.broadcast %cst_202 : f32 to vector<2x64xf32>
    %398 = arith.mulf %392, %397 : vector<2x64xf32>
    %399 = tpu.concatenate %394, %396, %398, %388 in 0 : vector<2x64xf32>, vector<2x64xf32>, vector<2x64xf32>, vector<2x64xf32> -> vector<8x64xf32>
    %400 = math.tanh %399 : vector<8x64xf32>
    %401 = vector.extract_strided_slice %400 {offsets = [0, 0], sizes = [2, 64], strides = [1, 1]} : vector<8x64xf32> to vector<2x64xf32>
    %cst_203 = arith.constant 5.000000e-01 : f32
    %402 = vector.broadcast %cst_203 : f32 to vector<2x64xf32>
    %403 = arith.mulf %401, %402 : vector<2x64xf32>
    %cst_204 = arith.constant 5.000000e-01 : f32
    %404 = vector.broadcast %cst_204 : f32 to vector<2x64xf32>
    %405 = arith.addf %403, %404 : vector<2x64xf32>
    %406 = vector.extract_strided_slice %400 {offsets = [2, 0], sizes = [2, 64], strides = [1, 1]} : vector<8x64xf32> to vector<2x64xf32>
    %cst_205 = arith.constant 5.000000e-01 : f32
    %407 = vector.broadcast %cst_205 : f32 to vector<2x64xf32>
    %408 = arith.mulf %406, %407 : vector<2x64xf32>
    %cst_206 = arith.constant 5.000000e-01 : f32
    %409 = vector.broadcast %cst_206 : f32 to vector<2x64xf32>
    %410 = arith.addf %408, %409 : vector<2x64xf32>
    %411 = vector.extract_strided_slice %400 {offsets = [4, 0], sizes = [2, 64], strides = [1, 1]} : vector<8x64xf32> to vector<2x64xf32>
    %cst_207 = arith.constant 5.000000e-01 : f32
    %412 = vector.broadcast %cst_207 : f32 to vector<2x64xf32>
    %413 = arith.mulf %411, %412 : vector<2x64xf32>
    %cst_208 = arith.constant 5.000000e-01 : f32
    %414 = vector.broadcast %cst_208 : f32 to vector<2x64xf32>
    %415 = arith.addf %413, %414 : vector<2x64xf32>
    %416 = vector.extract_strided_slice %400 {offsets = [6, 0], sizes = [2, 64], strides = [1, 1]} : vector<8x64xf32> to vector<2x64xf32>
    %417 = arith.mulf %410, %334 : vector<2x64xf32>
    %418 = arith.mulf %405, %416 : vector<2x64xf32>
    %419 = arith.addf %417, %418 : vector<2x64xf32>
    %420 = math.tanh %419 : vector<2x64xf32>
    %421 = arith.mulf %415, %420 : vector<2x64xf32>
    %422 = tpu.concatenate %421, %375 in 1 : vector<2x64xf32>, vector<2x64xf32> -> vector<2x128xf32>
    %423 = arith.truncf %422 : vector<2x128xf32> to vector<2x128xbf16>
    %cst_209 = arith.constant dense<0.000000e+00> : vector<2x64xf32>
    %424 = tpu.matmul %423, %9, %cst_209 {dimension_numbers = #tpu.dot_dimension_numbers<[1], [0], [0], [1], [0, 0, 1, 1], [], []>} : vector<2x128xbf16>, vector<128x64xbf16>, vector<2x64xf32> -> vector<2x64xf32>
    %425 = arith.addf %424, %19 : vector<2x64xf32>
    %cst_210 = arith.constant dense<0.000000e+00> : vector<2x64xf32>
    %426 = tpu.matmul %423, %11, %cst_210 {dimension_numbers = #tpu.dot_dimension_numbers<[1], [0], [0], [1], [0, 0, 1, 1], [], []>} : vector<2x128xbf16>, vector<128x64xbf16>, vector<2x64xf32> -> vector<2x64xf32>
    %427 = arith.addf %426, %23 : vector<2x64xf32>
    %cst_211 = arith.constant dense<0.000000e+00> : vector<2x64xf32>
    %428 = tpu.matmul %423, %13, %cst_211 {dimension_numbers = #tpu.dot_dimension_numbers<[1], [0], [0], [1], [0, 0, 1, 1], [], []>} : vector<2x128xbf16>, vector<128x64xbf16>, vector<2x64xf32> -> vector<2x64xf32>
    %429 = arith.addf %428, %27 : vector<2x64xf32>
    %cst_212 = arith.constant dense<0.000000e+00> : vector<2x64xf32>
    %430 = tpu.matmul %423, %15, %cst_212 {dimension_numbers = #tpu.dot_dimension_numbers<[1], [0], [0], [1], [0, 0, 1, 1], [], []>} : vector<2x128xbf16>, vector<128x64xbf16>, vector<2x64xf32> -> vector<2x64xf32>
    %431 = arith.addf %430, %31 : vector<2x64xf32>
    %cst_213 = arith.constant 5.000000e-01 : f32
    %432 = vector.broadcast %cst_213 : f32 to vector<2x64xf32>
    %433 = arith.mulf %425, %432 : vector<2x64xf32>
    %cst_214 = arith.constant 5.000000e-01 : f32
    %434 = vector.broadcast %cst_214 : f32 to vector<2x64xf32>
    %435 = arith.mulf %427, %434 : vector<2x64xf32>
    %cst_215 = arith.constant 5.000000e-01 : f32
    %436 = vector.broadcast %cst_215 : f32 to vector<2x64xf32>
    %437 = arith.mulf %431, %436 : vector<2x64xf32>
    %438 = tpu.concatenate %433, %435, %437, %429 in 0 : vector<2x64xf32>, vector<2x64xf32>, vector<2x64xf32>, vector<2x64xf32> -> vector<8x64xf32>
    %439 = math.tanh %438 : vector<8x64xf32>
    %440 = vector.extract_strided_slice %439 {offsets = [0, 0], sizes = [2, 64], strides = [1, 1]} : vector<8x64xf32> to vector<2x64xf32>
    %cst_216 = arith.constant 5.000000e-01 : f32
    %441 = vector.broadcast %cst_216 : f32 to vector<2x64xf32>
    %442 = arith.mulf %440, %441 : vector<2x64xf32>
    %cst_217 = arith.constant 5.000000e-01 : f32
    %443 = vector.broadcast %cst_217 : f32 to vector<2x64xf32>
    %444 = arith.addf %442, %443 : vector<2x64xf32>
    %445 = vector.extract_strided_slice %439 {offsets = [2, 0], sizes = [2, 64], strides = [1, 1]} : vector<8x64xf32> to vector<2x64xf32>
    %cst_218 = arith.constant 5.000000e-01 : f32
    %446 = vector.broadcast %cst_218 : f32 to vector<2x64xf32>
    %447 = arith.mulf %445, %446 : vector<2x64xf32>
    %cst_219 = arith.constant 5.000000e-01 : f32
    %448 = vector.broadcast %cst_219 : f32 to vector<2x64xf32>
    %449 = arith.addf %447, %448 : vector<2x64xf32>
    %450 = vector.extract_strided_slice %439 {offsets = [4, 0], sizes = [2, 64], strides = [1, 1]} : vector<8x64xf32> to vector<2x64xf32>
    %cst_220 = arith.constant 5.000000e-01 : f32
    %451 = vector.broadcast %cst_220 : f32 to vector<2x64xf32>
    %452 = arith.mulf %450, %451 : vector<2x64xf32>
    %cst_221 = arith.constant 5.000000e-01 : f32
    %453 = vector.broadcast %cst_221 : f32 to vector<2x64xf32>
    %454 = arith.addf %452, %453 : vector<2x64xf32>
    %455 = vector.extract_strided_slice %439 {offsets = [6, 0], sizes = [2, 64], strides = [1, 1]} : vector<8x64xf32> to vector<2x64xf32>
    %456 = arith.mulf %449, %373 : vector<2x64xf32>
    %457 = arith.mulf %444, %455 : vector<2x64xf32>
    %458 = arith.addf %456, %457 : vector<2x64xf32>
    %459 = math.tanh %458 : vector<2x64xf32>
    %460 = arith.mulf %454, %459 : vector<2x64xf32>
    %461 = arith.truncf %421 : vector<2x64xf32> to vector<2x64xbf16>
    %c0_222 = arith.constant 0 : index
    %c10 = arith.constant 10 : index
    %c0_223 = arith.constant 0 : index
    %462 = vector.load %arg0[%c0_222, %c10, %c0_223] : memref<4x16x64xf32, #tpu.memory_space<vmem>>, vector<1x2x64xf32>
    %463 = vector.shape_cast %462 : vector<1x2x64xf32> to vector<2x64xf32>
    %cst_224 = arith.constant dense<0.000000e+00> : vector<2x64xf32>
    %464 = tpu.matmul %461, %1, %cst_224 {dimension_numbers = #tpu.dot_dimension_numbers<[1], [0], [0], [1], [0, 0, 1, 1], [], []>} : vector<2x64xbf16>, vector<64x64xbf16>, vector<2x64xf32> -> vector<2x64xf32>
    %465 = arith.addf %463, %464 : vector<2x64xf32>
    %c1_225 = arith.constant 1 : index
    %c10_226 = arith.constant 10 : index
    %c0_227 = arith.constant 0 : index
    %466 = vector.load %arg0[%c1_225, %c10_226, %c0_227] : memref<4x16x64xf32, #tpu.memory_space<vmem>>, vector<1x2x64xf32>
    %467 = vector.shape_cast %466 : vector<1x2x64xf32> to vector<2x64xf32>
    %cst_228 = arith.constant dense<0.000000e+00> : vector<2x64xf32>
    %468 = tpu.matmul %461, %3, %cst_228 {dimension_numbers = #tpu.dot_dimension_numbers<[1], [0], [0], [1], [0, 0, 1, 1], [], []>} : vector<2x64xbf16>, vector<64x64xbf16>, vector<2x64xf32> -> vector<2x64xf32>
    %469 = arith.addf %467, %468 : vector<2x64xf32>
    %c2_229 = arith.constant 2 : index
    %c10_230 = arith.constant 10 : index
    %c0_231 = arith.constant 0 : index
    %470 = vector.load %arg0[%c2_229, %c10_230, %c0_231] : memref<4x16x64xf32, #tpu.memory_space<vmem>>, vector<1x2x64xf32>
    %471 = vector.shape_cast %470 : vector<1x2x64xf32> to vector<2x64xf32>
    %cst_232 = arith.constant dense<0.000000e+00> : vector<2x64xf32>
    %472 = tpu.matmul %461, %5, %cst_232 {dimension_numbers = #tpu.dot_dimension_numbers<[1], [0], [0], [1], [0, 0, 1, 1], [], []>} : vector<2x64xbf16>, vector<64x64xbf16>, vector<2x64xf32> -> vector<2x64xf32>
    %473 = arith.addf %471, %472 : vector<2x64xf32>
    %c3_233 = arith.constant 3 : index
    %c10_234 = arith.constant 10 : index
    %c0_235 = arith.constant 0 : index
    %474 = vector.load %arg0[%c3_233, %c10_234, %c0_235] : memref<4x16x64xf32, #tpu.memory_space<vmem>>, vector<1x2x64xf32>
    %475 = vector.shape_cast %474 : vector<1x2x64xf32> to vector<2x64xf32>
    %cst_236 = arith.constant dense<0.000000e+00> : vector<2x64xf32>
    %476 = tpu.matmul %461, %7, %cst_236 {dimension_numbers = #tpu.dot_dimension_numbers<[1], [0], [0], [1], [0, 0, 1, 1], [], []>} : vector<2x64xbf16>, vector<64x64xbf16>, vector<2x64xf32> -> vector<2x64xf32>
    %477 = arith.addf %475, %476 : vector<2x64xf32>
    %cst_237 = arith.constant 5.000000e-01 : f32
    %478 = vector.broadcast %cst_237 : f32 to vector<2x64xf32>
    %479 = arith.mulf %465, %478 : vector<2x64xf32>
    %cst_238 = arith.constant 5.000000e-01 : f32
    %480 = vector.broadcast %cst_238 : f32 to vector<2x64xf32>
    %481 = arith.mulf %469, %480 : vector<2x64xf32>
    %cst_239 = arith.constant 5.000000e-01 : f32
    %482 = vector.broadcast %cst_239 : f32 to vector<2x64xf32>
    %483 = arith.mulf %477, %482 : vector<2x64xf32>
    %484 = tpu.concatenate %479, %481, %483, %473 in 0 : vector<2x64xf32>, vector<2x64xf32>, vector<2x64xf32>, vector<2x64xf32> -> vector<8x64xf32>
    %485 = math.tanh %484 : vector<8x64xf32>
    %486 = vector.extract_strided_slice %485 {offsets = [0, 0], sizes = [2, 64], strides = [1, 1]} : vector<8x64xf32> to vector<2x64xf32>
    %cst_240 = arith.constant 5.000000e-01 : f32
    %487 = vector.broadcast %cst_240 : f32 to vector<2x64xf32>
    %488 = arith.mulf %486, %487 : vector<2x64xf32>
    %cst_241 = arith.constant 5.000000e-01 : f32
    %489 = vector.broadcast %cst_241 : f32 to vector<2x64xf32>
    %490 = arith.addf %488, %489 : vector<2x64xf32>
    %491 = vector.extract_strided_slice %485 {offsets = [2, 0], sizes = [2, 64], strides = [1, 1]} : vector<8x64xf32> to vector<2x64xf32>
    %cst_242 = arith.constant 5.000000e-01 : f32
    %492 = vector.broadcast %cst_242 : f32 to vector<2x64xf32>
    %493 = arith.mulf %491, %492 : vector<2x64xf32>
    %cst_243 = arith.constant 5.000000e-01 : f32
    %494 = vector.broadcast %cst_243 : f32 to vector<2x64xf32>
    %495 = arith.addf %493, %494 : vector<2x64xf32>
    %496 = vector.extract_strided_slice %485 {offsets = [4, 0], sizes = [2, 64], strides = [1, 1]} : vector<8x64xf32> to vector<2x64xf32>
    %cst_244 = arith.constant 5.000000e-01 : f32
    %497 = vector.broadcast %cst_244 : f32 to vector<2x64xf32>
    %498 = arith.mulf %496, %497 : vector<2x64xf32>
    %cst_245 = arith.constant 5.000000e-01 : f32
    %499 = vector.broadcast %cst_245 : f32 to vector<2x64xf32>
    %500 = arith.addf %498, %499 : vector<2x64xf32>
    %501 = vector.extract_strided_slice %485 {offsets = [6, 0], sizes = [2, 64], strides = [1, 1]} : vector<8x64xf32> to vector<2x64xf32>
    %502 = arith.mulf %495, %419 : vector<2x64xf32>
    %503 = arith.mulf %490, %501 : vector<2x64xf32>
    %504 = arith.addf %502, %503 : vector<2x64xf32>
    %505 = math.tanh %504 : vector<2x64xf32>
    %506 = arith.mulf %500, %505 : vector<2x64xf32>
    %507 = tpu.concatenate %506, %460 in 1 : vector<2x64xf32>, vector<2x64xf32> -> vector<2x128xf32>
    %508 = arith.truncf %507 : vector<2x128xf32> to vector<2x128xbf16>
    %cst_246 = arith.constant dense<0.000000e+00> : vector<2x64xf32>
    %509 = tpu.matmul %508, %9, %cst_246 {dimension_numbers = #tpu.dot_dimension_numbers<[1], [0], [0], [1], [0, 0, 1, 1], [], []>} : vector<2x128xbf16>, vector<128x64xbf16>, vector<2x64xf32> -> vector<2x64xf32>
    %510 = arith.addf %509, %19 : vector<2x64xf32>
    %cst_247 = arith.constant dense<0.000000e+00> : vector<2x64xf32>
    %511 = tpu.matmul %508, %11, %cst_247 {dimension_numbers = #tpu.dot_dimension_numbers<[1], [0], [0], [1], [0, 0, 1, 1], [], []>} : vector<2x128xbf16>, vector<128x64xbf16>, vector<2x64xf32> -> vector<2x64xf32>
    %512 = arith.addf %511, %23 : vector<2x64xf32>
    %cst_248 = arith.constant dense<0.000000e+00> : vector<2x64xf32>
    %513 = tpu.matmul %508, %13, %cst_248 {dimension_numbers = #tpu.dot_dimension_numbers<[1], [0], [0], [1], [0, 0, 1, 1], [], []>} : vector<2x128xbf16>, vector<128x64xbf16>, vector<2x64xf32> -> vector<2x64xf32>
    %514 = arith.addf %513, %27 : vector<2x64xf32>
    %cst_249 = arith.constant dense<0.000000e+00> : vector<2x64xf32>
    %515 = tpu.matmul %508, %15, %cst_249 {dimension_numbers = #tpu.dot_dimension_numbers<[1], [0], [0], [1], [0, 0, 1, 1], [], []>} : vector<2x128xbf16>, vector<128x64xbf16>, vector<2x64xf32> -> vector<2x64xf32>
    %516 = arith.addf %515, %31 : vector<2x64xf32>
    %cst_250 = arith.constant 5.000000e-01 : f32
    %517 = vector.broadcast %cst_250 : f32 to vector<2x64xf32>
    %518 = arith.mulf %510, %517 : vector<2x64xf32>
    %cst_251 = arith.constant 5.000000e-01 : f32
    %519 = vector.broadcast %cst_251 : f32 to vector<2x64xf32>
    %520 = arith.mulf %512, %519 : vector<2x64xf32>
    %cst_252 = arith.constant 5.000000e-01 : f32
    %521 = vector.broadcast %cst_252 : f32 to vector<2x64xf32>
    %522 = arith.mulf %516, %521 : vector<2x64xf32>
    %523 = tpu.concatenate %518, %520, %522, %514 in 0 : vector<2x64xf32>, vector<2x64xf32>, vector<2x64xf32>, vector<2x64xf32> -> vector<8x64xf32>
    %524 = math.tanh %523 : vector<8x64xf32>
    %525 = vector.extract_strided_slice %524 {offsets = [0, 0], sizes = [2, 64], strides = [1, 1]} : vector<8x64xf32> to vector<2x64xf32>
    %cst_253 = arith.constant 5.000000e-01 : f32
    %526 = vector.broadcast %cst_253 : f32 to vector<2x64xf32>
    %527 = arith.mulf %525, %526 : vector<2x64xf32>
    %cst_254 = arith.constant 5.000000e-01 : f32
    %528 = vector.broadcast %cst_254 : f32 to vector<2x64xf32>
    %529 = arith.addf %527, %528 : vector<2x64xf32>
    %530 = vector.extract_strided_slice %524 {offsets = [2, 0], sizes = [2, 64], strides = [1, 1]} : vector<8x64xf32> to vector<2x64xf32>
    %cst_255 = arith.constant 5.000000e-01 : f32
    %531 = vector.broadcast %cst_255 : f32 to vector<2x64xf32>
    %532 = arith.mulf %530, %531 : vector<2x64xf32>
    %cst_256 = arith.constant 5.000000e-01 : f32
    %533 = vector.broadcast %cst_256 : f32 to vector<2x64xf32>
    %534 = arith.addf %532, %533 : vector<2x64xf32>
    %535 = vector.extract_strided_slice %524 {offsets = [4, 0], sizes = [2, 64], strides = [1, 1]} : vector<8x64xf32> to vector<2x64xf32>
    %cst_257 = arith.constant 5.000000e-01 : f32
    %536 = vector.broadcast %cst_257 : f32 to vector<2x64xf32>
    %537 = arith.mulf %535, %536 : vector<2x64xf32>
    %cst_258 = arith.constant 5.000000e-01 : f32
    %538 = vector.broadcast %cst_258 : f32 to vector<2x64xf32>
    %539 = arith.addf %537, %538 : vector<2x64xf32>
    %540 = vector.extract_strided_slice %524 {offsets = [6, 0], sizes = [2, 64], strides = [1, 1]} : vector<8x64xf32> to vector<2x64xf32>
    %541 = arith.mulf %534, %458 : vector<2x64xf32>
    %542 = arith.mulf %529, %540 : vector<2x64xf32>
    %543 = arith.addf %541, %542 : vector<2x64xf32>
    %544 = math.tanh %543 : vector<2x64xf32>
    %545 = arith.mulf %539, %544 : vector<2x64xf32>
    %546 = arith.truncf %506 : vector<2x64xf32> to vector<2x64xbf16>
    %c0_259 = arith.constant 0 : index
    %c12 = arith.constant 12 : index
    %c0_260 = arith.constant 0 : index
    %547 = vector.load %arg0[%c0_259, %c12, %c0_260] : memref<4x16x64xf32, #tpu.memory_space<vmem>>, vector<1x2x64xf32>
    %548 = vector.shape_cast %547 : vector<1x2x64xf32> to vector<2x64xf32>
    %cst_261 = arith.constant dense<0.000000e+00> : vector<2x64xf32>
    %549 = tpu.matmul %546, %1, %cst_261 {dimension_numbers = #tpu.dot_dimension_numbers<[1], [0], [0], [1], [0, 0, 1, 1], [], []>} : vector<2x64xbf16>, vector<64x64xbf16>, vector<2x64xf32> -> vector<2x64xf32>
    %550 = arith.addf %548, %549 : vector<2x64xf32>
    %c1_262 = arith.constant 1 : index
    %c12_263 = arith.constant 12 : index
    %c0_264 = arith.constant 0 : index
    %551 = vector.load %arg0[%c1_262, %c12_263, %c0_264] : memref<4x16x64xf32, #tpu.memory_space<vmem>>, vector<1x2x64xf32>
    %552 = vector.shape_cast %551 : vector<1x2x64xf32> to vector<2x64xf32>
    %cst_265 = arith.constant dense<0.000000e+00> : vector<2x64xf32>
    %553 = tpu.matmul %546, %3, %cst_265 {dimension_numbers = #tpu.dot_dimension_numbers<[1], [0], [0], [1], [0, 0, 1, 1], [], []>} : vector<2x64xbf16>, vector<64x64xbf16>, vector<2x64xf32> -> vector<2x64xf32>
    %554 = arith.addf %552, %553 : vector<2x64xf32>
    %c2_266 = arith.constant 2 : index
    %c12_267 = arith.constant 12 : index
    %c0_268 = arith.constant 0 : index
    %555 = vector.load %arg0[%c2_266, %c12_267, %c0_268] : memref<4x16x64xf32, #tpu.memory_space<vmem>>, vector<1x2x64xf32>
    %556 = vector.shape_cast %555 : vector<1x2x64xf32> to vector<2x64xf32>
    %cst_269 = arith.constant dense<0.000000e+00> : vector<2x64xf32>
    %557 = tpu.matmul %546, %5, %cst_269 {dimension_numbers = #tpu.dot_dimension_numbers<[1], [0], [0], [1], [0, 0, 1, 1], [], []>} : vector<2x64xbf16>, vector<64x64xbf16>, vector<2x64xf32> -> vector<2x64xf32>
    %558 = arith.addf %556, %557 : vector<2x64xf32>
    %c3_270 = arith.constant 3 : index
    %c12_271 = arith.constant 12 : index
    %c0_272 = arith.constant 0 : index
    %559 = vector.load %arg0[%c3_270, %c12_271, %c0_272] : memref<4x16x64xf32, #tpu.memory_space<vmem>>, vector<1x2x64xf32>
    %560 = vector.shape_cast %559 : vector<1x2x64xf32> to vector<2x64xf32>
    %cst_273 = arith.constant dense<0.000000e+00> : vector<2x64xf32>
    %561 = tpu.matmul %546, %7, %cst_273 {dimension_numbers = #tpu.dot_dimension_numbers<[1], [0], [0], [1], [0, 0, 1, 1], [], []>} : vector<2x64xbf16>, vector<64x64xbf16>, vector<2x64xf32> -> vector<2x64xf32>
    %562 = arith.addf %560, %561 : vector<2x64xf32>
    %cst_274 = arith.constant 5.000000e-01 : f32
    %563 = vector.broadcast %cst_274 : f32 to vector<2x64xf32>
    %564 = arith.mulf %550, %563 : vector<2x64xf32>
    %cst_275 = arith.constant 5.000000e-01 : f32
    %565 = vector.broadcast %cst_275 : f32 to vector<2x64xf32>
    %566 = arith.mulf %554, %565 : vector<2x64xf32>
    %cst_276 = arith.constant 5.000000e-01 : f32
    %567 = vector.broadcast %cst_276 : f32 to vector<2x64xf32>
    %568 = arith.mulf %562, %567 : vector<2x64xf32>
    %569 = tpu.concatenate %564, %566, %568, %558 in 0 : vector<2x64xf32>, vector<2x64xf32>, vector<2x64xf32>, vector<2x64xf32> -> vector<8x64xf32>
    %570 = math.tanh %569 : vector<8x64xf32>
    %571 = vector.extract_strided_slice %570 {offsets = [0, 0], sizes = [2, 64], strides = [1, 1]} : vector<8x64xf32> to vector<2x64xf32>
    %cst_277 = arith.constant 5.000000e-01 : f32
    %572 = vector.broadcast %cst_277 : f32 to vector<2x64xf32>
    %573 = arith.mulf %571, %572 : vector<2x64xf32>
    %cst_278 = arith.constant 5.000000e-01 : f32
    %574 = vector.broadcast %cst_278 : f32 to vector<2x64xf32>
    %575 = arith.addf %573, %574 : vector<2x64xf32>
    %576 = vector.extract_strided_slice %570 {offsets = [2, 0], sizes = [2, 64], strides = [1, 1]} : vector<8x64xf32> to vector<2x64xf32>
    %cst_279 = arith.constant 5.000000e-01 : f32
    %577 = vector.broadcast %cst_279 : f32 to vector<2x64xf32>
    %578 = arith.mulf %576, %577 : vector<2x64xf32>
    %cst_280 = arith.constant 5.000000e-01 : f32
    %579 = vector.broadcast %cst_280 : f32 to vector<2x64xf32>
    %580 = arith.addf %578, %579 : vector<2x64xf32>
    %581 = vector.extract_strided_slice %570 {offsets = [4, 0], sizes = [2, 64], strides = [1, 1]} : vector<8x64xf32> to vector<2x64xf32>
    %cst_281 = arith.constant 5.000000e-01 : f32
    %582 = vector.broadcast %cst_281 : f32 to vector<2x64xf32>
    %583 = arith.mulf %581, %582 : vector<2x64xf32>
    %cst_282 = arith.constant 5.000000e-01 : f32
    %584 = vector.broadcast %cst_282 : f32 to vector<2x64xf32>
    %585 = arith.addf %583, %584 : vector<2x64xf32>
    %586 = vector.extract_strided_slice %570 {offsets = [6, 0], sizes = [2, 64], strides = [1, 1]} : vector<8x64xf32> to vector<2x64xf32>
    %587 = arith.mulf %580, %504 : vector<2x64xf32>
    %588 = arith.mulf %575, %586 : vector<2x64xf32>
    %589 = arith.addf %587, %588 : vector<2x64xf32>
    %590 = math.tanh %589 : vector<2x64xf32>
    %591 = arith.mulf %585, %590 : vector<2x64xf32>
    %592 = tpu.concatenate %591, %545 in 1 : vector<2x64xf32>, vector<2x64xf32> -> vector<2x128xf32>
    %593 = arith.truncf %592 : vector<2x128xf32> to vector<2x128xbf16>
    %cst_283 = arith.constant dense<0.000000e+00> : vector<2x64xf32>
    %594 = tpu.matmul %593, %9, %cst_283 {dimension_numbers = #tpu.dot_dimension_numbers<[1], [0], [0], [1], [0, 0, 1, 1], [], []>} : vector<2x128xbf16>, vector<128x64xbf16>, vector<2x64xf32> -> vector<2x64xf32>
    %595 = arith.addf %594, %19 : vector<2x64xf32>
    %cst_284 = arith.constant dense<0.000000e+00> : vector<2x64xf32>
    %596 = tpu.matmul %593, %11, %cst_284 {dimension_numbers = #tpu.dot_dimension_numbers<[1], [0], [0], [1], [0, 0, 1, 1], [], []>} : vector<2x128xbf16>, vector<128x64xbf16>, vector<2x64xf32> -> vector<2x64xf32>
    %597 = arith.addf %596, %23 : vector<2x64xf32>
    %cst_285 = arith.constant dense<0.000000e+00> : vector<2x64xf32>
    %598 = tpu.matmul %593, %13, %cst_285 {dimension_numbers = #tpu.dot_dimension_numbers<[1], [0], [0], [1], [0, 0, 1, 1], [], []>} : vector<2x128xbf16>, vector<128x64xbf16>, vector<2x64xf32> -> vector<2x64xf32>
    %599 = arith.addf %598, %27 : vector<2x64xf32>
    %cst_286 = arith.constant dense<0.000000e+00> : vector<2x64xf32>
    %600 = tpu.matmul %593, %15, %cst_286 {dimension_numbers = #tpu.dot_dimension_numbers<[1], [0], [0], [1], [0, 0, 1, 1], [], []>} : vector<2x128xbf16>, vector<128x64xbf16>, vector<2x64xf32> -> vector<2x64xf32>
    %601 = arith.addf %600, %31 : vector<2x64xf32>
    %cst_287 = arith.constant 5.000000e-01 : f32
    %602 = vector.broadcast %cst_287 : f32 to vector<2x64xf32>
    %603 = arith.mulf %595, %602 : vector<2x64xf32>
    %cst_288 = arith.constant 5.000000e-01 : f32
    %604 = vector.broadcast %cst_288 : f32 to vector<2x64xf32>
    %605 = arith.mulf %597, %604 : vector<2x64xf32>
    %cst_289 = arith.constant 5.000000e-01 : f32
    %606 = vector.broadcast %cst_289 : f32 to vector<2x64xf32>
    %607 = arith.mulf %601, %606 : vector<2x64xf32>
    %608 = tpu.concatenate %603, %605, %607, %599 in 0 : vector<2x64xf32>, vector<2x64xf32>, vector<2x64xf32>, vector<2x64xf32> -> vector<8x64xf32>
    %609 = math.tanh %608 : vector<8x64xf32>
    %610 = vector.extract_strided_slice %609 {offsets = [0, 0], sizes = [2, 64], strides = [1, 1]} : vector<8x64xf32> to vector<2x64xf32>
    %cst_290 = arith.constant 5.000000e-01 : f32
    %611 = vector.broadcast %cst_290 : f32 to vector<2x64xf32>
    %612 = arith.mulf %610, %611 : vector<2x64xf32>
    %cst_291 = arith.constant 5.000000e-01 : f32
    %613 = vector.broadcast %cst_291 : f32 to vector<2x64xf32>
    %614 = arith.addf %612, %613 : vector<2x64xf32>
    %615 = vector.extract_strided_slice %609 {offsets = [2, 0], sizes = [2, 64], strides = [1, 1]} : vector<8x64xf32> to vector<2x64xf32>
    %cst_292 = arith.constant 5.000000e-01 : f32
    %616 = vector.broadcast %cst_292 : f32 to vector<2x64xf32>
    %617 = arith.mulf %615, %616 : vector<2x64xf32>
    %cst_293 = arith.constant 5.000000e-01 : f32
    %618 = vector.broadcast %cst_293 : f32 to vector<2x64xf32>
    %619 = arith.addf %617, %618 : vector<2x64xf32>
    %620 = vector.extract_strided_slice %609 {offsets = [4, 0], sizes = [2, 64], strides = [1, 1]} : vector<8x64xf32> to vector<2x64xf32>
    %cst_294 = arith.constant 5.000000e-01 : f32
    %621 = vector.broadcast %cst_294 : f32 to vector<2x64xf32>
    %622 = arith.mulf %620, %621 : vector<2x64xf32>
    %cst_295 = arith.constant 5.000000e-01 : f32
    %623 = vector.broadcast %cst_295 : f32 to vector<2x64xf32>
    %624 = arith.addf %622, %623 : vector<2x64xf32>
    %625 = vector.extract_strided_slice %609 {offsets = [6, 0], sizes = [2, 64], strides = [1, 1]} : vector<8x64xf32> to vector<2x64xf32>
    %626 = arith.mulf %619, %543 : vector<2x64xf32>
    %627 = arith.mulf %614, %625 : vector<2x64xf32>
    %628 = arith.addf %626, %627 : vector<2x64xf32>
    %629 = math.tanh %628 : vector<2x64xf32>
    %630 = arith.mulf %624, %629 : vector<2x64xf32>
    %631 = arith.truncf %591 : vector<2x64xf32> to vector<2x64xbf16>
    %c0_296 = arith.constant 0 : index
    %c14 = arith.constant 14 : index
    %c0_297 = arith.constant 0 : index
    %632 = vector.load %arg0[%c0_296, %c14, %c0_297] : memref<4x16x64xf32, #tpu.memory_space<vmem>>, vector<1x2x64xf32>
    %633 = vector.shape_cast %632 : vector<1x2x64xf32> to vector<2x64xf32>
    %cst_298 = arith.constant dense<0.000000e+00> : vector<2x64xf32>
    %634 = tpu.matmul %631, %1, %cst_298 {dimension_numbers = #tpu.dot_dimension_numbers<[1], [0], [0], [1], [0, 0, 1, 1], [], []>} : vector<2x64xbf16>, vector<64x64xbf16>, vector<2x64xf32> -> vector<2x64xf32>
    %635 = arith.addf %633, %634 : vector<2x64xf32>
    %c1_299 = arith.constant 1 : index
    %c14_300 = arith.constant 14 : index
    %c0_301 = arith.constant 0 : index
    %636 = vector.load %arg0[%c1_299, %c14_300, %c0_301] : memref<4x16x64xf32, #tpu.memory_space<vmem>>, vector<1x2x64xf32>
    %637 = vector.shape_cast %636 : vector<1x2x64xf32> to vector<2x64xf32>
    %cst_302 = arith.constant dense<0.000000e+00> : vector<2x64xf32>
    %638 = tpu.matmul %631, %3, %cst_302 {dimension_numbers = #tpu.dot_dimension_numbers<[1], [0], [0], [1], [0, 0, 1, 1], [], []>} : vector<2x64xbf16>, vector<64x64xbf16>, vector<2x64xf32> -> vector<2x64xf32>
    %639 = arith.addf %637, %638 : vector<2x64xf32>
    %c2_303 = arith.constant 2 : index
    %c14_304 = arith.constant 14 : index
    %c0_305 = arith.constant 0 : index
    %640 = vector.load %arg0[%c2_303, %c14_304, %c0_305] : memref<4x16x64xf32, #tpu.memory_space<vmem>>, vector<1x2x64xf32>
    %641 = vector.shape_cast %640 : vector<1x2x64xf32> to vector<2x64xf32>
    %cst_306 = arith.constant dense<0.000000e+00> : vector<2x64xf32>
    %642 = tpu.matmul %631, %5, %cst_306 {dimension_numbers = #tpu.dot_dimension_numbers<[1], [0], [0], [1], [0, 0, 1, 1], [], []>} : vector<2x64xbf16>, vector<64x64xbf16>, vector<2x64xf32> -> vector<2x64xf32>
    %643 = arith.addf %641, %642 : vector<2x64xf32>
    %c3_307 = arith.constant 3 : index
    %c14_308 = arith.constant 14 : index
    %c0_309 = arith.constant 0 : index
    %644 = vector.load %arg0[%c3_307, %c14_308, %c0_309] : memref<4x16x64xf32, #tpu.memory_space<vmem>>, vector<1x2x64xf32>
    %645 = vector.shape_cast %644 : vector<1x2x64xf32> to vector<2x64xf32>
    %cst_310 = arith.constant dense<0.000000e+00> : vector<2x64xf32>
    %646 = tpu.matmul %631, %7, %cst_310 {dimension_numbers = #tpu.dot_dimension_numbers<[1], [0], [0], [1], [0, 0, 1, 1], [], []>} : vector<2x64xbf16>, vector<64x64xbf16>, vector<2x64xf32> -> vector<2x64xf32>
    %647 = arith.addf %645, %646 : vector<2x64xf32>
    %cst_311 = arith.constant 5.000000e-01 : f32
    %648 = vector.broadcast %cst_311 : f32 to vector<2x64xf32>
    %649 = arith.mulf %635, %648 : vector<2x64xf32>
    %cst_312 = arith.constant 5.000000e-01 : f32
    %650 = vector.broadcast %cst_312 : f32 to vector<2x64xf32>
    %651 = arith.mulf %639, %650 : vector<2x64xf32>
    %cst_313 = arith.constant 5.000000e-01 : f32
    %652 = vector.broadcast %cst_313 : f32 to vector<2x64xf32>
    %653 = arith.mulf %647, %652 : vector<2x64xf32>
    %654 = tpu.concatenate %649, %651, %653, %643 in 0 : vector<2x64xf32>, vector<2x64xf32>, vector<2x64xf32>, vector<2x64xf32> -> vector<8x64xf32>
    %655 = math.tanh %654 : vector<8x64xf32>
    %656 = vector.extract_strided_slice %655 {offsets = [0, 0], sizes = [2, 64], strides = [1, 1]} : vector<8x64xf32> to vector<2x64xf32>
    %cst_314 = arith.constant 5.000000e-01 : f32
    %657 = vector.broadcast %cst_314 : f32 to vector<2x64xf32>
    %658 = arith.mulf %656, %657 : vector<2x64xf32>
    %cst_315 = arith.constant 5.000000e-01 : f32
    %659 = vector.broadcast %cst_315 : f32 to vector<2x64xf32>
    %660 = arith.addf %658, %659 : vector<2x64xf32>
    %661 = vector.extract_strided_slice %655 {offsets = [2, 0], sizes = [2, 64], strides = [1, 1]} : vector<8x64xf32> to vector<2x64xf32>
    %cst_316 = arith.constant 5.000000e-01 : f32
    %662 = vector.broadcast %cst_316 : f32 to vector<2x64xf32>
    %663 = arith.mulf %661, %662 : vector<2x64xf32>
    %cst_317 = arith.constant 5.000000e-01 : f32
    %664 = vector.broadcast %cst_317 : f32 to vector<2x64xf32>
    %665 = arith.addf %663, %664 : vector<2x64xf32>
    %666 = vector.extract_strided_slice %655 {offsets = [4, 0], sizes = [2, 64], strides = [1, 1]} : vector<8x64xf32> to vector<2x64xf32>
    %cst_318 = arith.constant 5.000000e-01 : f32
    %667 = vector.broadcast %cst_318 : f32 to vector<2x64xf32>
    %668 = arith.mulf %666, %667 : vector<2x64xf32>
    %cst_319 = arith.constant 5.000000e-01 : f32
    %669 = vector.broadcast %cst_319 : f32 to vector<2x64xf32>
    %670 = arith.addf %668, %669 : vector<2x64xf32>
    %671 = vector.extract_strided_slice %655 {offsets = [6, 0], sizes = [2, 64], strides = [1, 1]} : vector<8x64xf32> to vector<2x64xf32>
    %672 = arith.mulf %665, %589 : vector<2x64xf32>
    %673 = arith.mulf %660, %671 : vector<2x64xf32>
    %674 = arith.addf %672, %673 : vector<2x64xf32>
    %675 = math.tanh %674 : vector<2x64xf32>
    %676 = arith.mulf %670, %675 : vector<2x64xf32>
    %677 = tpu.concatenate %676, %630 in 1 : vector<2x64xf32>, vector<2x64xf32> -> vector<2x128xf32>
    %678 = arith.truncf %677 : vector<2x128xf32> to vector<2x128xbf16>
    %cst_320 = arith.constant dense<0.000000e+00> : vector<2x64xf32>
    %679 = tpu.matmul %678, %9, %cst_320 {dimension_numbers = #tpu.dot_dimension_numbers<[1], [0], [0], [1], [0, 0, 1, 1], [], []>} : vector<2x128xbf16>, vector<128x64xbf16>, vector<2x64xf32> -> vector<2x64xf32>
    %680 = arith.addf %679, %19 : vector<2x64xf32>
    %cst_321 = arith.constant dense<0.000000e+00> : vector<2x64xf32>
    %681 = tpu.matmul %678, %11, %cst_321 {dimension_numbers = #tpu.dot_dimension_numbers<[1], [0], [0], [1], [0, 0, 1, 1], [], []>} : vector<2x128xbf16>, vector<128x64xbf16>, vector<2x64xf32> -> vector<2x64xf32>
    %682 = arith.addf %681, %23 : vector<2x64xf32>
    %cst_322 = arith.constant dense<0.000000e+00> : vector<2x64xf32>
    %683 = tpu.matmul %678, %13, %cst_322 {dimension_numbers = #tpu.dot_dimension_numbers<[1], [0], [0], [1], [0, 0, 1, 1], [], []>} : vector<2x128xbf16>, vector<128x64xbf16>, vector<2x64xf32> -> vector<2x64xf32>
    %684 = arith.addf %683, %27 : vector<2x64xf32>
    %cst_323 = arith.constant dense<0.000000e+00> : vector<2x64xf32>
    %685 = tpu.matmul %678, %15, %cst_323 {dimension_numbers = #tpu.dot_dimension_numbers<[1], [0], [0], [1], [0, 0, 1, 1], [], []>} : vector<2x128xbf16>, vector<128x64xbf16>, vector<2x64xf32> -> vector<2x64xf32>
    %686 = arith.addf %685, %31 : vector<2x64xf32>
    %cst_324 = arith.constant 5.000000e-01 : f32
    %687 = vector.broadcast %cst_324 : f32 to vector<2x64xf32>
    %688 = arith.mulf %680, %687 : vector<2x64xf32>
    %cst_325 = arith.constant 5.000000e-01 : f32
    %689 = vector.broadcast %cst_325 : f32 to vector<2x64xf32>
    %690 = arith.mulf %682, %689 : vector<2x64xf32>
    %cst_326 = arith.constant 5.000000e-01 : f32
    %691 = vector.broadcast %cst_326 : f32 to vector<2x64xf32>
    %692 = arith.mulf %686, %691 : vector<2x64xf32>
    %693 = tpu.concatenate %688, %690, %692, %684 in 0 : vector<2x64xf32>, vector<2x64xf32>, vector<2x64xf32>, vector<2x64xf32> -> vector<8x64xf32>
    %694 = math.tanh %693 : vector<8x64xf32>
    %695 = vector.extract_strided_slice %694 {offsets = [0, 0], sizes = [2, 64], strides = [1, 1]} : vector<8x64xf32> to vector<2x64xf32>
    %cst_327 = arith.constant 5.000000e-01 : f32
    %696 = vector.broadcast %cst_327 : f32 to vector<2x64xf32>
    %697 = arith.mulf %695, %696 : vector<2x64xf32>
    %cst_328 = arith.constant 5.000000e-01 : f32
    %698 = vector.broadcast %cst_328 : f32 to vector<2x64xf32>
    %699 = arith.addf %697, %698 : vector<2x64xf32>
    %700 = vector.extract_strided_slice %694 {offsets = [2, 0], sizes = [2, 64], strides = [1, 1]} : vector<8x64xf32> to vector<2x64xf32>
    %cst_329 = arith.constant 5.000000e-01 : f32
    %701 = vector.broadcast %cst_329 : f32 to vector<2x64xf32>
    %702 = arith.mulf %700, %701 : vector<2x64xf32>
    %cst_330 = arith.constant 5.000000e-01 : f32
    %703 = vector.broadcast %cst_330 : f32 to vector<2x64xf32>
    %704 = arith.addf %702, %703 : vector<2x64xf32>
    %705 = vector.extract_strided_slice %694 {offsets = [4, 0], sizes = [2, 64], strides = [1, 1]} : vector<8x64xf32> to vector<2x64xf32>
    %cst_331 = arith.constant 5.000000e-01 : f32
    %706 = vector.broadcast %cst_331 : f32 to vector<2x64xf32>
    %707 = arith.mulf %705, %706 : vector<2x64xf32>
    %cst_332 = arith.constant 5.000000e-01 : f32
    %708 = vector.broadcast %cst_332 : f32 to vector<2x64xf32>
    %709 = arith.addf %707, %708 : vector<2x64xf32>
    %710 = vector.extract_strided_slice %694 {offsets = [6, 0], sizes = [2, 64], strides = [1, 1]} : vector<8x64xf32> to vector<2x64xf32>
    %711 = arith.mulf %704, %628 : vector<2x64xf32>
    %712 = arith.mulf %699, %710 : vector<2x64xf32>
    %713 = arith.addf %711, %712 : vector<2x64xf32>
    %714 = math.tanh %713 : vector<2x64xf32>
    %715 = arith.mulf %709, %714 : vector<2x64xf32>
    %716 = tpu.concatenate %120, %205, %290, %375, %460, %545, %630, %715 in 0 : vector<2x64xf32>, vector<2x64xf32>, vector<2x64xf32>, vector<2x64xf32>, vector<2x64xf32>, vector<2x64xf32>, vector<2x64xf32>, vector<2x64xf32> -> vector<16x64xf32>
    %717 = arith.truncf %716 : vector<16x64xf32> to vector<16x64xbf16>
    %c0_333 = arith.constant 0 : index
    %c0_334 = arith.constant 0 : index
    %718 = vector.load %arg4[%c0_333, %c0_334] : memref<64x2xbf16, #tpu.memory_space<vmem>>, vector<64x2xbf16>
    %cst_335 = arith.constant dense<0.000000e+00> : vector<16x2xf32>
    %719 = tpu.matmul %717, %718, %cst_335 {dimension_numbers = #tpu.dot_dimension_numbers<[1], [0], [0], [1], [0, 0, 1, 1], [], []>} : vector<16x64xbf16>, vector<64x2xbf16>, vector<16x2xf32> -> vector<16x2xf32>
    %c0_336 = arith.constant 0 : index
    %c0_337 = arith.constant 0 : index
    %720 = vector.load %arg5[%c0_336, %c0_337] : memref<1x2xf32, #tpu.memory_space<vmem>>, vector<1x2xf32>
    %721 = vector.shape_cast %720 : vector<1x2xf32> to vector<1x2xf32>
    %722 = vector.broadcast %721 : vector<1x2xf32> to vector<16x2xf32>
    %723 = arith.addf %719, %722 : vector<16x2xf32>
    %c0_338 = arith.constant 0 : index
    %c0_339 = arith.constant 0 : index
    %724 = vector.load %arg6[%c0_338, %c0_339] : memref<16x2xf32, #tpu.memory_space<vmem>>, vector<16x2xf32>
    tpu.vector_store %arg6[%c0_338, %c0_339], %723 {strides = array<i32>} : memref<16x2xf32, #tpu.memory_space<vmem>>, vector<16x2xf32>,
    return
  }
}

</mosaic_0001>

<bundles_post_ra>
// kernel: rnn_forward.1
= control target key start
LH: loop header
LB: loop body
LE: loop exit
PB: predicated region body
PF: predicated region fallthrough
CT: control target
= control target key end

     0   :  { %v7798_v0 = vmov 0.0   ;;  %vm5710_vm0 = vmmov 0   ;;  %v5711_v11 = vmov 0   ;;  %vm440_vm1 = vcmask 1041408   ;;  %s5712_s21 = smov 64   ;;  %s7791_s1 = inlined_call_operand.vmem [shape: bf16[4,64,64], index: 1, kind: input, shape index: {}]   ;;  %s7792_s2 = inlined_call_operand.vmem [shape: bf16[4,128,64], index: 2, kind: input, shape index: {}]   ;;  %s7793_s0 = inlined_call_operand.vmem [shape: f32[4,16,64], index: 0, kind: input, shape index: {}]   ;;  %s7794_s3 = inlined_call_operand.vmem [shape: f32[4,1,64], index: 3, kind: input, shape index: {}]   ;;  %s7795_s4 = inlined_call_operand.vmem [shape: bf16[64,2], index: 4, kind: input, shape index: {}]   ;;  %s7796_s5 = inlined_call_operand.vmem [shape: f32[1,2], index: 5, kind: input, shape index: {}]   ;;  %s7797_s6 = inlined_call_operand.vmem [shape: f32[16,2], index: 6, kind: output, shape index: {}]  }
   0x1   :  { %4449 = vmatprep.subr.bf16.mxu0 %v7798_v0  ;;  %4461 = vmatprep.subr.bf16.mxu1 %v7798_v0  ;;  %v5753_v1 = vld [vmem:[%s7791_s1 + $0x18] sm:$0xff]   ;;  %v5768_v3 = vld [vmem:[%s7791_s1 + $0x10] sm:$0xff]   ;;  %v5782_v5 = vld [vmem:[%s7791_s1 + $0x8] sm:$0xff]   ;;  %vm442_vm2 = vcmask 1043456   ;;  %vm444_vm3 = vcmask 1045504   ;;  %vm182_vm4 = vcmask 523264  }
   0x2   :  { %v5758_v2 = vld [vmem:[%s7791_s1 + $0x38] sm:$0xff]   ;;  %4457 = vmatprep.mubr.msk.bf16.mxu0 %vm5710_vm0, %v7798_v0  ;;  %4469 = vmatprep.mubr.msk.bf16.mxu1 %vm5710_vm0, %v7798_v0  ;;  %v5775_v4 = vld [vmem:[%s7791_s1 + $0x30] sm:$0xff]   ;;  %v5789_v6 = vld [vmem:[%s7791_s1 + $0x28] sm:$0xff]   ;;  %vm3804_vm5 = vcmask 15360  }
   0x3   :  { %4450 = vmatpush3.bf16.msra.mxu0 %v5753_v1  ;;  %4462 = vmatpush3.bf16.msra.mxu1 %v5758_v2  ;;  %v5796_v7 = vld [vmem:[%s7791_s1] sm:$0xff]   ;;  %v5810_v9 = vld [vmem:[%s7791_s1 + $0x58] sm:$0xff]   ;;  %v5824_v12 = vld [vmem:[%s7791_s1 + $0x50] sm:$0xff]  }
   0x4   :  { %4451 = vmatprep.subr.bf16.mxu0 %v7798_v0  ;;  %4463 = vmatprep.subr.bf16.mxu1 %v7798_v0  ;;  %v5803_v8 = vld [vmem:[%s7791_s1 + $0x20] sm:$0xff]   ;;  %v5817_v10 = vld [vmem:[%s7791_s1 + $0x78] sm:$0xff]   ;;  %v5831_v13 = vld [vmem:[%s7791_s1 + $0x70] sm:$0xff]  }
   0x5   :  { %v5842_v14 = vld [vmem:[%s7791_s1 + $0x48] sm:$0xff]   ;;  %v5856_v16 = vld [vmem:[%s7791_s1 + $0x40] sm:$0xff]   ;;  %v5877_v18 = vld [vmem:[%s7792_s2 + $0x38] sm:$0xff]  }
   0x6   :  { %v5849_v15 = vld [vmem:[%s7791_s1 + $0x68] sm:$0xff]   ;;  %v5863_v17 = vld [vmem:[%s7791_s1 + $0x60] sm:$0xff]   ;;  %v5882_v19 = vld [vmem:[%s7792_s2 + $0x78] sm:$0xff]  }
   0x7   :  { %4452 = vmatpush3.bf16.msra.mxu0 %v5768_v3  ;;  %4464 = vmatpush3.bf16.msra.mxu1 %v5775_v4  ;;  %v5888_v20 = vld [vmem:[%s7792_s2 + $0x30] sm:$0xff]   ;;  %v5902_v22 = vld [vmem:[%s7792_s2 + $0x28] sm:$0xff]   ;;  %v5916_v24 = vld [vmem:[%s7792_s2 + $0x20] sm:$0xff]  }
   0x8   :  { %4453 = vmatprep.subr.bf16.mxu0 %v7798_v0  ;;  %4465 = vmatprep.subr.bf16.mxu1 %v7798_v0  ;;  %v5895_v21 = vld [vmem:[%s7792_s2 + $0x70] sm:$0xff]   ;;  %v5909_v23 = vld [vmem:[%s7792_s2 + $0x68] sm:$0xff]   ;;  %v5923_v25 = vld [vmem:[%s7792_s2 + $0x60] sm:$0xff]  }
   0x9   :  { %v5930_v26 = vld [vmem:[%s7792_s2 + $0x18] sm:$0xff]   ;;  %v5943_v28 = vld [vmem:[%s7792_s2 + $0x10] sm:$0xff]   ;;  %v5957_v30 = vld [vmem:[%s7792_s2 + $0x8] sm:$0xff]  }
   0xa   :  { %v5937_v27 = vld [vmem:[%s7792_s2 + $0x58] sm:$0xff]   ;;  %v5948_v29 = vld [vmem:[%s7792_s2 + $0x50] sm:$0xff]   ;;  %v5962_v31 = vld [vmem:[%s7792_s2 + $0x48] sm:$0xff]  }
   0xb   :  { %4454 = vmatpush3.bf16.msra.mxu0 %v5782_v5  ;;  %4466 = vmatpush3.bf16.msra.mxu1 %v5789_v6  ;;  %7824 = vst [vmem:[#allocation2_spill] sm:$0xff] %v5962_v31  ;;  %v5972_v32 = vld [vmem:[%s7792_s2] sm:$0xff]   ;;  %v3894_v42 = vld [vmem:[%s7793_s0 + $0x10] sm:$0x3] }
   0xc   :  { %4455 = vmatprep.subr.bf16.mxu0 %v7798_v0  ;;  %4467 = vmatprep.subr.bf16.mxu1 %v7798_v0  ;;  %7825 = vst [vmem:[#allocation3_spill] sm:$0xff] %v5972_v32  ;;  %v5979_v33 = vld [vmem:[%s7792_s2 + $0x40] sm:$0xff]   ;;  %v3904_v48 = vld [vmem:[%s7793_s0 + $0x30] sm:$0x3] }
   0xd   :  { %7826 = vst [vmem:[#allocation4_spill] sm:$0xff] %v5979_v33  ;;  %v157_v44 = vld [vmem:[%s7793_s0] sm:$0x3] }
   0xe   :  { %v3899_v45 = vld [vmem:[%s7793_s0 + $0x20] sm:$0x3] }
   0xf   :  { %4456 = vmatpush3.bf16.msra.mxu0 %v5796_v7  ;;  %4468 = vmatpush3.bf16.msra.mxu1 %v5803_v8 }
  0x10   :  { %4473 = vmatprep.subr.bf16.mxu0 %v7798_v0  ;;  %4485 = vmatprep.subr.bf16.mxu1 %v7798_v0 }
  0x12   :  { %4458 = vmatmul.mubr.bf16.vlgmr.msra.gmra.mxu0 %v5711_v11  ;;  %4470 = vmatmul.mubr.bf16.vlgmr.msra.gmra.mxu1 %v5711_v11 }
  0x13   :  { %4474 = vmatpush3.bf16.msra.mxu0 %v5810_v9  ;;  %4486 = vmatpush3.bf16.msra.mxu1 %v5817_v10 }
  0x14   :  { %4475 = vmatprep.subr.bf16.mxu0 %v7798_v0  ;;  %4487 = vmatprep.subr.bf16.mxu1 %v7798_v0 }
  0x15   :  { %4481 = vmatprep.mubr.msk.bf16.mxu0 %vm5710_vm0, %v7798_v0  ;;  %4493 = vmatprep.mubr.msk.bf16.mxu1 %vm5710_vm0, %v7798_v0 }
  0x17   :  { %4476 = vmatpush3.bf16.msra.mxu0 %v5824_v12  ;;  %4488 = vmatpush3.bf16.msra.mxu1 %v5831_v13 }
  0x18   :  { %4477 = vmatprep.subr.bf16.mxu0 %v7798_v0  ;;  %4489 = vmatprep.subr.bf16.mxu1 %v7798_v0 }
  0x1b   :  { %4478 = vmatpush3.bf16.msra.mxu0 %v5842_v14  ;;  %4490 = vmatpush3.bf16.msra.mxu1 %v5849_v15 }
  0x1c   :  { %4479 = vmatprep.subr.bf16.mxu0 %v7798_v0  ;;  %4491 = vmatprep.subr.bf16.mxu1 %v7798_v0 }
  0x1f   :  { %4480 = vmatpush3.bf16.msra.mxu0 %v5856_v16  ;;  %4492 = vmatpush3.bf16.msra.mxu1 %v5863_v17 }
  0x20   :  { %4497 = vmatprep.subr.bf16.mxu0 %v7798_v0  ;;  %4517 = vmatprep.subr.bf16.mxu1 %v7798_v0 }
  0x22   :  { %4482 = vmatmul.mubr.bf16.vlgmr.msra.gmra.mxu0 %v5711_v11  ;;  %4494 = vmatmul.mubr.bf16.vlgmr.msra.gmra.mxu1 %v5711_v11 }
  0x23   :  { %4513 = vmatprep.mubr.msk.bf16.mxu0 %vm5710_vm0, %v7798_v0  ;;  %4533 = vmatprep.mubr.msk.bf16.mxu1 %vm5710_vm0, %v7798_v0 }
  0x24   :  { %4498 = vmatpush3.bf16.msra.mxu0 %v5877_v18  ;;  %4518 = vmatpush3.bf16.msra.mxu1 %v5882_v19 }
  0x25   :  { %4499 = vmatprep.subr.bf16.mxu0 %v7798_v0  ;;  %4519 = vmatprep.subr.bf16.mxu1 %v7798_v0 }
  0x28   :  { %4500 = vmatpush3.bf16.msra.mxu0 %v5888_v20  ;;  %4520 = vmatpush3.bf16.msra.mxu1 %v5895_v21 }
  0x29   :  { %4501 = vmatprep.subr.bf16.mxu0 %v7798_v0  ;;  %4521 = vmatprep.subr.bf16.mxu1 %v7798_v0 }
  0x2c   :  { %4502 = vmatpush3.bf16.msra.mxu0 %v5902_v22  ;;  %4522 = vmatpush3.bf16.msra.mxu1 %v5909_v23 }
  0x2d   :  { %4503 = vmatprep.subr.bf16.mxu0 %v7798_v0  ;;  %4523 = vmatprep.subr.bf16.mxu1 %v7798_v0 }
  0x30   :  { %4504 = vmatpush3.bf16.msra.mxu0 %v5916_v24  ;;  %4524 = vmatpush3.bf16.msra.mxu1 %v5923_v25 }
  0x31   :  { %4505 = vmatprep.subr.bf16.mxu0 %v7798_v0  ;;  %4525 = vmatprep.subr.bf16.mxu1 %v7798_v0 }
  0x34   :  { %4506 = vmatpush3.bf16.msra.mxu0 %v5930_v26  ;;  %4526 = vmatpush3.bf16.msra.mxu1 %v5937_v27 }
  0x35   :  { %4507 = vmatprep.subr.bf16.mxu0 %v7798_v0  ;;  %4527 = vmatprep.subr.bf16.mxu1 %v7798_v0 }
  0x38   :  { %4508 = vmatpush3.bf16.msra.mxu0 %v5943_v28  ;;  %4528 = vmatpush3.bf16.msra.mxu1 %v5948_v29 }
  0x39   :  { %4509 = vmatprep.subr.bf16.mxu0 %v7798_v0  ;;  %4529 = vmatprep.subr.bf16.mxu1 %v7798_v0 }
  0x3c   :  { %4510 = vmatpush3.bf16.msra.mxu0 %v5957_v30  ;;  %4530 = vmatpush3.bf16.msra.mxu1 %v5962_v31 }
  0x3d   :  { %4511 = vmatprep.subr.bf16.mxu0 %v7798_v0  ;;  %4531 = vmatprep.subr.bf16.mxu1 %v7798_v0 }
  0x40   :  { %4512 = vmatpush3.bf16.msra.mxu0 %v5972_v32  ;;  %4532 = vmatpush3.bf16.msra.mxu1 %v5979_v33 }
  0x41   :  { %4537 = vmatprep.subr.bf16.mxu0 %v7798_v0  ;;  %4557 = vmatprep.subr.bf16.mxu1 %v7798_v0 }
  0xd2   :  { %v220_v34 = vpop.f32.mrf.mxu0  ;;  %v287_v35 = vpop.f32.mrf.mxu1 }
  0xd3   :  { %v293_v43 = vadd.f32 %v3894_v42, %v287_v35  ;;  %v226_v46 = vadd.f32 %v220_v34, %v157_v44 }
  0xd4   :  { %v4459_v36 = vpop.f32.mrf.mxu0  ;;  %v4471_v37 = vpop.f32.mrf.mxu1 }
  0xd5   :  { %v429_v47 = vmul.f32 0.5, %v293_v43  ;;  %v428_v54 = vmul.f32 0.5, %v226_v46 }
  0xd6   :  { %v223_v38 = vpop.f32.mrf.mxu0  ;;  %v290_v39 = vpop.f32.mrf.mxu1 }
  0xd7   :  { %v432_v55 = vrot.slane %v429_v47, 6 }
  0xd8   :  { %v4460_v40 = vpop.f32.mrf.mxu0  ;;  %v4472_v41 = vpop.f32.mrf.mxu1 }
  0xd9   :  { %v441_v63 = vsel %vm440_vm1, %v428_v54, %v432_v55  ;;  %v6041_v54 = vld [vmem:[%s7792_s2 + $0xa8] sm:$0xff]  }
  0xda   :  { %v6046_v55 = vld [vmem:[%s7792_s2 + $0xe8] sm:$0xff]  }
  0xe2   :  { %v354_v49 = vpop.f32.mrf.mxu0  ;;  %v421_v51 = vpop.f32.mrf.mxu1 }
  0xe3   :  { %v360_v50 = vadd.f32 %v3899_v45, %v354_v49  ;;  %v427_v52 = vadd.f32 %v3904_v48, %v421_v51  ;;  %v6011_v49 = vld [vmem:[%s7792_s2 + $0xb8] sm:$0xff]  }
  0xe4   :  { %v4483_v53 = vpop.f32.mrf.mxu0  ;;  %v4495_v56 = vpop.f32.mrf.mxu1 }
  0xe5   :  { %v430_v57 = vmul.f32 0.5, %v427_v52  ;;  %v438_v59 = vrot.slane %v360_v50, 2  ;;  %v6016_v50 = vld [vmem:[%s7792_s2 + $0xf8] sm:$0xff]   ;;  %v6023_v52 = vld [vmem:[%s7792_s2 + $0xb0] sm:$0xff]   ;;  %v6055_v56 = vld [vmem:[%s7792_s2 + $0xa0] sm:$0xff]  }
  0xe6   :  { %v357_v58 = vpop.f32.mrf.mxu0  ;;  %v424_v60 = vpop.f32.mrf.mxu1  ;;  %v6028_v53 = vld [vmem:[%s7792_s2 + $0xf0] sm:$0xff]  }
  0xe7   :  { %v435_v61 = vrot.slane %v430_v57, 4  ;;  %v6060_v57 = vld [vmem:[%s7792_s2 + $0xe0] sm:$0xff]   ;;  %v6069_v58 = vld [vmem:[%s7792_s2 + $0x98] sm:$0xff]   ;;  %v6083_v60 = vld [vmem:[%s7792_s2 + $0x90] sm:$0xff]  }
  0xe8   :  { %v4484_v62 = vpop.f32.mrf.mxu0  ;;  %v4496_v11 = vpop.f32.mrf.mxu1 }
  0xe9   :  { %v443_v34 = vsel %vm442_vm2, %v441_v63, %v435_v61  ;;  %v6088_v61 = vld [vmem:[%s7792_s2 + $0xd0] sm:$0xff]   ;;  %v6097_v62 = vld [vmem:[%s7792_s2 + $0x88] sm:$0xff]   ;;  %v6111_v11 = vld [vmem:[%s7792_s2 + $0x80] sm:$0xff]  }
  0xea   :  { %v445_v35 = vsel %vm444_vm3, %v443_v34, %v438_v59  ;;  %v6074_v59 = vld [vmem:[%s7792_s2 + $0xd8] sm:$0xff]   ;;  %v6102_v63 = vld [vmem:[%s7792_s2 + $0xc8] sm:$0xff]   ;;  %v6116_v34 = vld [vmem:[%s7792_s2 + $0xc0] sm:$0xff]  }
  0xeb   :  { %5541 = vtanh.f32 %v445_v35 }
  0xf8   :  { %v5542_v36 = vpop.eup %5541 }
  0xf9   :  { %v447_v37 = vmul.f32 0.5, %v5542_v36  ;;  %v451_v39 = vrot.slane %v5542_v36, 6 }
  0xfb   :  { %v448_v38 = vadd.f32 0.5, %v447_v37 }
  0xfd   :  { %v453_v40 = vmul.f32 %v451_v39, %v448_v38  ;;  %v449_v41 = vmul.f32 0.0, %v448_v38 }
  0xff   :  { %v455_v42 = vrot.slane %v453_v40, 6  ;;  %v6209_v40 = vld [vmem:[%s7794_s3 + $0x1] ss:$0 sm:$0xff] }
 0x100   :  { %7827 = vst [vmem:[#allocation5_spill] sm:$0xff] %v6209_v40 }
 0x101   :  { %v6001_v43 = vadd.f32 %v455_v42, %v449_v41  ;;  %v6215_v42 = vld [vmem:[%s7794_s3] ss:$0 sm:$0xff] }
 0x102   :  { %7828 = vst [vmem:[#allocation6_spill] sm:$0xff] %v6215_v42 }
 0x103   :  { %5543 = vtanh.f32 %v6001_v43 }
 0x110   :  { %v5544_v44 = vpop.eup %5543 }
 0x111   :  { %v460_v45 = vrot.slane %v5544_v44, 6 }
 0x113   :  { %v6004_v46 = vmul.f32 %v460_v45, %v448_v38  ;;  %v6220_v45 = vld [vmem:[%s7794_s3 + $0x3] ss:$0 sm:$0xff] }
 0x114   :  { %7829 = vst [vmem:[#allocation7_spill] sm:$0xff] %v6220_v45 }
 0x115   :  { %v463_v47 = vsel %vm182_vm4, %v6004_v46, 0.0 }
 0x116   :  { %v464_v48 = vpack.c.bf16 %v463_v47, %v463_v47 }
 0x118   :  { %v466_v51 = vrot.slane %v464_v48, 2 }
 0x11a   :  { %4514 = vmatmul.mubr.bf16.vlgmr.msra.gmra.mxu0 %v466_v51  ;;  %4534 = vmatmul.mubr.bf16.vlgmr.msra.gmra.mxu1 %v466_v51 }
 0x11b   :  { %4538 = vmatpush3.bf16.msra.mxu0 %v6011_v49  ;;  %4558 = vmatpush3.bf16.msra.mxu1 %v6016_v50 }
 0x11c   :  { %4539 = vmatprep.subr.bf16.mxu0 %v7798_v0  ;;  %4559 = vmatprep.subr.bf16.mxu1 %v7798_v0 }
 0x11d   :  { %4553 = vmatprep.mubr.msk.bf16.mxu0 %vm5710_vm0, %v7798_v0  ;;  %4573 = vmatprep.mubr.msk.bf16.mxu1 %vm5710_vm0, %v7798_v0 }
 0x11f   :  { %4540 = vmatpush3.bf16.msra.mxu0 %v6023_v52  ;;  %4560 = vmatpush3.bf16.msra.mxu1 %v6028_v53 }
 0x120   :  { %4541 = vmatprep.subr.bf16.mxu0 %v7798_v0  ;;  %4561 = vmatprep.subr.bf16.mxu1 %v7798_v0 }
 0x123   :  { %4542 = vmatpush3.bf16.msra.mxu0 %v6041_v54  ;;  %4562 = vmatpush3.bf16.msra.mxu1 %v6046_v55 }
 0x124   :  { %4543 = vmatprep.subr.bf16.mxu0 %v7798_v0  ;;  %4563 = vmatprep.subr.bf16.mxu1 %v7798_v0 }
 0x127   :  { %4544 = vmatpush3.bf16.msra.mxu0 %v6055_v56  ;;  %4564 = vmatpush3.bf16.msra.mxu1 %v6060_v57 }
 0x128   :  { %4545 = vmatprep.subr.bf16.mxu0 %v7798_v0  ;;  %4565 = vmatprep.subr.bf16.mxu1 %v7798_v0 }
 0x12b   :  { %4546 = vmatpush3.bf16.msra.mxu0 %v6069_v58  ;;  %4566 = vmatpush3.bf16.msra.mxu1 %v6074_v59 }
 0x12c   :  { %4547 = vmatprep.subr.bf16.mxu0 %v7798_v0  ;;  %4567 = vmatprep.subr.bf16.mxu1 %v7798_v0 }
 0x12f   :  { %4548 = vmatpush3.bf16.msra.mxu0 %v6083_v60  ;;  %4568 = vmatpush3.bf16.msra.mxu1 %v6088_v61 }
 0x130   :  { %4549 = vmatprep.subr.bf16.mxu0 %v7798_v0  ;;  %4569 = vmatprep.subr.bf16.mxu1 %v7798_v0 }
 0x133   :  { %4550 = vmatpush3.bf16.msra.mxu0 %v6097_v62  ;;  %4570 = vmatpush3.bf16.msra.mxu1 %v6102_v63 }
 0x134   :  { %4551 = vmatprep.subr.bf16.mxu0 %v7798_v0  ;;  %4571 = vmatprep.subr.bf16.mxu1 %v7798_v0 }
 0x137   :  { %4552 = vmatpush3.bf16.msra.mxu0 %v6111_v11  ;;  %4572 = vmatpush3.bf16.msra.mxu1 %v6116_v34 }
 0x138   :  { %4577 = vmatprep.subr.bf16.mxu0 %v7798_v0  ;;  %4589 = vmatprep.subr.bf16.mxu1 %v7798_v0 }
 0x13a   :  { %4554 = vmatmul.mubr.bf16.vlgmr.msra.gmra.mxu0 %v466_v51  ;;  %4574 = vmatmul.mubr.bf16.vlgmr.msra.gmra.mxu1 %v466_v51 }
 0x13b   :  { %4578 = vmatpush3.bf16.msra.mxu0 %v5753_v1  ;;  %4590 = vmatpush3.bf16.msra.mxu1 %v5758_v2  ;;  %v852_v1 = vpack.c.bf16 %v6004_v46, %v6004_v46  ;;  %v6225_v46 = vld [vmem:[%s7794_s3 + $0x2] ss:$0 sm:$0xff] }
 0x13c   :  { %4579 = vmatprep.subr.bf16.mxu0 %v7798_v0  ;;  %4591 = vmatprep.subr.bf16.mxu1 %v7798_v0  ;;  %7830 = vst [vmem:[#allocation8_spill] sm:$0xff] %v6225_v46 }
 0x13d   :  { %4585 = vmatprep.mubr.msk.bf16.mxu0 %vm5710_vm0, %v7798_v0  ;;  %4597 = vmatprep.mubr.msk.bf16.mxu1 %vm5710_vm0, %v7798_v0  ;;  %v855_v2 = vrot.slane %v852_v1, 2 }
 0x13f   :  { %4580 = vmatpush3.bf16.msra.mxu0 %v5768_v3  ;;  %4592 = vmatpush3.bf16.msra.mxu1 %v5775_v4 }
 0x140   :  { %4581 = vmatprep.subr.bf16.mxu0 %v7798_v0  ;;  %4593 = vmatprep.subr.bf16.mxu1 %v7798_v0 }
 0x143   :  { %4582 = vmatpush3.bf16.msra.mxu0 %v5782_v5  ;;  %4594 = vmatpush3.bf16.msra.mxu1 %v5789_v6 }
 0x144   :  { %4583 = vmatprep.subr.bf16.mxu0 %v7798_v0  ;;  %4595 = vmatprep.subr.bf16.mxu1 %v7798_v0 }
 0x147   :  { %4584 = vmatpush3.bf16.msra.mxu0 %v5796_v7  ;;  %4596 = vmatpush3.bf16.msra.mxu1 %v5803_v8 }
 0x148   :  { %4601 = vmatprep.subr.bf16.mxu0 %v7798_v0  ;;  %4613 = vmatprep.subr.bf16.mxu1 %v7798_v0 }
 0x14a   :  { %4586 = vmatmul.mubr.msk.bf16.vlgmr.msra.gmra.mxu0 %vm182_vm4, %v855_v2  ;;  %4598 = vmatmul.mubr.msk.bf16.vlgmr.msra.gmra.mxu1 %vm182_vm4, %v855_v2 }
 0x14b   :  { %4602 = vmatpush3.bf16.msra.mxu0 %v5810_v9  ;;  %4614 = vmatpush3.bf16.msra.mxu1 %v5817_v10 }
 0x14c   :  { %4603 = vmatprep.subr.bf16.mxu0 %v7798_v0  ;;  %4615 = vmatprep.subr.bf16.mxu1 %v7798_v0 }
 0x14d   :  { %4609 = vmatprep.mubr.msk.bf16.mxu0 %vm5710_vm0, %v7798_v0  ;;  %4621 = vmatprep.mubr.msk.bf16.mxu1 %vm5710_vm0, %v7798_v0 }
 0x14f   :  { %4604 = vmatpush3.bf16.msra.mxu0 %v5824_v12  ;;  %4616 = vmatpush3.bf16.msra.mxu1 %v5831_v13 }
 0x150   :  { %4605 = vmatprep.subr.bf16.mxu0 %v7798_v0  ;;  %4617 = vmatprep.subr.bf16.mxu1 %v7798_v0 }
 0x153   :  { %4606 = vmatpush3.bf16.msra.mxu0 %v5842_v14  ;;  %4618 = vmatpush3.bf16.msra.mxu1 %v5849_v15 }
 0x154   :  { %4607 = vmatprep.subr.bf16.mxu0 %v7798_v0  ;;  %4619 = vmatprep.subr.bf16.mxu1 %v7798_v0 }
 0x157   :  { %4608 = vmatpush3.bf16.msra.mxu0 %v5856_v16  ;;  %4620 = vmatpush3.bf16.msra.mxu1 %v5863_v17 }
 0x158   :  { %4625 = vmatprep.subr.bf16.mxu0 %v7798_v0  ;;  %4645 = vmatprep.subr.bf16.mxu1 %v7798_v0 }
 0x15a   :  { %4610 = vmatmul.mubr.msk.bf16.vlgmr.msra.gmra.mxu0 %vm182_vm4, %v855_v2  ;;  %4622 = vmatmul.mubr.msk.bf16.vlgmr.msra.gmra.mxu1 %vm182_vm4, %v855_v2 }
 0x15b   :  { %4626 = vmatpush3.bf16.msra.mxu0 %v5877_v18  ;;  %4646 = vmatpush3.bf16.msra.mxu1 %v5882_v19 }
 0x15c   :  { %4627 = vmatprep.subr.bf16.mxu0 %v7798_v0  ;;  %4647 = vmatprep.subr.bf16.mxu1 %v7798_v0 }
 0x15d   :  { %4641 = vmatprep.mubr.msk.bf16.mxu0 %vm5710_vm0, %v7798_v0  ;;  %4661 = vmatprep.mubr.msk.bf16.mxu1 %vm5710_vm0, %v7798_v0 }
 0x15f   :  { %4628 = vmatpush3.bf16.msra.mxu0 %v5888_v20  ;;  %4648 = vmatpush3.bf16.msra.mxu1 %v5895_v21 }
 0x160   :  { %4629 = vmatprep.subr.bf16.mxu0 %v7798_v0  ;;  %4649 = vmatprep.subr.bf16.mxu1 %v7798_v0 }
 0x163   :  { %4630 = vmatpush3.bf16.msra.mxu0 %v5902_v22  ;;  %4650 = vmatpush3.bf16.msra.mxu1 %v5909_v23 }
 0x164   :  { %4631 = vmatprep.subr.bf16.mxu0 %v7798_v0  ;;  %4651 = vmatprep.subr.bf16.mxu1 %v7798_v0 }
 0x167   :  { %4632 = vmatpush3.bf16.msra.mxu0 %v5916_v24  ;;  %4652 = vmatpush3.bf16.msra.mxu1 %v5923_v25 }
 0x168   :  { %4633 = vmatprep.subr.bf16.mxu0 %v7798_v0  ;;  %4653 = vmatprep.subr.bf16.mxu1 %v7798_v0 }
 0x16b   :  { %4634 = vmatpush3.bf16.msra.mxu0 %v5930_v26  ;;  %4654 = vmatpush3.bf16.msra.mxu1 %v5937_v27 }
 0x16c   :  { %4635 = vmatprep.subr.bf16.mxu0 %v7798_v0  ;;  %4655 = vmatprep.subr.bf16.mxu1 %v7798_v0 }
 0x16f   :  { %4636 = vmatpush3.bf16.msra.mxu0 %v5943_v28  ;;  %4656 = vmatpush3.bf16.msra.mxu1 %v5948_v29 }
 0x170   :  { %4637 = vmatprep.subr.bf16.mxu0 %v7798_v0  ;;  %4657 = vmatprep.subr.bf16.mxu1 %v7798_v0 }
 0x173   :  { %4638 = vmatpush3.bf16.msra.mxu0 %v5957_v30  ;;  %4658 = vmatpush3.bf16.msra.mxu1 %v5962_v31 }
 0x174   :  { %4639 = vmatprep.subr.bf16.mxu0 %v7798_v0  ;;  %4659 = vmatprep.subr.bf16.mxu1 %v7798_v0 }
 0x177   :  { %4640 = vmatpush3.bf16.msra.mxu0 %v5972_v32  ;;  %4660 = vmatpush3.bf16.msra.mxu1 %v5979_v33 }
 0x178   :  { %4665 = vmatprep.subr.bf16.mxu0 %v7798_v0  ;;  %4685 = vmatprep.subr.bf16.mxu1 %v7798_v0 }
 0x1da   :  { %v550_v3 = vpop.f32.mrf.mxu0  ;;  %v638_v4 = vpop.f32.mrf.mxu1 }
 0x1db   :  { %v639_v41 = vadd.f32 %v6209_v40, %v638_v4  ;;  %v551_v47 = vadd.f32 %v6215_v42, %v550_v3 }
 0x1dc   :  { %v4515_v5 = vpop.f32.mrf.mxu0  ;;  %v4535_v35 = vpop.f32.mrf.mxu1 }
 0x1dd   :  { %v821_v44 = vmul.f32 0.5, %v639_v41 }
 0x1de   :  { %v553_v36 = vpop.f32.mrf.mxu0  ;;  %v641_v37 = vpop.f32.mrf.mxu1 }
 0x1df   :  { %v824_v2 = vrot.slane %v821_v44, 6  ;;  %v820_v37 = vmul.f32 0.5, %v551_v47  ;;  %v853_v44 = vld [vmem:[%s7793_s0 + $0x2] sm:$0x3]  ;;  %v3942_v47 = vld [vmem:[%s7793_s0 + $0x12] sm:$0x3] }
 0x1e0   :  { %v4516_v38 = vpop.f32.mrf.mxu0  ;;  %v4536_v39 = vpop.f32.mrf.mxu1 }
 0x1e1   :  { %v832_v0 = vsel %vm440_vm1, %v820_v37, %v824_v2 }
 0x1fa   :  { %v726_v48 = vpop.f32.mrf.mxu0  ;;  %v814_v51 = vpop.f32.mrf.mxu1 }
 0x1fb   :  { %v815_v1 = vadd.f32 %v6220_v45, %v814_v51  ;;  %v727_v4 = vadd.f32 %v6225_v46, %v726_v48 }
 0x1fc   :  { %v4555_v5 = vpop.f32.mrf.mxu0  ;;  %v4575_v35 = vpop.f32.mrf.mxu1 }
 0x1fd   :  { %v822_v36 = vmul.f32 0.5, %v815_v1  ;;  %v830_v40 = vrot.slane %v727_v4, 2 }
 0x1fe   :  { %v729_v38 = vpop.f32.mrf.mxu0  ;;  %v817_v39 = vpop.f32.mrf.mxu1 }
 0x1ff   :  { %v827_v41 = vrot.slane %v822_v36, 4 }
 0x200   :  { %v4556_v33 = vpop.f32.mrf.mxu0  ;;  %v4576_v32 = vpop.f32.mrf.mxu1 }
 0x201   :  { %v833_v3 = vsel %vm442_vm2, %v832_v0, %v827_v41 }
 0x202   :  { %v834_v42 = vsel %vm444_vm3, %v833_v3, %v830_v40 }
 0x203   :  { %5545 = vtanh.f32 %v834_v42 }
 0x20a   :  { %v893_v48 = vpop.f32.mrf.mxu0  ;;  %v935_v51 = vpop.f32.mrf.mxu1 }
 0x20b   :  { %v899_v1 = vadd.f32 %v893_v48, %v853_v44  ;;  %v941_v2 = vadd.f32 %v3942_v47, %v935_v51  ;;  %v3946_v44 = vld [vmem:[%s7793_s0 + $0x32] sm:$0x3]  ;;  %v3944_v47 = vld [vmem:[%s7793_s0 + $0x22] sm:$0x3] }
 0x20c   :  { %v4587_v4 = vpop.f32.mrf.mxu0  ;;  %v4599_v33 = vpop.f32.mrf.mxu1 }
 0x20d   :  { %v1027_v32 = vmul.f32 0.5, %v941_v2  ;;  %v1026_v35 = vmul.f32 0.5, %v899_v1 }
 0x20e   :  { %v896_v5 = vpop.f32.mrf.mxu0  ;;  %v938_v0 = vpop.f32.mrf.mxu1 }
 0x20f   :  { %v1030_v40 = vrot.slane %v1027_v32, 6 }
 0x210   :  { %v5546_v42 = vpop.eup %5545  ;;  %v4588_v36 = vpop.f32.mrf.mxu0 }
 0x211   :  { %v4600_v37 = vpop.f32.mrf.mxu1  ;;  %v1038_v38 = vsel %vm440_vm1, %v1026_v35, %v1030_v40  ;;  %v836_v39 = vmul.f32 0.5, %v5546_v42  ;;  %v840_v3 = vrot.slane %v5546_v42, 6 }
 0x213   :  { %v837_v41 = vadd.f32 0.5, %v836_v39 }
 0x215   :  { %v842_v46 = vmul.f32 %v840_v3, %v837_v41  ;;  %v838_v45 = vmul.f32 0.0, %v837_v41 }
 0x217   :  { %v844_v31 = vrot.slane %v842_v46, 6 }
 0x219   :  { %v6246_v48 = vadd.f32 %v844_v31, %v838_v45 }
 0x21a   :  { %v977_v51 = vpop.f32.mrf.mxu0  ;;  %v1019_v1 = vpop.f32.mrf.mxu1 }
 0x21b   :  { %v1025_v2 = vadd.f32 %v3946_v44, %v1019_v1  ;;  %5547 = vtanh.f32 %v6246_v48  ;;  %v983_v4 = vadd.f32 %v3944_v47, %v977_v51 }
 0x21c   :  { %v4611_v33 = vpop.f32.mrf.mxu0  ;;  %v4623_v32 = vpop.f32.mrf.mxu1 }
 0x21d   :  { %v1028_v5 = vmul.f32 0.5, %v1025_v2  ;;  %v1036_v40 = vrot.slane %v983_v4, 2 }
 0x21e   :  { %v980_v46 = vpop.f32.mrf.mxu0  ;;  %v1022_v0 = vpop.f32.mrf.mxu1 }
 0x21f   :  { %v1033_v35 = vrot.slane %v1028_v5, 4 }
 0x220   :  { %v4612_v42 = vpop.f32.mrf.mxu0  ;;  %v4624_v36 = vpop.f32.mrf.mxu1 }
 0x221   :  { %v1039_v37 = vsel %vm442_vm2, %v1038_v38, %v1033_v35  ;;  %v6302_v42 = vld [vmem:[%s7791_s1 + $0x18] sm:$0xff]  }
 0x222   :  { %v1040_v31 = vsel %vm444_vm3, %v1039_v37, %v1036_v40  ;;  %v6308_v36 = vld [vmem:[%s7791_s1 + $0x38] sm:$0xff]   ;;  %v6320_v37 = vld [vmem:[%s7791_s1 + $0x10] sm:$0xff]  }
 0x223   :  { %5549 = vtanh.f32 %v1040_v31  ;;  %v6326_v31 = vld [vmem:[%s7791_s1 + $0x30] sm:$0xff]  }
 0x228   :  { %v5548_v45 = vpop.eup %5547 }
 0x229   :  { %v849_v39 = vrot.slane %v5548_v45, 6  ;;  %v6334_v45 = vld [vmem:[%s7791_s1 + $0x8] sm:$0xff]  }
 0x22b   :  { %v6251_v3 = vmul.f32 %v849_v39, %v837_v41 }
 0x22d   :  { %1059 = vrot.lane.b32.xlu0 %v6251_v3, %s5712_s21 }
 0x230   :  { %v5550_v44 = vpop.eup %5549 }
 0x231   :  { %v1042_v47 = vmul.f32 0.5, %v5550_v44  ;;  %v1046_v1 = vrot.slane %v5550_v44, 6 }
 0x233   :  { %v1043_v51 = vadd.f32 0.5, %v1042_v47 }
 0x235   :  { %v1048_v2 = vmul.f32 %v1046_v1, %v1043_v51  ;;  %v1044_v33 = vmul.f32 %v1043_v51, %v6001_v43  ;;  %v7831_v43 = vmov 0.0  }
 0x237   :  { %v1050_v4 = vrot.slane %v1048_v2, 6 }
 0x239   :  { %v6256_v38 = vadd.f32 %v1050_v4, %v1044_v33 }
 0x23b   :  { %5551 = vtanh.f32 %v6256_v38 }
 0x248   :  { %v5552_v32 = vpop.eup %5551 }
 0x249   :  { %v1055_v41 = vrot.slane %v5552_v32, 6 }
 0x24b   :  { %v6259_v5 = vmul.f32 %v1055_v41, %v1043_v51 }
 0x24d   :  { %v1259_v39 = vpack.c.bf16 %v6259_v5, %v6259_v5 }
 0x24f   :  { %v1262_v44 = vrot.slane %v1259_v39, 2  ;;  %v3949_v39 = vld [vmem:[%s7793_s0 + $0x14] sm:$0x3] }
 0x29f   :  { %v1060_v46 = vpop.permute.xlu0 %1059 }
 0x2a0   :  { %v1062_v0 = vsel %vm182_vm4, %v6259_v5, %v1060_v46 }
 0x2a1   :  { %v1063_v35 = vpack.c.bf16 %v1062_v0, %v1062_v0 }
 0x2a3   :  { %v1065_v40 = vrot.slane %v1063_v35, 2 }
 0x2a5   :  { %4642 = vmatmul.mubr.bf16.vlgmr.msra.gmra.mxu0 %v1065_v40  ;;  %4662 = vmatmul.mubr.bf16.vlgmr.msra.gmra.mxu1 %v1065_v40 }
 0x2a6   :  { %4666 = vmatpush3.bf16.msra.mxu0 %v6011_v49  ;;  %4686 = vmatpush3.bf16.msra.mxu1 %v6016_v50 }
 0x2a7   :  { %4667 = vmatprep.subr.bf16.mxu0 %v7831_v43  ;;  %4687 = vmatprep.subr.bf16.mxu1 %v7831_v43 }
 0x2a8   :  { %4681 = vmatprep.mubr.msk.bf16.mxu0 %vm5710_vm0, %v7831_v43  ;;  %4701 = vmatprep.mubr.msk.bf16.mxu1 %vm5710_vm0, %v7831_v43 }
 0x2aa   :  { %4668 = vmatpush3.bf16.msra.mxu0 %v6023_v52  ;;  %4688 = vmatpush3.bf16.msra.mxu1 %v6028_v53 }
 0x2ab   :  { %4669 = vmatprep.subr.bf16.mxu0 %v7831_v43  ;;  %4689 = vmatprep.subr.bf16.mxu1 %v7831_v43 }
 0x2ae   :  { %4670 = vmatpush3.bf16.msra.mxu0 %v6041_v54  ;;  %4690 = vmatpush3.bf16.msra.mxu1 %v6046_v55 }
 0x2af   :  { %4671 = vmatprep.subr.bf16.mxu0 %v7831_v43  ;;  %4691 = vmatprep.subr.bf16.mxu1 %v7831_v43 }
 0x2b2   :  { %4672 = vmatpush3.bf16.msra.mxu0 %v6055_v56  ;;  %4692 = vmatpush3.bf16.msra.mxu1 %v6060_v57 }
 0x2b3   :  { %4673 = vmatprep.subr.bf16.mxu0 %v7831_v43  ;;  %4693 = vmatprep.subr.bf16.mxu1 %v7831_v43 }
 0x2b6   :  { %4674 = vmatpush3.bf16.msra.mxu0 %v6069_v58  ;;  %4694 = vmatpush3.bf16.msra.mxu1 %v6074_v59 }
 0x2b7   :  { %4675 = vmatprep.subr.bf16.mxu0 %v7831_v43  ;;  %4695 = vmatprep.subr.bf16.mxu1 %v7831_v43 }
 0x2ba   :  { %4676 = vmatpush3.bf16.msra.mxu0 %v6083_v60  ;;  %4696 = vmatpush3.bf16.msra.mxu1 %v6088_v61 }
 0x2bb   :  { %4677 = vmatprep.subr.bf16.mxu0 %v7831_v43  ;;  %4697 = vmatprep.subr.bf16.mxu1 %v7831_v43 }
 0x2be   :  { %4678 = vmatpush3.bf16.msra.mxu0 %v6097_v62  ;;  %4698 = vmatpush3.bf16.msra.mxu1 %v6102_v63 }
 0x2bf   :  { %4679 = vmatprep.subr.bf16.mxu0 %v7831_v43  ;;  %4699 = vmatprep.subr.bf16.mxu1 %v7831_v43 }
 0x2c2   :  { %4680 = vmatpush3.bf16.msra.mxu0 %v6111_v11  ;;  %4700 = vmatpush3.bf16.msra.mxu1 %v6116_v34 }
 0x2c3   :  { %4705 = vmatprep.subr.bf16.mxu0 %v7831_v43  ;;  %4717 = vmatprep.subr.bf16.mxu1 %v7831_v43 }
 0x2c5   :  { %4682 = vmatmul.mubr.bf16.vlgmr.msra.gmra.mxu0 %v1065_v40  ;;  %4702 = vmatmul.mubr.bf16.vlgmr.msra.gmra.mxu1 %v1065_v40  ;;  %v1260_v40 = vld [vmem:[%s7793_s0 + $0x4] sm:$0x3] }
 0x2c6   :  { %4706 = vmatpush3.bf16.msra.mxu0 %v6302_v42  ;;  %4718 = vmatpush3.bf16.msra.mxu1 %v6308_v36 }
 0x2c7   :  { %4707 = vmatprep.subr.bf16.mxu0 %v7831_v43  ;;  %4719 = vmatprep.subr.bf16.mxu1 %v7831_v43 }
 0x2c8   :  { %4713 = vmatprep.mubr.msk.bf16.mxu0 %vm5710_vm0, %v7831_v43  ;;  %4725 = vmatprep.mubr.msk.bf16.mxu1 %vm5710_vm0, %v7831_v43 }
 0x2ca   :  { %4708 = vmatpush3.bf16.msra.mxu0 %v6320_v37  ;;  %4720 = vmatpush3.bf16.msra.mxu1 %v6326_v31 }
 0x2cb   :  { %4709 = vmatprep.subr.bf16.mxu0 %v7831_v43  ;;  %4721 = vmatprep.subr.bf16.mxu1 %v7831_v43 }
 0x2ce   :  { %4710 = vmatpush3.bf16.msra.mxu0 %v6334_v45  ;;  %4722 = vmatpush3.bf16.msra.mxu1 %v5789_v6  ;;  %v7832_v6 = vld [vmem:[#allocation2_spill] sm:$0xff] }
 0x2cf   :  { %4711 = vmatprep.subr.bf16.mxu0 %v7831_v43  ;;  %4723 = vmatprep.subr.bf16.mxu1 %v7831_v43 }
 0x2d2   :  { %4712 = vmatpush3.bf16.msra.mxu0 %v5796_v7  ;;  %4724 = vmatpush3.bf16.msra.mxu1 %v5803_v8  ;;  %v7833_v7 = vld [vmem:[#allocation3_spill] sm:$0xff]  ;;  %v7834_v8 = vld [vmem:[#allocation4_spill] sm:$0xff] }
 0x2d3   :  { %4729 = vmatprep.subr.bf16.mxu0 %v7831_v43  ;;  %4741 = vmatprep.subr.bf16.mxu1 %v7831_v43 }
 0x2d5   :  { %4714 = vmatmul.mubr.msk.bf16.vlgmr.msra.gmra.mxu0 %vm182_vm4, %v1262_v44  ;;  %4726 = vmatmul.mubr.msk.bf16.vlgmr.msra.gmra.mxu1 %vm182_vm4, %v1262_v44 }
 0x2d6   :  { %4730 = vmatpush3.bf16.msra.mxu0 %v5810_v9  ;;  %4742 = vmatpush3.bf16.msra.mxu1 %v5817_v10 }
 0x2d7   :  { %4731 = vmatprep.subr.bf16.mxu0 %v7831_v43  ;;  %4743 = vmatprep.subr.bf16.mxu1 %v7831_v43 }
 0x2d8   :  { %4737 = vmatprep.mubr.msk.bf16.mxu0 %vm5710_vm0, %v7831_v43  ;;  %4749 = vmatprep.mubr.msk.bf16.mxu1 %vm5710_vm0, %v7831_v43 }
 0x2da   :  { %4732 = vmatpush3.bf16.msra.mxu0 %v5824_v12  ;;  %4744 = vmatpush3.bf16.msra.mxu1 %v5831_v13 }
 0x2db   :  { %4733 = vmatprep.subr.bf16.mxu0 %v7831_v43  ;;  %4745 = vmatprep.subr.bf16.mxu1 %v7831_v43 }
 0x2de   :  { %4734 = vmatpush3.bf16.msra.mxu0 %v5842_v14  ;;  %4746 = vmatpush3.bf16.msra.mxu1 %v5849_v15 }
 0x2df   :  { %4735 = vmatprep.subr.bf16.mxu0 %v7831_v43  ;;  %4747 = vmatprep.subr.bf16.mxu1 %v7831_v43 }
 0x2e2   :  { %4736 = vmatpush3.bf16.msra.mxu0 %v5856_v16  ;;  %4748 = vmatpush3.bf16.msra.mxu1 %v5863_v17 }
 0x2e3   :  { %4753 = vmatprep.subr.bf16.mxu0 %v7831_v43  ;;  %4773 = vmatprep.subr.bf16.mxu1 %v7831_v43 }
 0x2e5   :  { %4738 = vmatmul.mubr.msk.bf16.vlgmr.msra.gmra.mxu0 %vm182_vm4, %v1262_v44  ;;  %4750 = vmatmul.mubr.msk.bf16.vlgmr.msra.gmra.mxu1 %vm182_vm4, %v1262_v44 }
 0x2e6   :  { %4754 = vmatpush3.bf16.msra.mxu0 %v5877_v18  ;;  %4774 = vmatpush3.bf16.msra.mxu1 %v5882_v19  ;;  %v7835_v18 = vld [vmem:[#allocation5_spill] sm:$0xff] }
 0x2e7   :  { %4755 = vmatprep.subr.bf16.mxu0 %v7831_v43  ;;  %4775 = vmatprep.subr.bf16.mxu1 %v7831_v43 }
 0x2e8   :  { %4769 = vmatprep.mubr.msk.bf16.mxu0 %vm5710_vm0, %v7831_v43  ;;  %4789 = vmatprep.mubr.msk.bf16.mxu1 %vm5710_vm0, %v7831_v43 }
 0x2ea   :  { %4756 = vmatpush3.bf16.msra.mxu0 %v5888_v20  ;;  %4776 = vmatpush3.bf16.msra.mxu1 %v5895_v21  ;;  %v7836_v21 = vld [vmem:[#allocation6_spill] sm:$0xff] }
 0x2eb   :  { %4757 = vmatprep.subr.bf16.mxu0 %v7831_v43  ;;  %4777 = vmatprep.subr.bf16.mxu1 %v7831_v43 }
 0x2ee   :  { %4758 = vmatpush3.bf16.msra.mxu0 %v5902_v22  ;;  %4778 = vmatpush3.bf16.msra.mxu1 %v5909_v23 }
 0x2ef   :  { %4759 = vmatprep.subr.bf16.mxu0 %v7831_v43  ;;  %4779 = vmatprep.subr.bf16.mxu1 %v7831_v43 }
 0x2f2   :  { %4760 = vmatpush3.bf16.msra.mxu0 %v5916_v24  ;;  %4780 = vmatpush3.bf16.msra.mxu1 %v5923_v25  ;;  %v7837_v25 = vld [vmem:[#allocation7_spill] sm:$0xff] }
 0x2f3   :  { %4761 = vmatprep.subr.bf16.mxu0 %v7831_v43  ;;  %4781 = vmatprep.subr.bf16.mxu1 %v7831_v43 }
 0x2f6   :  { %4762 = vmatpush3.bf16.msra.mxu0 %v5930_v26  ;;  %4782 = vmatpush3.bf16.msra.mxu1 %v5937_v27 }
 0x2f7   :  { %4763 = vmatprep.subr.bf16.mxu0 %v7831_v43  ;;  %4783 = vmatprep.subr.bf16.mxu1 %v7831_v43 }
 0x2fa   :  { %4764 = vmatpush3.bf16.msra.mxu0 %v5943_v28  ;;  %4784 = vmatpush3.bf16.msra.mxu1 %v5948_v29  ;;  %v7838_v28 = vld [vmem:[#allocation8_spill] sm:$0xff] }
 0x2fb   :  { %4765 = vmatprep.subr.bf16.mxu0 %v7831_v43  ;;  %4785 = vmatprep.subr.bf16.mxu1 %v7831_v43 }
 0x2fe   :  { %4766 = vmatpush3.bf16.msra.mxu0 %v5957_v30  ;;  %4786 = vmatpush3.bf16.msra.mxu1 %v7832_v6 }
 0x2ff   :  { %4767 = vmatprep.subr.bf16.mxu0 %v7831_v43  ;;  %4787 = vmatprep.subr.bf16.mxu1 %v7831_v43 }
 0x302   :  { %4768 = vmatpush3.bf16.msra.mxu0 %v7833_v7  ;;  %4788 = vmatpush3.bf16.msra.mxu1 %v7834_v8 }
 0x303   :  { %4793 = vmatprep.subr.bf16.mxu0 %v7831_v43  ;;  %4813 = vmatprep.subr.bf16.mxu1 %v7831_v43 }
 0x365   :  { %v1101_v9 = vpop.f32.mrf.mxu0  ;;  %v1141_v10 = vpop.f32.mrf.mxu1 }
 0x366   :  { %v1142_v19 = vadd.f32 %v7835_v18, %v1141_v10  ;;  %v1102_v22 = vadd.f32 %v7836_v21, %v1101_v9 }
 0x367   :  { %v4643_v12 = vpop.f32.mrf.mxu0  ;;  %v4663_v13 = vpop.f32.mrf.mxu1 }
 0x368   :  { %v1228_v20 = vmul.f32 0.5, %v1142_v19  ;;  %v1227_v1 = vmul.f32 0.5, %v1102_v22 }
 0x369   :  { %v1104_v14 = vpop.f32.mrf.mxu0  ;;  %v1144_v15 = vpop.f32.mrf.mxu1 }
 0x36a   :  { %v1231_v27 = vrot.slane %v1228_v20, 6 }
 0x36b   :  { %v4644_v16 = vpop.f32.mrf.mxu0  ;;  %v4664_v17 = vpop.f32.mrf.mxu1 }
 0x36c   :  { %v1239_v32 = vsel %vm440_vm1, %v1227_v1, %v1231_v27 }
 0x385   :  { %v1181_v23 = vpop.f32.mrf.mxu0  ;;  %v1221_v24 = vpop.f32.mrf.mxu1 }
 0x386   :  { %v1222_v26 = vadd.f32 %v7837_v25, %v1221_v24  ;;  %v1182_v29 = vadd.f32 %v7838_v28, %v1181_v23 }
 0x387   :  { %v4683_v30 = vpop.f32.mrf.mxu0  ;;  %v4703_v47 = vpop.f32.mrf.mxu1 }
 0x388   :  { %v1229_v51 = vmul.f32 0.5, %v1222_v26  ;;  %v1237_v41 = vrot.slane %v1182_v29, 2  ;;  %v3953_v47 = vld [vmem:[%s7793_s0 + $0x34] sm:$0x3] }
 0x389   :  { %v1184_v2 = vpop.f32.mrf.mxu0  ;;  %v1224_v4 = vpop.f32.mrf.mxu1 }
 0x38a   :  { %v1234_v33 = vrot.slane %v1229_v51, 4  ;;  %v3951_v51 = vld [vmem:[%s7793_s0 + $0x24] sm:$0x3] }
 0x38b   :  { %v4684_v5 = vpop.f32.mrf.mxu0  ;;  %v4704_v46 = vpop.f32.mrf.mxu1 }
 0x38c   :  { %v1240_v0 = vsel %vm442_vm2, %v1239_v32, %v1234_v33 }
 0x38d   :  { %v1241_v35 = vsel %vm444_vm3, %v1240_v0, %v1237_v41 }
 0x38e   :  { %5553 = vtanh.f32 %v1241_v35 }
 0x395   :  { %v1300_v44 = vpop.f32.mrf.mxu0  ;;  %v1342_v6 = vpop.f32.mrf.mxu1 }
 0x396   :  { %v1306_v7 = vadd.f32 %v1300_v44, %v1260_v40  ;;  %v1348_v8 = vadd.f32 %v3949_v39, %v1342_v6 }
 0x397   :  { %v4715_v9 = vpop.f32.mrf.mxu0  ;;  %v4727_v10 = vpop.f32.mrf.mxu1 }
 0x398   :  { %v1434_v12 = vmul.f32 0.5, %v1348_v8  ;;  %v1433_v15 = vmul.f32 0.5, %v1306_v7 }
 0x399   :  { %v1303_v13 = vpop.f32.mrf.mxu0  ;;  %v1345_v14 = vpop.f32.mrf.mxu1 }
 0x39a   :  { %v1437_v16 = vrot.slane %v1434_v12, 6  ;;  %v3701_v12 = vrot.slane %v6251_v3, 4 }
 0x39b   :  { %v5554_v17 = vpop.eup %5553  ;;  %v4716_v19 = vpop.f32.mrf.mxu0 }
 0x39c   :  { %v4728_v20 = vpop.f32.mrf.mxu1  ;;  %v1445_v22 = vsel %vm440_vm1, %v1433_v15, %v1437_v16  ;;  %v1243_v23 = vmul.f32 0.5, %v5554_v17  ;;  %v1247_v26 = vrot.slane %v5554_v17, 6 }
 0x39e   :  { %v1244_v24 = vadd.f32 0.5, %v1243_v23 }
 0x3a0   :  { %v1249_v27 = vmul.f32 %v1247_v26, %v1244_v24  ;;  %v1245_v29 = vmul.f32 %v1244_v24, %v6246_v48 }
 0x3a2   :  { %v1251_v30 = vrot.slane %v1249_v27, 6 }
 0x3a4   :  { %v6427_v1 = vadd.f32 %v1251_v30, %v1245_v29 }
 0x3a5   :  { %v1384_v2 = vpop.f32.mrf.mxu0  ;;  %v1426_v4 = vpop.f32.mrf.mxu1 }
 0x3a6   :  { %v1432_v33 = vadd.f32 %v3953_v47, %v1426_v4  ;;  %5555 = vtanh.f32 %v6427_v1  ;;  %v1390_v32 = vadd.f32 %v3951_v51, %v1384_v2  ;;  %v6617_v2 = vld [vmem:[%s7792_s2 + $0x28] sm:$0xff]  }
 0x3a7   :  { %v4739_v41 = vpop.f32.mrf.mxu0  ;;  %v4751_v5 = vpop.f32.mrf.mxu1  ;;  %v6623_v4 = vld [vmem:[%s7792_s2 + $0x68] sm:$0xff]  }
 0x3a8   :  { %v1435_v48 = vmul.f32 0.5, %v1432_v33  ;;  %v1443_v40 = vrot.slane %v1390_v32, 2  ;;  %v6631_v33 = vld [vmem:[%s7792_s2 + $0x20] sm:$0xff]   ;;  %v6645_v41 = vld [vmem:[%s7792_s2 + $0x18] sm:$0xff]  }
 0x3a9   :  { %v1387_v46 = vpop.f32.mrf.mxu0  ;;  %v1429_v0 = vpop.f32.mrf.mxu1  ;;  %v6637_v32 = vld [vmem:[%s7792_s2 + $0x60] sm:$0xff]   ;;  %v6651_v5 = vld [vmem:[%s7792_s2 + $0x58] sm:$0xff]  }
 0x3aa   :  { %v1440_v35 = vrot.slane %v1435_v48, 4  ;;  %v6659_v48 = vld [vmem:[%s7792_s2 + $0x10] sm:$0xff]   ;;  %v6673_v0 = vld [vmem:[%s7792_s2 + $0x8] sm:$0xff]  }
 0x3ab   :  { %v4740_v39 = vpop.f32.mrf.mxu0  ;;  %v4752_v44 = vpop.f32.mrf.mxu1  ;;  %v6665_v46 = vld [vmem:[%s7792_s2 + $0x50] sm:$0xff]   ;;  %7840 = vst [vmem:[#allocation3_spill] sm:$0xff] %v6673_v0 }
 0x3ac   :  { %v1446_v6 = vsel %vm442_vm2, %v1445_v22, %v1440_v35  ;;  %7839 = vst [vmem:[#allocation2_spill] sm:$0xff] %v6665_v46  ;;  %v6679_v35 = vld [vmem:[%s7792_s2 + $0x48] sm:$0xff]   ;;  %v6693_v39 = vld [vmem:[%s7792_s2 + $0x40] sm:$0xff]  }
 0x3ad   :  { %v1447_v7 = vsel %vm444_vm3, %v1446_v6, %v1443_v40  ;;  %7841 = vst [vmem:[#allocation4_spill] sm:$0xff] %v6679_v35  ;;  %v6687_v40 = vld [vmem:[%s7792_s2] sm:$0xff]   ;;  %7843 = vst [vmem:[#allocation6_spill] sm:$0xff] %v6693_v39 }
 0x3ae   :  { %5557 = vtanh.f32 %v1447_v7  ;;  %7842 = vst [vmem:[#allocation5_spill] sm:$0xff] %v6687_v40 }
 0x3b3   :  { %v5556_v8 = vpop.eup %5555 }
 0x3b4   :  { %v1256_v9 = vrot.slane %v5556_v8, 6 }
 0x3b6   :  { %v1258_v10 = vmul.f32 %v1256_v9, %v1244_v24 }
 0x3b8   :  { %1466 = vrot.lane.b32.xlu0 %v1258_v10, %s5712_s21  ;;  %v3703_v13 = vrot.slane %v1258_v10, 2 }
 0x3ba   :  { %v6435_v14 = vsel %vm440_vm1, %v3701_v12, %v3703_v13 }
 0x3bb   :  { %v5558_v15 = vpop.eup %5557 }
 0x3bc   :  { %v1449_v16 = vmul.f32 0.5, %v5558_v15  ;;  %v1453_v19 = vrot.slane %v5558_v15, 6 }
 0x3be   :  { %v1450_v17 = vadd.f32 0.5, %v1449_v16 }
 0x3c0   :  { %v1455_v20 = vmul.f32 %v1453_v19, %v1450_v17  ;;  %v1451_v23 = vmul.f32 %v1450_v17, %v6256_v38  ;;  %v6609_v38 = vld [vmem:[%s7792_s2 + $0x70] sm:$0xff]  }
 0x3c2   :  { %v1457_v22 = vrot.slane %v1455_v20, 6 }
 0x3c4   :  { %v6438_v26 = vadd.f32 %v1457_v22, %v1451_v23 }
 0x3c6   :  { %5559 = vtanh.f32 %v6438_v26 }
 0x3d3   :  { %v5560_v3 = vpop.eup %5559 }
 0x3d4   :  { %v1462_v24 = vrot.slane %v5560_v3, 6 }
 0x3d6   :  { %v6441_v27 = vmul.f32 %v1462_v24, %v1450_v17 }
 0x42a   :  { %v1467_v29 = vpop.permute.xlu0 %1466 }
 0x42b   :  { %v1469_v30 = vsel %vm182_vm4, %v6441_v27, %v1467_v29 }
 0x42c   :  { %v1470_v47 = vpack.c.bf16 %v1469_v30, %v1469_v30 }
 0x42e   :  { %v1472_v51 = vrot.slane %v1470_v47, 2 }
 0x430   :  { %4770 = vmatmul.mubr.bf16.vlgmr.msra.gmra.mxu0 %v1472_v51  ;;  %4790 = vmatmul.mubr.bf16.vlgmr.msra.gmra.mxu1 %v1472_v51 }
 0x431   :  { %4794 = vmatpush3.bf16.msra.mxu0 %v6011_v49  ;;  %4814 = vmatpush3.bf16.msra.mxu1 %v6016_v50  ;;  %v6497_v49 = vld [vmem:[%s7791_s1 + $0x28] sm:$0xff]   ;;  %v1666_v50 = vpack.c.bf16 %v6441_v27, %v6441_v27 }
 0x432   :  { %4795 = vmatprep.subr.bf16.mxu0 %v7831_v43  ;;  %4815 = vmatprep.subr.bf16.mxu1 %v7831_v43 }
 0x433   :  { %4809 = vmatprep.mubr.msk.bf16.mxu0 %vm5710_vm0, %v7831_v43  ;;  %4829 = vmatprep.mubr.msk.bf16.mxu1 %vm5710_vm0, %v7831_v43 }
 0x435   :  { %4796 = vmatpush3.bf16.msra.mxu0 %v6023_v52  ;;  %4816 = vmatpush3.bf16.msra.mxu1 %v6028_v53  ;;  %v6507_v52 = vld [vmem:[%s7791_s1] sm:$0xff]  }
 0x436   :  { %4797 = vmatprep.subr.bf16.mxu0 %v7831_v43  ;;  %4817 = vmatprep.subr.bf16.mxu1 %v7831_v43  ;;  %v6513_v53 = vld [vmem:[%s7791_s1 + $0x20] sm:$0xff]  }
 0x439   :  { %4798 = vmatpush3.bf16.msra.mxu0 %v6041_v54  ;;  %4818 = vmatpush3.bf16.msra.mxu1 %v6046_v55  ;;  %v1669_v54 = vrot.slane %v1666_v50, 2  ;;  %v6523_v55 = vld [vmem:[%s7791_s1 + $0x58] sm:$0xff]  }
 0x43a   :  { %4799 = vmatprep.subr.bf16.mxu0 %v7831_v43  ;;  %4819 = vmatprep.subr.bf16.mxu1 %v7831_v43 }
 0x43d   :  { %4800 = vmatpush3.bf16.msra.mxu0 %v6055_v56  ;;  %4820 = vmatpush3.bf16.msra.mxu1 %v6060_v57  ;;  %v6529_v56 = vld [vmem:[%s7791_s1 + $0x78] sm:$0xff]   ;;  %v6541_v57 = vld [vmem:[%s7791_s1 + $0x50] sm:$0xff]  }
 0x43e   :  { %4801 = vmatprep.subr.bf16.mxu0 %v7831_v43  ;;  %4821 = vmatprep.subr.bf16.mxu1 %v7831_v43 }
 0x441   :  { %4802 = vmatpush3.bf16.msra.mxu0 %v6069_v58  ;;  %4822 = vmatpush3.bf16.msra.mxu1 %v6074_v59  ;;  %v6547_v58 = vld [vmem:[%s7791_s1 + $0x70] sm:$0xff]   ;;  %v6555_v59 = vld [vmem:[%s7791_s1 + $0x48] sm:$0xff]  }
 0x442   :  { %4803 = vmatprep.subr.bf16.mxu0 %v7831_v43  ;;  %4823 = vmatprep.subr.bf16.mxu1 %v7831_v43 }
 0x445   :  { %4804 = vmatpush3.bf16.msra.mxu0 %v6083_v60  ;;  %4824 = vmatpush3.bf16.msra.mxu1 %v6088_v61  ;;  %v6561_v60 = vld [vmem:[%s7791_s1 + $0x68] sm:$0xff]   ;;  %v6569_v61 = vld [vmem:[%s7791_s1 + $0x40] sm:$0xff]  }
 0x446   :  { %4805 = vmatprep.subr.bf16.mxu0 %v7831_v43  ;;  %4825 = vmatprep.subr.bf16.mxu1 %v7831_v43 }
 0x449   :  { %4806 = vmatpush3.bf16.msra.mxu0 %v6097_v62  ;;  %4826 = vmatpush3.bf16.msra.mxu1 %v6102_v63  ;;  %v6575_v62 = vld [vmem:[%s7791_s1 + $0x60] sm:$0xff]   ;;  %v6585_v63 = vld [vmem:[%s7792_s2 + $0x38] sm:$0xff]  }
 0x44a   :  { %4807 = vmatprep.subr.bf16.mxu0 %v7831_v43  ;;  %4827 = vmatprep.subr.bf16.mxu1 %v7831_v43 }
 0x44d   :  { %4808 = vmatpush3.bf16.msra.mxu0 %v6111_v11  ;;  %4828 = vmatpush3.bf16.msra.mxu1 %v6116_v34  ;;  %v6591_v11 = vld [vmem:[%s7792_s2 + $0x78] sm:$0xff]   ;;  %v6603_v34 = vld [vmem:[%s7792_s2 + $0x30] sm:$0xff]  }
 0x44e   :  { %4833 = vmatprep.subr.bf16.mxu0 %v7831_v43  ;;  %4845 = vmatprep.subr.bf16.mxu1 %v7831_v43 }
 0x450   :  { %4810 = vmatmul.mubr.bf16.vlgmr.msra.gmra.mxu0 %v1472_v51  ;;  %4830 = vmatmul.mubr.bf16.vlgmr.msra.gmra.mxu1 %v1472_v51 }
 0x451   :  { %4834 = vmatpush3.bf16.msra.mxu0 %v6302_v42  ;;  %4846 = vmatpush3.bf16.msra.mxu1 %v6308_v36 }
 0x452   :  { %4835 = vmatprep.subr.bf16.mxu0 %v7831_v43  ;;  %4847 = vmatprep.subr.bf16.mxu1 %v7831_v43 }
 0x453   :  { %4841 = vmatprep.mubr.msk.bf16.mxu0 %vm5710_vm0, %v7831_v43  ;;  %4853 = vmatprep.mubr.msk.bf16.mxu1 %vm5710_vm0, %v7831_v43 }
 0x455   :  { %4836 = vmatpush3.bf16.msra.mxu0 %v6320_v37  ;;  %4848 = vmatpush3.bf16.msra.mxu1 %v6326_v31 }
 0x456   :  { %4837 = vmatprep.subr.bf16.mxu0 %v7831_v43  ;;  %4849 = vmatprep.subr.bf16.mxu1 %v7831_v43 }
 0x459   :  { %4838 = vmatpush3.bf16.msra.mxu0 %v6334_v45  ;;  %4850 = vmatpush3.bf16.msra.mxu1 %v6497_v49 }
 0x45a   :  { %4839 = vmatprep.subr.bf16.mxu0 %v7831_v43  ;;  %4851 = vmatprep.subr.bf16.mxu1 %v7831_v43 }
 0x45d   :  { %4840 = vmatpush3.bf16.msra.mxu0 %v6507_v52  ;;  %4852 = vmatpush3.bf16.msra.mxu1 %v6513_v53 }
 0x45e   :  { %4857 = vmatprep.subr.bf16.mxu0 %v7831_v43  ;;  %4869 = vmatprep.subr.bf16.mxu1 %v7831_v43 }
 0x460   :  { %4842 = vmatmul.mubr.msk.bf16.vlgmr.msra.gmra.mxu0 %vm182_vm4, %v1669_v54  ;;  %4854 = vmatmul.mubr.msk.bf16.vlgmr.msra.gmra.mxu1 %vm182_vm4, %v1669_v54 }
 0x461   :  { %4858 = vmatpush3.bf16.msra.mxu0 %v6523_v55  ;;  %4870 = vmatpush3.bf16.msra.mxu1 %v6529_v56 }
 0x462   :  { %4859 = vmatprep.subr.bf16.mxu0 %v7831_v43  ;;  %4871 = vmatprep.subr.bf16.mxu1 %v7831_v43 }
 0x463   :  { %4865 = vmatprep.mubr.msk.bf16.mxu0 %vm5710_vm0, %v7831_v43  ;;  %4877 = vmatprep.mubr.msk.bf16.mxu1 %vm5710_vm0, %v7831_v43 }
 0x465   :  { %4860 = vmatpush3.bf16.msra.mxu0 %v6541_v57  ;;  %4872 = vmatpush3.bf16.msra.mxu1 %v6547_v58 }
 0x466   :  { %4861 = vmatprep.subr.bf16.mxu0 %v7831_v43  ;;  %4873 = vmatprep.subr.bf16.mxu1 %v7831_v43 }
 0x469   :  { %4862 = vmatpush3.bf16.msra.mxu0 %v6555_v59  ;;  %4874 = vmatpush3.bf16.msra.mxu1 %v6561_v60 }
 0x46a   :  { %4863 = vmatprep.subr.bf16.mxu0 %v7831_v43  ;;  %4875 = vmatprep.subr.bf16.mxu1 %v7831_v43 }
 0x46d   :  { %4864 = vmatpush3.bf16.msra.mxu0 %v6569_v61  ;;  %4876 = vmatpush3.bf16.msra.mxu1 %v6575_v62 }
 0x46e   :  { %4881 = vmatprep.subr.bf16.mxu0 %v7831_v43  ;;  %4901 = vmatprep.subr.bf16.mxu1 %v7831_v43 }
 0x470   :  { %4866 = vmatmul.mubr.msk.bf16.vlgmr.msra.gmra.mxu0 %vm182_vm4, %v1669_v54  ;;  %4878 = vmatmul.mubr.msk.bf16.vlgmr.msra.gmra.mxu1 %vm182_vm4, %v1669_v54 }
 0x471   :  { %4882 = vmatpush3.bf16.msra.mxu0 %v6585_v63  ;;  %4902 = vmatpush3.bf16.msra.mxu1 %v6591_v11 }
 0x472   :  { %4883 = vmatprep.subr.bf16.mxu0 %v7831_v43  ;;  %4903 = vmatprep.subr.bf16.mxu1 %v7831_v43 }
 0x473   :  { %4897 = vmatprep.mubr.msk.bf16.mxu0 %vm5710_vm0, %v7831_v43  ;;  %4917 = vmatprep.mubr.msk.bf16.mxu1 %vm5710_vm0, %v7831_v43 }
 0x475   :  { %4884 = vmatpush3.bf16.msra.mxu0 %v6603_v34  ;;  %4904 = vmatpush3.bf16.msra.mxu1 %v6609_v38 }
 0x476   :  { %4885 = vmatprep.subr.bf16.mxu0 %v7831_v43  ;;  %4905 = vmatprep.subr.bf16.mxu1 %v7831_v43 }
 0x479   :  { %4886 = vmatpush3.bf16.msra.mxu0 %v6617_v2  ;;  %4906 = vmatpush3.bf16.msra.mxu1 %v6623_v4 }
 0x47a   :  { %4887 = vmatprep.subr.bf16.mxu0 %v7831_v43  ;;  %4907 = vmatprep.subr.bf16.mxu1 %v7831_v43 }
 0x47d   :  { %4888 = vmatpush3.bf16.msra.mxu0 %v6631_v33  ;;  %4908 = vmatpush3.bf16.msra.mxu1 %v6637_v32 }
 0x47e   :  { %4889 = vmatprep.subr.bf16.mxu0 %v7831_v43  ;;  %4909 = vmatprep.subr.bf16.mxu1 %v7831_v43 }
 0x481   :  { %4890 = vmatpush3.bf16.msra.mxu0 %v6645_v41  ;;  %4910 = vmatpush3.bf16.msra.mxu1 %v6651_v5 }
 0x482   :  { %4891 = vmatprep.subr.bf16.mxu0 %v7831_v43  ;;  %4911 = vmatprep.subr.bf16.mxu1 %v7831_v43 }
 0x485   :  { %4892 = vmatpush3.bf16.msra.mxu0 %v6659_v48  ;;  %4912 = vmatpush3.bf16.msra.mxu1 %v6665_v46 }
 0x486   :  { %4893 = vmatprep.subr.bf16.mxu0 %v7831_v43  ;;  %4913 = vmatprep.subr.bf16.mxu1 %v7831_v43 }
 0x489   :  { %4894 = vmatpush3.bf16.msra.mxu0 %v6673_v0  ;;  %4914 = vmatpush3.bf16.msra.mxu1 %v6679_v35 }
 0x48a   :  { %4895 = vmatprep.subr.bf16.mxu0 %v7831_v43  ;;  %4915 = vmatprep.subr.bf16.mxu1 %v7831_v43 }
 0x48d   :  { %4896 = vmatpush3.bf16.msra.mxu0 %v6687_v40  ;;  %4916 = vmatpush3.bf16.msra.mxu1 %v6693_v39 }
 0x48e   :  { %4921 = vmatprep.subr.bf16.mxu0 %v7831_v43  ;;  %4941 = vmatprep.subr.bf16.mxu1 %v7831_v43 }
 0x4f0   :  { %v1508_v44 = vpop.f32.mrf.mxu0  ;;  %v1548_v6 = vpop.f32.mrf.mxu1 }
 0x4f1   :  { %v1549_v15 = vadd.f32 %v7835_v18, %v1548_v6  ;;  %v1509_v17 = vadd.f32 %v7836_v21, %v1508_v44 }
 0x4f2   :  { %v4771_v7 = vpop.f32.mrf.mxu0  ;;  %v4791_v8 = vpop.f32.mrf.mxu1 }
 0x4f3   :  { %v1635_v16 = vmul.f32 0.5, %v1549_v15  ;;  %v1634_v30 = vmul.f32 0.5, %v1509_v17 }
 0x4f4   :  { %v1511_v9 = vpop.f32.mrf.mxu0  ;;  %v1551_v10 = vpop.f32.mrf.mxu1 }
 0x4f5   :  { %v1638_v23 = vrot.slane %v1635_v16, 6 }
 0x4f6   :  { %v4772_v12 = vpop.f32.mrf.mxu0  ;;  %v4792_v13 = vpop.f32.mrf.mxu1 }
 0x4f7   :  { %v1646_v54 = vsel %vm440_vm1, %v1634_v30, %v1638_v23 }
 0x510   :  { %v1588_v19 = vpop.f32.mrf.mxu0  ;;  %v1628_v20 = vpop.f32.mrf.mxu1 }
 0x511   :  { %v1629_v22 = vadd.f32 %v7837_v25, %v1628_v20  ;;  %v1589_v3 = vadd.f32 %v7838_v28, %v1588_v19  ;;  %v1667_v25 = vld [vmem:[%s7793_s0 + $0x6] sm:$0x3]  ;;  %v3956_v28 = vld [vmem:[%s7793_s0 + $0x16] sm:$0x3] }
 0x512   :  { %v4811_v24 = vpop.f32.mrf.mxu0  ;;  %v4831_v27 = vpop.f32.mrf.mxu1 }
 0x513   :  { %v1636_v29 = vmul.f32 0.5, %v1629_v22  ;;  %v1644_v18 = vrot.slane %v1589_v3, 2 }
 0x514   :  { %v1591_v47 = vpop.f32.mrf.mxu0  ;;  %v1631_v51 = vpop.f32.mrf.mxu1 }
 0x515   :  { %v1641_v50 = vrot.slane %v1636_v29, 4 }
 0x516   :  { %v4812_v6 = vpop.f32.mrf.mxu0  ;;  %v4832_v7 = vpop.f32.mrf.mxu1 }
 0x517   :  { %v1647_v21 = vsel %vm442_vm2, %v1646_v54, %v1641_v50  ;;  %v3958_v6 = vld [vmem:[%s7793_s0 + $0x26] sm:$0x3] }
 0x518   :  { %v1648_v44 = vsel %vm444_vm3, %v1647_v21, %v1644_v18  ;;  %v3960_v18 = vld [vmem:[%s7793_s0 + $0x36] sm:$0x3] }
 0x519   :  { %5561 = vtanh.f32 %v1648_v44 }
 0x520   :  { %v1707_v8 = vpop.f32.mrf.mxu0  ;;  %v1749_v9 = vpop.f32.mrf.mxu1 }
 0x521   :  { %v1713_v10 = vadd.f32 %v1707_v8, %v1667_v25  ;;  %v1755_v12 = vadd.f32 %v3956_v28, %v1749_v9 }
 0x522   :  { %v4843_v13 = vpop.f32.mrf.mxu0  ;;  %v4855_v15 = vpop.f32.mrf.mxu1 }
 0x523   :  { %v1841_v16 = vmul.f32 0.5, %v1755_v12  ;;  %v1840_v20 = vmul.f32 0.5, %v1713_v10 }
 0x524   :  { %v1710_v17 = vpop.f32.mrf.mxu0  ;;  %v1752_v19 = vpop.f32.mrf.mxu1 }
 0x525   :  { %v1844_v22 = vrot.slane %v1841_v16, 6 }
 0x526   :  { %v5562_v23 = vpop.eup %5561  ;;  %v4844_v3 = vpop.f32.mrf.mxu0 }
 0x527   :  { %v4856_v24 = vpop.f32.mrf.mxu1  ;;  %v1852_v27 = vsel %vm440_vm1, %v1840_v20, %v1844_v22  ;;  %v1650_v29 = vmul.f32 0.5, %v5562_v23  ;;  %v1654_v47 = vrot.slane %v5562_v23, 6 }
 0x529   :  { %v1651_v30 = vadd.f32 0.5, %v1650_v29 }
 0x52b   :  { %v1656_v51 = vmul.f32 %v1654_v47, %v1651_v30  ;;  %v1652_v50 = vmul.f32 %v1651_v30, %v6427_v1 }
 0x52d   :  { %v1658_v54 = vrot.slane %v1656_v51, 6 }
 0x52f   :  { %v6719_v7 = vadd.f32 %v1658_v54, %v1652_v50 }
 0x530   :  { %v1791_v21 = vpop.f32.mrf.mxu0  ;;  %v1833_v44 = vpop.f32.mrf.mxu1 }
 0x531   :  { %v1839_v25 = vadd.f32 %v3960_v18, %v1833_v44  ;;  %5563 = vtanh.f32 %v6719_v7  ;;  %v1797_v28 = vadd.f32 %v3958_v6, %v1791_v21 }
 0x532   :  { %v4867_v8 = vpop.f32.mrf.mxu0  ;;  %v4879_v9 = vpop.f32.mrf.mxu1 }
 0x533   :  { %v1842_v1 = vmul.f32 0.5, %v1839_v25  ;;  %v1850_v15 = vrot.slane %v1797_v28, 2  ;;  %v6746_v9 = vld [vmem:[%s7792_s2 + $0xf8] sm:$0xff]  }
 0x534   :  { %v1794_v10 = vpop.f32.mrf.mxu0  ;;  %v1836_v12 = vpop.f32.mrf.mxu1 }
 0x535   :  { %v1847_v13 = vrot.slane %v1842_v1, 4  ;;  %v6758_v1 = vld [vmem:[%s7792_s2 + $0xb0] sm:$0xff]   ;;  %v6772_v12 = vld [vmem:[%s7792_s2 + $0xa8] sm:$0xff]  }
 0x536   :  { %v4868_v16 = vpop.f32.mrf.mxu0  ;;  %v4880_v17 = vpop.f32.mrf.mxu1  ;;  %v6764_v10 = vld [vmem:[%s7792_s2 + $0xf0] sm:$0xff]  }
 0x537   :  { %v1853_v19 = vsel %vm442_vm2, %v1852_v27, %v1847_v13  ;;  %v6778_v13 = vld [vmem:[%s7792_s2 + $0xe8] sm:$0xff]   ;;  %v6792_v16 = vld [vmem:[%s7792_s2 + $0xe0] sm:$0xff]   ;;  %v6800_v17 = vld [vmem:[%s7792_s2 + $0x98] sm:$0xff]  }
 0x538   :  { %v1854_v20 = vsel %vm444_vm3, %v1853_v19, %v1850_v15  ;;  %v6786_v15 = vld [vmem:[%s7792_s2 + $0xa0] sm:$0xff]   ;;  %v6806_v19 = vld [vmem:[%s7792_s2 + $0xd8] sm:$0xff]  }
 0x539   :  { %5565 = vtanh.f32 %v1854_v20  ;;  %v6814_v20 = vld [vmem:[%s7792_s2 + $0x90] sm:$0xff]  }
 0x53e   :  { %v5564_v22 = vpop.eup %5563 }
 0x53f   :  { %v1663_v23 = vrot.slane %v5564_v22, 6  ;;  %v6820_v22 = vld [vmem:[%s7792_s2 + $0xd0] sm:$0xff]  }
 0x541   :  { %v1665_v3 = vmul.f32 %v1663_v23, %v1651_v30  ;;  %v6828_v23 = vld [vmem:[%s7792_s2 + $0x88] sm:$0xff]  }
 0x543   :  { %1873 = vrot.lane.b32.xlu1 %v1665_v3, %s5712_s21  ;;  %v6727_v24 = vsel %vm442_vm2, %v6435_v14, %v1665_v3  ;;  %v6834_v3 = vld [vmem:[%s7792_s2 + $0xc8] sm:$0xff]  }
 0x546   :  { %v5566_v29 = vpop.eup %5565 }
 0x547   :  { %v1856_v47 = vmul.f32 0.5, %v5566_v29  ;;  %v1860_v50 = vrot.slane %v5566_v29, 6  ;;  %v6842_v29 = vld [vmem:[%s7792_s2 + $0x80] sm:$0xff]  }
 0x549   :  { %v1857_v51 = vadd.f32 0.5, %v1856_v47  ;;  %v6848_v47 = vld [vmem:[%s7792_s2 + $0xc0] sm:$0xff]  }
 0x54b   :  { %v1862_v54 = vmul.f32 %v1860_v50, %v1857_v51  ;;  %v1858_v27 = vmul.f32 %v1857_v51, %v6438_v26  ;;  %v6740_v26 = vld [vmem:[%s7792_s2 + $0xb8] sm:$0xff]  }
 0x54d   :  { %v1864_v18 = vrot.slane %v1862_v54, 6 }
 0x54f   :  { %v6730_v6 = vadd.f32 %v1864_v18, %v1858_v27 }
 0x551   :  { %5567 = vtanh.f32 %v6730_v6 }
 0x55e   :  { %v5568_v30 = vpop.eup %5567 }
 0x55f   :  { %v1869_v21 = vrot.slane %v5568_v30, 6  ;;  %v6938_v30 = vld [vmem:[%s7794_s3 + $0x1] ss:$0 sm:$0xff] }
 0x560   :  { %7844 = vst [vmem:[#allocation7_spill] sm:$0xff] %v6938_v30 }
 0x561   :  { %v6733_v44 = vmul.f32 %v1869_v21, %v1857_v51 }
 0x5b5   :  { %v1874_v25 = vpop.permute.xlu1 %1873 }
 0x5b6   :  { %v1876_v14 = vsel %vm182_vm4, %v6733_v44, %v1874_v25  ;;  %v6944_v25 = vld [vmem:[%s7794_s3] ss:$0 sm:$0xff] }
 0x5b7   :  { %v1877_v28 = vpack.c.bf16 %v1876_v14, %v1876_v14  ;;  %7845 = vst [vmem:[#allocation8_spill] sm:$0xff] %v6944_v25 }
 0x5b9   :  { %v1879_v8 = vrot.slane %v1877_v28, 2 }
 0x5bb   :  { %4898 = vmatmul.mubr.bf16.vlgmr.msra.gmra.mxu0 %v1879_v8  ;;  %4918 = vmatmul.mubr.bf16.vlgmr.msra.gmra.mxu1 %v1879_v8 }
 0x5bc   :  { %4922 = vmatpush3.bf16.msra.mxu0 %v6740_v26  ;;  %4942 = vmatpush3.bf16.msra.mxu1 %v6746_v9 }
 0x5bd   :  { %4923 = vmatprep.subr.bf16.mxu0 %v7831_v43  ;;  %4943 = vmatprep.subr.bf16.mxu1 %v7831_v43 }
 0x5be   :  { %4937 = vmatprep.mubr.msk.bf16.mxu0 %vm5710_vm0, %v7831_v43  ;;  %4957 = vmatprep.mubr.msk.bf16.mxu1 %vm5710_vm0, %v7831_v43 }
 0x5c0   :  { %4924 = vmatpush3.bf16.msra.mxu0 %v6758_v1  ;;  %4944 = vmatpush3.bf16.msra.mxu1 %v6764_v10 }
 0x5c1   :  { %4925 = vmatprep.subr.bf16.mxu0 %v7831_v43  ;;  %4945 = vmatprep.subr.bf16.mxu1 %v7831_v43 }
 0x5c4   :  { %4926 = vmatpush3.bf16.msra.mxu0 %v6772_v12  ;;  %4946 = vmatpush3.bf16.msra.mxu1 %v6778_v13 }
 0x5c5   :  { %4927 = vmatprep.subr.bf16.mxu0 %v7831_v43  ;;  %4947 = vmatprep.subr.bf16.mxu1 %v7831_v43 }
 0x5c8   :  { %4928 = vmatpush3.bf16.msra.mxu0 %v6786_v15  ;;  %4948 = vmatpush3.bf16.msra.mxu1 %v6792_v16 }
 0x5c9   :  { %4929 = vmatprep.subr.bf16.mxu0 %v7831_v43  ;;  %4949 = vmatprep.subr.bf16.mxu1 %v7831_v43 }
 0x5cc   :  { %4930 = vmatpush3.bf16.msra.mxu0 %v6800_v17  ;;  %4950 = vmatpush3.bf16.msra.mxu1 %v6806_v19 }
 0x5cd   :  { %4931 = vmatprep.subr.bf16.mxu0 %v7831_v43  ;;  %4951 = vmatprep.subr.bf16.mxu1 %v7831_v43 }
 0x5d0   :  { %4932 = vmatpush3.bf16.msra.mxu0 %v6814_v20  ;;  %4952 = vmatpush3.bf16.msra.mxu1 %v6820_v22 }
 0x5d1   :  { %4933 = vmatprep.subr.bf16.mxu0 %v7831_v43  ;;  %4953 = vmatprep.subr.bf16.mxu1 %v7831_v43 }
 0x5d4   :  { %4934 = vmatpush3.bf16.msra.mxu0 %v6828_v23  ;;  %4954 = vmatpush3.bf16.msra.mxu1 %v6834_v3 }
 0x5d5   :  { %4935 = vmatprep.subr.bf16.mxu0 %v7831_v43  ;;  %4955 = vmatprep.subr.bf16.mxu1 %v7831_v43 }
 0x5d8   :  { %4936 = vmatpush3.bf16.msra.mxu0 %v6842_v29  ;;  %4956 = vmatpush3.bf16.msra.mxu1 %v6848_v47 }
 0x5d9   :  { %4961 = vmatprep.subr.bf16.mxu0 %v7831_v43  ;;  %4973 = vmatprep.subr.bf16.mxu1 %v7831_v43 }
 0x5db   :  { %4938 = vmatmul.mubr.bf16.vlgmr.msra.gmra.mxu0 %v1879_v8  ;;  %4958 = vmatmul.mubr.bf16.vlgmr.msra.gmra.mxu1 %v1879_v8 }
 0x5dc   :  { %4962 = vmatpush3.bf16.msra.mxu0 %v6302_v42  ;;  %4974 = vmatpush3.bf16.msra.mxu1 %v6308_v36  ;;  %v2073_v42 = vpack.c.bf16 %v6733_v44, %v6733_v44 }
 0x5dd   :  { %4963 = vmatprep.subr.bf16.mxu0 %v7831_v43  ;;  %4975 = vmatprep.subr.bf16.mxu1 %v7831_v43 }
 0x5de   :  { %4969 = vmatprep.mubr.msk.bf16.mxu0 %vm5710_vm0, %v7831_v43  ;;  %4981 = vmatprep.mubr.msk.bf16.mxu1 %vm5710_vm0, %v7831_v43  ;;  %v2076_v36 = vrot.slane %v2073_v42, 2  ;;  %v6950_v42 = vld [vmem:[%s7794_s3 + $0x3] ss:$0 sm:$0xff] }
 0x5df   :  { %7846 = vst [vmem:[#allocation9_spill] sm:$0xff] %v6950_v42 }
 0x5e0   :  { %4964 = vmatpush3.bf16.msra.mxu0 %v6320_v37  ;;  %4976 = vmatpush3.bf16.msra.mxu1 %v6326_v31 }
 0x5e1   :  { %4965 = vmatprep.subr.bf16.mxu0 %v7831_v43  ;;  %4977 = vmatprep.subr.bf16.mxu1 %v7831_v43 }
 0x5e4   :  { %4966 = vmatpush3.bf16.msra.mxu0 %v6334_v45  ;;  %4978 = vmatpush3.bf16.msra.mxu1 %v6497_v49 }
 0x5e5   :  { %4967 = vmatprep.subr.bf16.mxu0 %v7831_v43  ;;  %4979 = vmatprep.subr.bf16.mxu1 %v7831_v43 }
 0x5e8   :  { %4968 = vmatpush3.bf16.msra.mxu0 %v6507_v52  ;;  %4980 = vmatpush3.bf16.msra.mxu1 %v6513_v53 }
 0x5e9   :  { %4985 = vmatprep.subr.bf16.mxu0 %v7831_v43  ;;  %4997 = vmatprep.subr.bf16.mxu1 %v7831_v43 }
 0x5eb   :  { %4970 = vmatmul.mubr.msk.bf16.vlgmr.msra.gmra.mxu0 %vm182_vm4, %v2076_v36  ;;  %4982 = vmatmul.mubr.msk.bf16.vlgmr.msra.gmra.mxu1 %vm182_vm4, %v2076_v36 }
 0x5ec   :  { %4986 = vmatpush3.bf16.msra.mxu0 %v6523_v55  ;;  %4998 = vmatpush3.bf16.msra.mxu1 %v6529_v56 }
 0x5ed   :  { %4987 = vmatprep.subr.bf16.mxu0 %v7831_v43  ;;  %4999 = vmatprep.subr.bf16.mxu1 %v7831_v43 }
 0x5ee   :  { %4993 = vmatprep.mubr.msk.bf16.mxu0 %vm5710_vm0, %v7831_v43  ;;  %5005 = vmatprep.mubr.msk.bf16.mxu1 %vm5710_vm0, %v7831_v43 }
 0x5f0   :  { %4988 = vmatpush3.bf16.msra.mxu0 %v6541_v57  ;;  %5000 = vmatpush3.bf16.msra.mxu1 %v6547_v58 }
 0x5f1   :  { %4989 = vmatprep.subr.bf16.mxu0 %v7831_v43  ;;  %5001 = vmatprep.subr.bf16.mxu1 %v7831_v43 }
 0x5f4   :  { %4990 = vmatpush3.bf16.msra.mxu0 %v6555_v59  ;;  %5002 = vmatpush3.bf16.msra.mxu1 %v6561_v60 }
 0x5f5   :  { %4991 = vmatprep.subr.bf16.mxu0 %v7831_v43  ;;  %5003 = vmatprep.subr.bf16.mxu1 %v7831_v43 }
 0x5f8   :  { %4992 = vmatpush3.bf16.msra.mxu0 %v6569_v61  ;;  %5004 = vmatpush3.bf16.msra.mxu1 %v6575_v62 }
 0x5f9   :  { %5009 = vmatprep.subr.bf16.mxu0 %v7831_v43  ;;  %5029 = vmatprep.subr.bf16.mxu1 %v7831_v43 }
 0x5fb   :  { %4994 = vmatmul.mubr.msk.bf16.vlgmr.msra.gmra.mxu0 %vm182_vm4, %v2076_v36  ;;  %5006 = vmatmul.mubr.msk.bf16.vlgmr.msra.gmra.mxu1 %vm182_vm4, %v2076_v36 }
 0x5fc   :  { %5010 = vmatpush3.bf16.msra.mxu0 %v6585_v63  ;;  %5030 = vmatpush3.bf16.msra.mxu1 %v6591_v11 }
 0x5fd   :  { %5011 = vmatprep.subr.bf16.mxu0 %v7831_v43  ;;  %5031 = vmatprep.subr.bf16.mxu1 %v7831_v43 }
 0x5fe   :  { %5025 = vmatprep.mubr.msk.bf16.mxu0 %vm5710_vm0, %v7831_v43  ;;  %5045 = vmatprep.mubr.msk.bf16.mxu1 %vm5710_vm0, %v7831_v43 }
 0x600   :  { %5012 = vmatpush3.bf16.msra.mxu0 %v6603_v34  ;;  %5032 = vmatpush3.bf16.msra.mxu1 %v6609_v38 }
 0x601   :  { %5013 = vmatprep.subr.bf16.mxu0 %v7831_v43  ;;  %5033 = vmatprep.subr.bf16.mxu1 %v7831_v43 }
 0x604   :  { %5014 = vmatpush3.bf16.msra.mxu0 %v6617_v2  ;;  %5034 = vmatpush3.bf16.msra.mxu1 %v6623_v4 }
 0x605   :  { %5015 = vmatprep.subr.bf16.mxu0 %v7831_v43  ;;  %5035 = vmatprep.subr.bf16.mxu1 %v7831_v43 }
 0x608   :  { %5016 = vmatpush3.bf16.msra.mxu0 %v6631_v33  ;;  %5036 = vmatpush3.bf16.msra.mxu1 %v6637_v32 }
 0x609   :  { %5017 = vmatprep.subr.bf16.mxu0 %v7831_v43  ;;  %5037 = vmatprep.subr.bf16.mxu1 %v7831_v43 }
 0x60c   :  { %5018 = vmatpush3.bf16.msra.mxu0 %v6645_v41  ;;  %5038 = vmatpush3.bf16.msra.mxu1 %v6651_v5 }
 0x60d   :  { %5019 = vmatprep.subr.bf16.mxu0 %v7831_v43  ;;  %5039 = vmatprep.subr.bf16.mxu1 %v7831_v43 }
 0x610   :  { %5020 = vmatpush3.bf16.msra.mxu0 %v6659_v48  ;;  %5040 = vmatpush3.bf16.msra.mxu1 %v6665_v46 }
 0x611   :  { %5021 = vmatprep.subr.bf16.mxu0 %v7831_v43  ;;  %5041 = vmatprep.subr.bf16.mxu1 %v7831_v43 }
 0x614   :  { %5022 = vmatpush3.bf16.msra.mxu0 %v6673_v0  ;;  %5042 = vmatpush3.bf16.msra.mxu1 %v6679_v35 }
 0x615   :  { %5023 = vmatprep.subr.bf16.mxu0 %v7831_v43  ;;  %5043 = vmatprep.subr.bf16.mxu1 %v7831_v43 }
 0x618   :  { %5024 = vmatpush3.bf16.msra.mxu0 %v6687_v40  ;;  %5044 = vmatpush3.bf16.msra.mxu1 %v6693_v39 }
 0x619   :  { %5049 = vmatprep.subr.bf16.mxu0 %v7831_v43  ;;  %5069 = vmatprep.subr.bf16.mxu1 %v7831_v43 }
 0x67b   :  { %v1915_v37 = vpop.f32.mrf.mxu0  ;;  %v1955_v31 = vpop.f32.mrf.mxu1 }
 0x67c   :  { %v1956_v21 = vadd.f32 %v6938_v30, %v1955_v31  ;;  %v1916_v14 = vadd.f32 %v6944_v25, %v1915_v37  ;;  %v6956_v31 = vld [vmem:[%s7794_s3 + $0x2] ss:$0 sm:$0xff] }
 0x67d   :  { %v4899_v45 = vpop.f32.mrf.mxu0  ;;  %v4919_v51 = vpop.f32.mrf.mxu1  ;;  %7847 = vst [vmem:[#allocation10_spill] sm:$0xff] %v6956_v31 }
 0x67e   :  { %v2042_v44 = vmul.f32 0.5, %v1956_v21 }
 0x67f   :  { %v1918_v50 = vpop.f32.mrf.mxu0  ;;  %v1958_v54 = vpop.f32.mrf.mxu1 }
 0x680   :  { %v2045_v45 = vrot.slane %v2042_v44, 6 }
 0x681   :  { %v4900_v18 = vpop.f32.mrf.mxu0  ;;  %v4920_v27 = vpop.f32.mrf.mxu1 }
 0x682   :  { %v2041_v18 = vmul.f32 0.5, %v1916_v14  ;;  %v3963_v14 = vld [vmem:[%s7793_s0 + $0x18] sm:$0x3] }
 0x684   :  { %v2053_v30 = vsel %vm440_vm1, %v2041_v18, %v2045_v45 }
 0x69b   :  { %v1995_v28 = vpop.f32.mrf.mxu0  ;;  %v2035_v8 = vpop.f32.mrf.mxu1 }
 0x69c   :  { %v2036_v36 = vadd.f32 %v6950_v42, %v2035_v8  ;;  %v1996_v51 = vadd.f32 %v6956_v31, %v1995_v28  ;;  %v2074_v28 = vld [vmem:[%s7793_s0 + $0x8] sm:$0x3] }
 0x69d   :  { %v4939_v50 = vpop.f32.mrf.mxu0  ;;  %v4959_v54 = vpop.f32.mrf.mxu1 }
 0x69e   :  { %v2043_v37 = vmul.f32 0.5, %v2036_v36  ;;  %v2051_v39 = vrot.slane %v1996_v51, 2 }
 0x69f   :  { %v1998_v27 = vpop.f32.mrf.mxu0  ;;  %v2038_v21 = vpop.f32.mrf.mxu1 }
 0x6a0   :  { %v2048_v25 = vrot.slane %v2043_v37, 4 }
 0x6a1   :  { %v4940_v40 = vpop.f32.mrf.mxu0  ;;  %v4960_v8 = vpop.f32.mrf.mxu1 }
 0x6a2   :  { %v2054_v44 = vsel %vm442_vm2, %v2053_v30, %v2048_v25 }
 0x6a3   :  { %v2055_v42 = vsel %vm444_vm3, %v2054_v44, %v2051_v39 }
 0x6a4   :  { %5569 = vtanh.f32 %v2055_v42 }
 0x6ab   :  { %v2114_v36 = vpop.f32.mrf.mxu0  ;;  %v2156_v50 = vpop.f32.mrf.mxu1 }
 0x6ac   :  { %v2120_v54 = vadd.f32 %v2114_v36, %v2074_v28  ;;  %v2162_v45 = vadd.f32 %v3963_v14, %v2156_v50  ;;  %v3967_v14 = vld [vmem:[%s7793_s0 + $0x38] sm:$0x3]  ;;  %v3965_v36 = vld [vmem:[%s7793_s0 + $0x28] sm:$0x3] }
 0x6ad   :  { %v4971_v51 = vpop.f32.mrf.mxu0  ;;  %v4983_v40 = vpop.f32.mrf.mxu1 }
 0x6ae   :  { %v2248_v37 = vmul.f32 0.5, %v2162_v45  ;;  %v2247_v25 = vmul.f32 0.5, %v2120_v54 }
 0x6af   :  { %v2117_v18 = vpop.f32.mrf.mxu0  ;;  %v2159_v30 = vpop.f32.mrf.mxu1 }
 0x6b0   :  { %v2251_v39 = vrot.slane %v2248_v37, 6 }
 0x6b1   :  { %v5570_v42 = vpop.eup %5569  ;;  %v4972_v27 = vpop.f32.mrf.mxu0 }
 0x6b2   :  { %v4984_v21 = vpop.f32.mrf.mxu1  ;;  %v2259_v8 = vsel %vm440_vm1, %v2247_v25, %v2251_v39  ;;  %v2057_v44 = vmul.f32 0.5, %v5570_v42  ;;  %v2061_v35 = vrot.slane %v5570_v42, 6 }
 0x6b4   :  { %v2058_v31 = vadd.f32 0.5, %v2057_v44 }
 0x6b6   :  { %v2063_v0 = vmul.f32 %v2061_v35, %v2058_v31  ;;  %v2059_v46 = vmul.f32 %v2058_v31, %v6719_v7 }
 0x6b8   :  { %v2065_v28 = vrot.slane %v2063_v0, 6 }
 0x6ba   :  { %v6976_v50 = vadd.f32 %v2065_v28, %v2059_v46 }
 0x6bb   :  { %v2198_v54 = vpop.f32.mrf.mxu0  ;;  %v2240_v45 = vpop.f32.mrf.mxu1 }
 0x6bc   :  { %v2246_v51 = vadd.f32 %v3967_v14, %v2240_v45  ;;  %5571 = vtanh.f32 %v6976_v50  ;;  %v2204_v40 = vadd.f32 %v3965_v36, %v2198_v54 }
 0x6bd   :  { %v4995_v35 = vpop.f32.mrf.mxu0  ;;  %v5007_v37 = vpop.f32.mrf.mxu1 }
 0x6be   :  { %v2249_v7 = vmul.f32 0.5, %v2246_v51  ;;  %v2257_v25 = vrot.slane %v2204_v40, 2 }
 0x6bf   :  { %v2201_v0 = vpop.f32.mrf.mxu0  ;;  %v2243_v18 = vpop.f32.mrf.mxu1 }
 0x6c0   :  { %v2254_v30 = vrot.slane %v2249_v7, 4 }
 0x6c1   :  { %v4996_v39 = vpop.f32.mrf.mxu0  ;;  %v5008_v42 = vpop.f32.mrf.mxu1 }
 0x6c2   :  { %v2260_v27 = vsel %vm442_vm2, %v2259_v8, %v2254_v30  ;;  %v7039_v42 = vld [vmem:[%s7791_s1 + $0x38] sm:$0xff]  }
 0x6c3   :  { %v2261_v46 = vsel %vm444_vm3, %v2260_v27, %v2257_v25  ;;  %v7051_v27 = vld [vmem:[%s7791_s1 + $0x10] sm:$0xff]  }
 0x6c4   :  { %5573 = vtanh.f32 %v2261_v46  ;;  %v7057_v46 = vld [vmem:[%s7791_s1 + $0x30] sm:$0xff]  }
 0x6c9   :  { %v5572_v21 = vpop.eup %5571 }
 0x6ca   :  { %v2070_v44 = vrot.slane %v5572_v21, 6  ;;  %v7065_v21 = vld [vmem:[%s7791_s1 + $0x8] sm:$0xff]  }
 0x6cc   :  { %v2072_v28 = vmul.f32 %v2070_v44, %v2058_v31 }
 0x6ce   :  { %2280 = vrot.lane.b32.xlu1 %v2072_v28, %s5712_s21  ;;  %v3705_v14 = vrot.slane %v2072_v28, 6 }
 0x6d0   :  { %v6984_v36 = vsel %vm444_vm3, %v6727_v24, %v3705_v14 }
 0x6d1   :  { %v5574_v54 = vpop.eup %5573 }
 0x6d2   :  { %v2263_v45 = vmul.f32 0.5, %v5574_v54  ;;  %v2267_v40 = vrot.slane %v5574_v54, 6  ;;  %v7856_v54 = vld [vmem:[#allocation10_spill] sm:$0xff] }
 0x6d4   :  { %v2264_v51 = vadd.f32 0.5, %v2263_v45 }
 0x6d6   :  { %v2269_v35 = vmul.f32 %v2267_v40, %v2264_v51  ;;  %v2265_v8 = vmul.f32 %v2264_v51, %v6730_v6  ;;  %v7033_v6 = vld [vmem:[%s7791_s1 + $0x18] sm:$0xff]  }
 0x6d8   :  { %v2271_v37 = vrot.slane %v2269_v35, 6 }
 0x6da   :  { %v6987_v7 = vadd.f32 %v2271_v37, %v2265_v8 }
 0x6dc   :  { %5575 = vtanh.f32 %v6987_v7 }
 0x6e9   :  { %v5576_v31 = vpop.eup %5575 }
 0x6ea   :  { %v2276_v0 = vrot.slane %v5576_v31, 6 }
 0x6ec   :  { %v6990_v18 = vmul.f32 %v2276_v0, %v2264_v51 }
 0x6ee   :  { %v2480_v44 = vpack.c.bf16 %v6990_v18, %v6990_v18 }
 0x6f0   :  { %v2483_v28 = vrot.slane %v2480_v44, 2 }
 0x740   :  { %v2281_v30 = vpop.permute.xlu1 %2280 }
 0x741   :  { %v2283_v24 = vsel %vm182_vm4, %v6990_v18, %v2281_v30 }
 0x742   :  { %v2284_v25 = vpack.c.bf16 %v2283_v24, %v2283_v24 }
 0x744   :  { %v2286_v39 = vrot.slane %v2284_v25, 2 }
 0x746   :  { %5026 = vmatmul.mubr.bf16.vlgmr.msra.gmra.mxu0 %v2286_v39  ;;  %5046 = vmatmul.mubr.bf16.vlgmr.msra.gmra.mxu1 %v2286_v39 }
 0x747   :  { %5050 = vmatpush3.bf16.msra.mxu0 %v6740_v26  ;;  %5070 = vmatpush3.bf16.msra.mxu1 %v6746_v9 }
 0x748   :  { %5051 = vmatprep.subr.bf16.mxu0 %v7831_v43  ;;  %5071 = vmatprep.subr.bf16.mxu1 %v7831_v43 }
 0x749   :  { %5065 = vmatprep.mubr.msk.bf16.mxu0 %vm5710_vm0, %v7831_v43  ;;  %5085 = vmatprep.mubr.msk.bf16.mxu1 %vm5710_vm0, %v7831_v43 }
 0x74b   :  { %5052 = vmatpush3.bf16.msra.mxu0 %v6758_v1  ;;  %5072 = vmatpush3.bf16.msra.mxu1 %v6764_v10 }
 0x74c   :  { %5053 = vmatprep.subr.bf16.mxu0 %v7831_v43  ;;  %5073 = vmatprep.subr.bf16.mxu1 %v7831_v43 }
 0x74f   :  { %5054 = vmatpush3.bf16.msra.mxu0 %v6772_v12  ;;  %5074 = vmatpush3.bf16.msra.mxu1 %v6778_v13 }
 0x750   :  { %5055 = vmatprep.subr.bf16.mxu0 %v7831_v43  ;;  %5075 = vmatprep.subr.bf16.mxu1 %v7831_v43 }
 0x753   :  { %5056 = vmatpush3.bf16.msra.mxu0 %v6786_v15  ;;  %5076 = vmatpush3.bf16.msra.mxu1 %v6792_v16 }
 0x754   :  { %5057 = vmatprep.subr.bf16.mxu0 %v7831_v43  ;;  %5077 = vmatprep.subr.bf16.mxu1 %v7831_v43 }
 0x757   :  { %5058 = vmatpush3.bf16.msra.mxu0 %v6800_v17  ;;  %5078 = vmatpush3.bf16.msra.mxu1 %v6806_v19 }
 0x758   :  { %5059 = vmatprep.subr.bf16.mxu0 %v7831_v43  ;;  %5079 = vmatprep.subr.bf16.mxu1 %v7831_v43 }
 0x75b   :  { %5060 = vmatpush3.bf16.msra.mxu0 %v6814_v20  ;;  %5080 = vmatpush3.bf16.msra.mxu1 %v6820_v22 }
 0x75c   :  { %5061 = vmatprep.subr.bf16.mxu0 %v7831_v43  ;;  %5081 = vmatprep.subr.bf16.mxu1 %v7831_v43 }
 0x75f   :  { %5062 = vmatpush3.bf16.msra.mxu0 %v6828_v23  ;;  %5082 = vmatpush3.bf16.msra.mxu1 %v6834_v3 }
 0x760   :  { %5063 = vmatprep.subr.bf16.mxu0 %v7831_v43  ;;  %5083 = vmatprep.subr.bf16.mxu1 %v7831_v43 }
 0x763   :  { %5064 = vmatpush3.bf16.msra.mxu0 %v6842_v29  ;;  %5084 = vmatpush3.bf16.msra.mxu1 %v6848_v47 }
 0x764   :  { %5089 = vmatprep.subr.bf16.mxu0 %v7831_v43  ;;  %5101 = vmatprep.subr.bf16.mxu1 %v7831_v43 }
 0x766   :  { %5066 = vmatmul.mubr.bf16.vlgmr.msra.gmra.mxu0 %v2286_v39  ;;  %5086 = vmatmul.mubr.bf16.vlgmr.msra.gmra.mxu1 %v2286_v39 }
 0x767   :  { %5090 = vmatpush3.bf16.msra.mxu0 %v7033_v6  ;;  %5102 = vmatpush3.bf16.msra.mxu1 %v7039_v42 }
 0x768   :  { %5091 = vmatprep.subr.bf16.mxu0 %v7831_v43  ;;  %5103 = vmatprep.subr.bf16.mxu1 %v7831_v43 }
 0x769   :  { %5097 = vmatprep.mubr.msk.bf16.mxu0 %vm5710_vm0, %v7831_v43  ;;  %5109 = vmatprep.mubr.msk.bf16.mxu1 %vm5710_vm0, %v7831_v43 }
 0x76b   :  { %5092 = vmatpush3.bf16.msra.mxu0 %v7051_v27  ;;  %5104 = vmatpush3.bf16.msra.mxu1 %v7057_v46 }
 0x76c   :  { %5093 = vmatprep.subr.bf16.mxu0 %v7831_v43  ;;  %5105 = vmatprep.subr.bf16.mxu1 %v7831_v43 }
 0x76f   :  { %5094 = vmatpush3.bf16.msra.mxu0 %v7065_v21  ;;  %5106 = vmatpush3.bf16.msra.mxu1 %v6497_v49  ;;  %v7848_v49 = vld [vmem:[#allocation2_spill] sm:$0xff] }
 0x770   :  { %5095 = vmatprep.subr.bf16.mxu0 %v7831_v43  ;;  %5107 = vmatprep.subr.bf16.mxu1 %v7831_v43 }
 0x773   :  { %5096 = vmatpush3.bf16.msra.mxu0 %v6507_v52  ;;  %5108 = vmatpush3.bf16.msra.mxu1 %v6513_v53  ;;  %v7849_v52 = vld [vmem:[#allocation3_spill] sm:$0xff]  ;;  %v7850_v53 = vld [vmem:[#allocation4_spill] sm:$0xff] }
 0x774   :  { %5113 = vmatprep.subr.bf16.mxu0 %v7831_v43  ;;  %5125 = vmatprep.subr.bf16.mxu1 %v7831_v43 }
 0x776   :  { %5098 = vmatmul.mubr.msk.bf16.vlgmr.msra.gmra.mxu0 %vm182_vm4, %v2483_v28  ;;  %5110 = vmatmul.mubr.msk.bf16.vlgmr.msra.gmra.mxu1 %vm182_vm4, %v2483_v28 }
 0x777   :  { %5114 = vmatpush3.bf16.msra.mxu0 %v6523_v55  ;;  %5126 = vmatpush3.bf16.msra.mxu1 %v6529_v56  ;;  %v7851_v55 = vld [vmem:[#allocation5_spill] sm:$0xff]  ;;  %v7852_v56 = vld [vmem:[#allocation6_spill] sm:$0xff] }
 0x778   :  { %5115 = vmatprep.subr.bf16.mxu0 %v7831_v43  ;;  %5127 = vmatprep.subr.bf16.mxu1 %v7831_v43 }
 0x779   :  { %5121 = vmatprep.mubr.msk.bf16.mxu0 %vm5710_vm0, %v7831_v43  ;;  %5133 = vmatprep.mubr.msk.bf16.mxu1 %vm5710_vm0, %v7831_v43 }
 0x77b   :  { %5116 = vmatpush3.bf16.msra.mxu0 %v6541_v57  ;;  %5128 = vmatpush3.bf16.msra.mxu1 %v6547_v58 }
 0x77c   :  { %5117 = vmatprep.subr.bf16.mxu0 %v7831_v43  ;;  %5129 = vmatprep.subr.bf16.mxu1 %v7831_v43 }
 0x77f   :  { %5118 = vmatpush3.bf16.msra.mxu0 %v6555_v59  ;;  %5130 = vmatpush3.bf16.msra.mxu1 %v6561_v60 }
 0x780   :  { %5119 = vmatprep.subr.bf16.mxu0 %v7831_v43  ;;  %5131 = vmatprep.subr.bf16.mxu1 %v7831_v43 }
 0x783   :  { %5120 = vmatpush3.bf16.msra.mxu0 %v6569_v61  ;;  %5132 = vmatpush3.bf16.msra.mxu1 %v6575_v62 }
 0x784   :  { %5137 = vmatprep.subr.bf16.mxu0 %v7831_v43  ;;  %5157 = vmatprep.subr.bf16.mxu1 %v7831_v43 }
 0x786   :  { %5122 = vmatmul.mubr.msk.bf16.vlgmr.msra.gmra.mxu0 %vm182_vm4, %v2483_v28  ;;  %5134 = vmatmul.mubr.msk.bf16.vlgmr.msra.gmra.mxu1 %vm182_vm4, %v2483_v28  ;;  %v2481_v28 = vld [vmem:[%s7793_s0 + $0xa] sm:$0x3] }
 0x787   :  { %5138 = vmatpush3.bf16.msra.mxu0 %v6585_v63  ;;  %5158 = vmatpush3.bf16.msra.mxu1 %v6591_v11 }
 0x788   :  { %5139 = vmatprep.subr.bf16.mxu0 %v7831_v43  ;;  %5159 = vmatprep.subr.bf16.mxu1 %v7831_v43 }
 0x789   :  { %5153 = vmatprep.mubr.msk.bf16.mxu0 %vm5710_vm0, %v7831_v43  ;;  %5173 = vmatprep.mubr.msk.bf16.mxu1 %vm5710_vm0, %v7831_v43 }
 0x78b   :  { %5140 = vmatpush3.bf16.msra.mxu0 %v6603_v34  ;;  %5160 = vmatpush3.bf16.msra.mxu1 %v6609_v38  ;;  %v7853_v34 = vld [vmem:[#allocation7_spill] sm:$0xff] }
 0x78c   :  { %5141 = vmatprep.subr.bf16.mxu0 %v7831_v43  ;;  %5161 = vmatprep.subr.bf16.mxu1 %v7831_v43 }
 0x78f   :  { %5142 = vmatpush3.bf16.msra.mxu0 %v6617_v2  ;;  %5162 = vmatpush3.bf16.msra.mxu1 %v6623_v4  ;;  %v7854_v4 = vld [vmem:[#allocation8_spill] sm:$0xff] }
 0x790   :  { %5143 = vmatprep.subr.bf16.mxu0 %v7831_v43  ;;  %5163 = vmatprep.subr.bf16.mxu1 %v7831_v43 }
 0x793   :  { %5144 = vmatpush3.bf16.msra.mxu0 %v6631_v33  ;;  %5164 = vmatpush3.bf16.msra.mxu1 %v6637_v32 }
 0x794   :  { %5145 = vmatprep.subr.bf16.mxu0 %v7831_v43  ;;  %5165 = vmatprep.subr.bf16.mxu1 %v7831_v43 }
 0x797   :  { %5146 = vmatpush3.bf16.msra.mxu0 %v6645_v41  ;;  %5166 = vmatpush3.bf16.msra.mxu1 %v6651_v5  ;;  %v7855_v5 = vld [vmem:[#allocation9_spill] sm:$0xff] }
 0x798   :  { %5147 = vmatprep.subr.bf16.mxu0 %v7831_v43  ;;  %5167 = vmatprep.subr.bf16.mxu1 %v7831_v43 }
 0x79b   :  { %5148 = vmatpush3.bf16.msra.mxu0 %v6659_v48  ;;  %5168 = vmatpush3.bf16.msra.mxu1 %v7848_v49  ;;  %v3970_v49 = vld [vmem:[%s7793_s0 + $0x1a] sm:$0x3] }
 0x79c   :  { %5149 = vmatprep.subr.bf16.mxu0 %v7831_v43  ;;  %5169 = vmatprep.subr.bf16.mxu1 %v7831_v43 }
 0x79f   :  { %5150 = vmatpush3.bf16.msra.mxu0 %v7849_v52  ;;  %5170 = vmatpush3.bf16.msra.mxu1 %v7850_v53 }
 0x7a0   :  { %5151 = vmatprep.subr.bf16.mxu0 %v7831_v43  ;;  %5171 = vmatprep.subr.bf16.mxu1 %v7831_v43 }
 0x7a3   :  { %5152 = vmatpush3.bf16.msra.mxu0 %v7851_v55  ;;  %5172 = vmatpush3.bf16.msra.mxu1 %v7852_v56 }
 0x7a4   :  { %5177 = vmatprep.subr.bf16.mxu0 %v7831_v43  ;;  %5197 = vmatprep.subr.bf16.mxu1 %v7831_v43 }
 0x806   :  { %v2322_v57 = vpop.f32.mrf.mxu0  ;;  %v2362_v58 = vpop.f32.mrf.mxu1 }
 0x807   :  { %v2363_v38 = vadd.f32 %v7853_v34, %v2362_v58  ;;  %v2323_v33 = vadd.f32 %v7854_v4, %v2322_v57 }
 0x808   :  { %v5027_v59 = vpop.f32.mrf.mxu0  ;;  %v5047_v60 = vpop.f32.mrf.mxu1 }
 0x809   :  { %v2449_v2 = vmul.f32 0.5, %v2363_v38  ;;  %v2448_v37 = vmul.f32 0.5, %v2323_v33 }
 0x80a   :  { %v2325_v61 = vpop.f32.mrf.mxu0  ;;  %v2365_v62 = vpop.f32.mrf.mxu1 }
 0x80b   :  { %v2452_v14 = vrot.slane %v2449_v2, 6 }
 0x80c   :  { %v5028_v63 = vpop.f32.mrf.mxu0  ;;  %v5048_v11 = vpop.f32.mrf.mxu1 }
 0x80d   :  { %v2460_v18 = vsel %vm440_vm1, %v2448_v37, %v2452_v14 }
 0x826   :  { %v2402_v32 = vpop.f32.mrf.mxu0  ;;  %v2442_v41 = vpop.f32.mrf.mxu1 }
 0x827   :  { %v2443_v48 = vadd.f32 %v7855_v5, %v2442_v41  ;;  %v2403_v45 = vadd.f32 %v7856_v54, %v2402_v32 }
 0x828   :  { %v5067_v51 = vpop.f32.mrf.mxu0  ;;  %v5087_v40 = vpop.f32.mrf.mxu1 }
 0x829   :  { %v2450_v35 = vmul.f32 0.5, %v2443_v48  ;;  %v2458_v30 = vrot.slane %v2403_v45, 2  ;;  %v3974_v40 = vld [vmem:[%s7793_s0 + $0x3a] sm:$0x3] }
 0x82a   :  { %v2405_v8 = vpop.f32.mrf.mxu0  ;;  %v2445_v31 = vpop.f32.mrf.mxu1 }
 0x82b   :  { %v2455_v0 = vrot.slane %v2450_v35, 4  ;;  %v3972_v35 = vld [vmem:[%s7793_s0 + $0x2a] sm:$0x3] }
 0x82c   :  { %v5068_v24 = vpop.f32.mrf.mxu0  ;;  %v5088_v25 = vpop.f32.mrf.mxu1 }
 0x82d   :  { %v2461_v39 = vsel %vm442_vm2, %v2460_v18, %v2455_v0 }
 0x82e   :  { %v2462_v44 = vsel %vm444_vm3, %v2461_v39, %v2458_v30 }
 0x82f   :  { %5577 = vtanh.f32 %v2462_v44 }
 0x836   :  { %v2521_v52 = vpop.f32.mrf.mxu0  ;;  %v2563_v53 = vpop.f32.mrf.mxu1 }
 0x837   :  { %v2527_v55 = vadd.f32 %v2521_v52, %v2481_v28  ;;  %v2569_v56 = vadd.f32 %v3970_v49, %v2563_v53 }
 0x838   :  { %v5099_v57 = vpop.f32.mrf.mxu0  ;;  %v5111_v58 = vpop.f32.mrf.mxu1 }
 0x839   :  { %v2655_v59 = vmul.f32 0.5, %v2569_v56  ;;  %v2654_v62 = vmul.f32 0.5, %v2527_v55 }
 0x83a   :  { %v2524_v60 = vpop.f32.mrf.mxu0  ;;  %v2566_v61 = vpop.f32.mrf.mxu1 }
 0x83b   :  { %v2658_v63 = vrot.slane %v2655_v59, 6 }
 0x83c   :  { %v5578_v11 = vpop.eup %5577  ;;  %v5100_v38 = vpop.f32.mrf.mxu0 }
 0x83d   :  { %v5112_v2 = vpop.f32.mrf.mxu1  ;;  %v2666_v33 = vsel %vm440_vm1, %v2654_v62, %v2658_v63  ;;  %v2464_v32 = vmul.f32 0.5, %v5578_v11  ;;  %v2468_v48 = vrot.slane %v5578_v11, 6 }
 0x83f   :  { %v2465_v41 = vadd.f32 0.5, %v2464_v32 }
 0x841   :  { %v2470_v14 = vmul.f32 %v2468_v48, %v2465_v41  ;;  %v2466_v45 = vmul.f32 %v2465_v41, %v6976_v50 }
 0x843   :  { %v2472_v51 = vrot.slane %v2470_v14, 6 }
 0x845   :  { %v7158_v37 = vadd.f32 %v2472_v51, %v2466_v45 }
 0x846   :  { %v2605_v8 = vpop.f32.mrf.mxu0  ;;  %v2647_v31 = vpop.f32.mrf.mxu1 }
 0x847   :  { %v2653_v0 = vadd.f32 %v3974_v40, %v2647_v31  ;;  %5579 = vtanh.f32 %v7158_v37  ;;  %v2611_v18 = vadd.f32 %v3972_v35, %v2605_v8  ;;  %v7347_v40 = vld [vmem:[%s7792_s2 + $0x28] sm:$0xff]   ;;  %v7361_v8 = vld [vmem:[%s7792_s2 + $0x20] sm:$0xff]  }
 0x848   :  { %v5123_v30 = vpop.f32.mrf.mxu0  ;;  %v5135_v24 = vpop.f32.mrf.mxu1  ;;  %v7353_v35 = vld [vmem:[%s7792_s2 + $0x68] sm:$0xff]   ;;  %v7367_v31 = vld [vmem:[%s7792_s2 + $0x60] sm:$0xff]  }
 0x849   :  { %v2656_v50 = vmul.f32 0.5, %v2653_v0  ;;  %v2664_v28 = vrot.slane %v2611_v18, 2  ;;  %v7375_v0 = vld [vmem:[%s7792_s2 + $0x18] sm:$0xff]   ;;  %v7389_v30 = vld [vmem:[%s7792_s2 + $0x10] sm:$0xff]  }
 0x84a   :  { %v2608_v25 = vpop.f32.mrf.mxu0  ;;  %v2650_v39 = vpop.f32.mrf.mxu1  ;;  %v7381_v18 = vld [vmem:[%s7792_s2 + $0x58] sm:$0xff]   ;;  %v7395_v24 = vld [vmem:[%s7792_s2 + $0x50] sm:$0xff]  }
 0x84b   :  { %v2661_v44 = vrot.slane %v2656_v50, 4  ;;  %v7403_v50 = vld [vmem:[%s7792_s2 + $0x8] sm:$0xff]   ;;  %v7417_v39 = vld [vmem:[%s7792_s2] sm:$0xff]  }
 0x84c   :  { %v5124_v49 = vpop.f32.mrf.mxu0  ;;  %v5136_v52 = vpop.f32.mrf.mxu1  ;;  %v7409_v25 = vld [vmem:[%s7792_s2 + $0x48] sm:$0xff]  }
 0x84d   :  { %v2667_v53 = vsel %vm442_vm2, %v2666_v33, %v2661_v44  ;;  %v7423_v44 = vld [vmem:[%s7792_s2 + $0x40] sm:$0xff]  }
 0x84e   :  { %v2668_v55 = vsel %vm444_vm3, %v2667_v53, %v2664_v28 }
 0x84f   :  { %5581 = vtanh.f32 %v2668_v55 }
 0x854   :  { %v5580_v56 = vpop.eup %5579 }
 0x855   :  { %v2477_v57 = vrot.slane %v5580_v56, 6 }
 0x857   :  { %v7163_v58 = vmul.f32 %v2477_v57, %v2465_v41 }
 0x859   :  { %2687 = vrot.lane.b32.xlu0 %v7163_v58, %s5712_s21 }
 0x85c   :  { %v5582_v59 = vpop.eup %5581 }
 0x85d   :  { %v2670_v60 = vmul.f32 0.5, %v5582_v59  ;;  %v2674_v62 = vrot.slane %v5582_v59, 6 }
 0x85f   :  { %v2671_v61 = vadd.f32 0.5, %v2670_v60 }
 0x861   :  { %v2676_v63 = vmul.f32 %v2674_v62, %v2671_v61  ;;  %v2672_v38 = vmul.f32 %v2671_v61, %v6987_v7  ;;  %v7339_v7 = vld [vmem:[%s7792_s2 + $0x70] sm:$0xff]  }
 0x863   :  { %v2678_v11 = vrot.slane %v2676_v63, 6 }
 0x865   :  { %v7168_v2 = vadd.f32 %v2678_v11, %v2672_v38 }
 0x867   :  { %5583 = vtanh.f32 %v7168_v2 }
 0x874   :  { %v5584_v33 = vpop.eup %5583 }
 0x875   :  { %v2683_v32 = vrot.slane %v5584_v33, 6 }
 0x877   :  { %v7171_v41 = vmul.f32 %v2683_v32, %v2671_v61 }
 0x8cb   :  { %v2688_v48 = vpop.permute.xlu0 %2687 }
 0x8cc   :  { %v2690_v14 = vsel %vm182_vm4, %v7171_v41, %v2688_v48 }
 0x8cd   :  { %v2691_v45 = vpack.c.bf16 %v2690_v14, %v2690_v14 }
 0x8cf   :  { %v2693_v51 = vrot.slane %v2691_v45, 2 }
 0x8d1   :  { %5154 = vmatmul.mubr.bf16.vlgmr.msra.gmra.mxu0 %v2693_v51  ;;  %5174 = vmatmul.mubr.bf16.vlgmr.msra.gmra.mxu1 %v2693_v51 }
 0x8d2   :  { %5178 = vmatpush3.bf16.msra.mxu0 %v6740_v26  ;;  %5198 = vmatpush3.bf16.msra.mxu1 %v6746_v9  ;;  %v7227_v26 = vld [vmem:[%s7791_s1 + $0x28] sm:$0xff]   ;;  %v2887_v9 = vpack.c.bf16 %v7171_v41, %v7171_v41 }
 0x8d3   :  { %5179 = vmatprep.subr.bf16.mxu0 %v7831_v43  ;;  %5199 = vmatprep.subr.bf16.mxu1 %v7831_v43 }
 0x8d4   :  { %5193 = vmatprep.mubr.msk.bf16.mxu0 %vm5710_vm0, %v7831_v43  ;;  %5213 = vmatprep.mubr.msk.bf16.mxu1 %vm5710_vm0, %v7831_v43 }
 0x8d6   :  { %5180 = vmatpush3.bf16.msra.mxu0 %v6758_v1  ;;  %5200 = vmatpush3.bf16.msra.mxu1 %v6764_v10  ;;  %v7237_v1 = vld [vmem:[%s7791_s1] sm:$0xff]  }
 0x8d7   :  { %5181 = vmatprep.subr.bf16.mxu0 %v7831_v43  ;;  %5201 = vmatprep.subr.bf16.mxu1 %v7831_v43  ;;  %v7243_v10 = vld [vmem:[%s7791_s1 + $0x20] sm:$0xff]  }
 0x8da   :  { %5182 = vmatpush3.bf16.msra.mxu0 %v6772_v12  ;;  %5202 = vmatpush3.bf16.msra.mxu1 %v6778_v13  ;;  %v2890_v12 = vrot.slane %v2887_v9, 2  ;;  %v7253_v13 = vld [vmem:[%s7791_s1 + $0x58] sm:$0xff]  }
 0x8db   :  { %5183 = vmatprep.subr.bf16.mxu0 %v7831_v43  ;;  %5203 = vmatprep.subr.bf16.mxu1 %v7831_v43 }
 0x8de   :  { %5184 = vmatpush3.bf16.msra.mxu0 %v6786_v15  ;;  %5204 = vmatpush3.bf16.msra.mxu1 %v6792_v16  ;;  %v7259_v15 = vld [vmem:[%s7791_s1 + $0x78] sm:$0xff]   ;;  %v7271_v16 = vld [vmem:[%s7791_s1 + $0x50] sm:$0xff]  }
 0x8df   :  { %5185 = vmatprep.subr.bf16.mxu0 %v7831_v43  ;;  %5205 = vmatprep.subr.bf16.mxu1 %v7831_v43 }
 0x8e2   :  { %5186 = vmatpush3.bf16.msra.mxu0 %v6800_v17  ;;  %5206 = vmatpush3.bf16.msra.mxu1 %v6806_v19  ;;  %v7277_v17 = vld [vmem:[%s7791_s1 + $0x70] sm:$0xff]   ;;  %v7285_v19 = vld [vmem:[%s7791_s1 + $0x48] sm:$0xff]  }
 0x8e3   :  { %5187 = vmatprep.subr.bf16.mxu0 %v7831_v43  ;;  %5207 = vmatprep.subr.bf16.mxu1 %v7831_v43 }
 0x8e6   :  { %5188 = vmatpush3.bf16.msra.mxu0 %v6814_v20  ;;  %5208 = vmatpush3.bf16.msra.mxu1 %v6820_v22  ;;  %v7291_v20 = vld [vmem:[%s7791_s1 + $0x68] sm:$0xff]   ;;  %v7299_v22 = vld [vmem:[%s7791_s1 + $0x40] sm:$0xff]  }
 0x8e7   :  { %5189 = vmatprep.subr.bf16.mxu0 %v7831_v43  ;;  %5209 = vmatprep.subr.bf16.mxu1 %v7831_v43 }
 0x8ea   :  { %5190 = vmatpush3.bf16.msra.mxu0 %v6828_v23  ;;  %5210 = vmatpush3.bf16.msra.mxu1 %v6834_v3  ;;  %v7305_v23 = vld [vmem:[%s7791_s1 + $0x60] sm:$0xff]   ;;  %v7315_v3 = vld [vmem:[%s7792_s2 + $0x38] sm:$0xff]  }
 0x8eb   :  { %5191 = vmatprep.subr.bf16.mxu0 %v7831_v43  ;;  %5211 = vmatprep.subr.bf16.mxu1 %v7831_v43 }
 0x8ee   :  { %5192 = vmatpush3.bf16.msra.mxu0 %v6842_v29  ;;  %5212 = vmatpush3.bf16.msra.mxu1 %v6848_v47  ;;  %v7321_v29 = vld [vmem:[%s7792_s2 + $0x78] sm:$0xff]   ;;  %v7333_v47 = vld [vmem:[%s7792_s2 + $0x30] sm:$0xff]  }
 0x8ef   :  { %5217 = vmatprep.subr.bf16.mxu0 %v7831_v43  ;;  %5229 = vmatprep.subr.bf16.mxu1 %v7831_v43 }
 0x8f1   :  { %5194 = vmatmul.mubr.bf16.vlgmr.msra.gmra.mxu0 %v2693_v51  ;;  %5214 = vmatmul.mubr.bf16.vlgmr.msra.gmra.mxu1 %v2693_v51 }
 0x8f2   :  { %5218 = vmatpush3.bf16.msra.mxu0 %v7033_v6  ;;  %5230 = vmatpush3.bf16.msra.mxu1 %v7039_v42 }
 0x8f3   :  { %5219 = vmatprep.subr.bf16.mxu0 %v7831_v43  ;;  %5231 = vmatprep.subr.bf16.mxu1 %v7831_v43 }
 0x8f4   :  { %5225 = vmatprep.mubr.msk.bf16.mxu0 %vm5710_vm0, %v7831_v43  ;;  %5237 = vmatprep.mubr.msk.bf16.mxu1 %vm5710_vm0, %v7831_v43 }
 0x8f6   :  { %5220 = vmatpush3.bf16.msra.mxu0 %v7051_v27  ;;  %5232 = vmatpush3.bf16.msra.mxu1 %v7057_v46 }
 0x8f7   :  { %5221 = vmatprep.subr.bf16.mxu0 %v7831_v43  ;;  %5233 = vmatprep.subr.bf16.mxu1 %v7831_v43 }
 0x8fa   :  { %5222 = vmatpush3.bf16.msra.mxu0 %v7065_v21  ;;  %5234 = vmatpush3.bf16.msra.mxu1 %v7227_v26 }
 0x8fb   :  { %5223 = vmatprep.subr.bf16.mxu0 %v7831_v43  ;;  %5235 = vmatprep.subr.bf16.mxu1 %v7831_v43 }
 0x8fe   :  { %5224 = vmatpush3.bf16.msra.mxu0 %v7237_v1  ;;  %5236 = vmatpush3.bf16.msra.mxu1 %v7243_v10 }
 0x8ff   :  { %5241 = vmatprep.subr.bf16.mxu0 %v7831_v43  ;;  %5253 = vmatprep.subr.bf16.mxu1 %v7831_v43 }
 0x901   :  { %5226 = vmatmul.mubr.msk.bf16.vlgmr.msra.gmra.mxu0 %vm182_vm4, %v2890_v12  ;;  %5238 = vmatmul.mubr.msk.bf16.vlgmr.msra.gmra.mxu1 %vm182_vm4, %v2890_v12 }
 0x902   :  { %5242 = vmatpush3.bf16.msra.mxu0 %v7253_v13  ;;  %5254 = vmatpush3.bf16.msra.mxu1 %v7259_v15 }
 0x903   :  { %5243 = vmatprep.subr.bf16.mxu0 %v7831_v43  ;;  %5255 = vmatprep.subr.bf16.mxu1 %v7831_v43 }
 0x904   :  { %5249 = vmatprep.mubr.msk.bf16.mxu0 %vm5710_vm0, %v7831_v43  ;;  %5261 = vmatprep.mubr.msk.bf16.mxu1 %vm5710_vm0, %v7831_v43 }
 0x906   :  { %5244 = vmatpush3.bf16.msra.mxu0 %v7271_v16  ;;  %5256 = vmatpush3.bf16.msra.mxu1 %v7277_v17 }
 0x907   :  { %5245 = vmatprep.subr.bf16.mxu0 %v7831_v43  ;;  %5257 = vmatprep.subr.bf16.mxu1 %v7831_v43 }
 0x90a   :  { %5246 = vmatpush3.bf16.msra.mxu0 %v7285_v19  ;;  %5258 = vmatpush3.bf16.msra.mxu1 %v7291_v20 }
 0x90b   :  { %5247 = vmatprep.subr.bf16.mxu0 %v7831_v43  ;;  %5259 = vmatprep.subr.bf16.mxu1 %v7831_v43 }
 0x90e   :  { %5248 = vmatpush3.bf16.msra.mxu0 %v7299_v22  ;;  %5260 = vmatpush3.bf16.msra.mxu1 %v7305_v23 }
 0x90f   :  { %5265 = vmatprep.subr.bf16.mxu0 %v7831_v43  ;;  %5285 = vmatprep.subr.bf16.mxu1 %v7831_v43 }
 0x911   :  { %5250 = vmatmul.mubr.msk.bf16.vlgmr.msra.gmra.mxu0 %vm182_vm4, %v2890_v12  ;;  %5262 = vmatmul.mubr.msk.bf16.vlgmr.msra.gmra.mxu1 %vm182_vm4, %v2890_v12 }
 0x912   :  { %5266 = vmatpush3.bf16.msra.mxu0 %v7315_v3  ;;  %5286 = vmatpush3.bf16.msra.mxu1 %v7321_v29 }
 0x913   :  { %5267 = vmatprep.subr.bf16.mxu0 %v7831_v43  ;;  %5287 = vmatprep.subr.bf16.mxu1 %v7831_v43 }
 0x914   :  { %5281 = vmatprep.mubr.msk.bf16.mxu0 %vm5710_vm0, %v7831_v43  ;;  %5301 = vmatprep.mubr.msk.bf16.mxu1 %vm5710_vm0, %v7831_v43 }
 0x916   :  { %5268 = vmatpush3.bf16.msra.mxu0 %v7333_v47  ;;  %5288 = vmatpush3.bf16.msra.mxu1 %v7339_v7 }
 0x917   :  { %5269 = vmatprep.subr.bf16.mxu0 %v7831_v43  ;;  %5289 = vmatprep.subr.bf16.mxu1 %v7831_v43 }
 0x91a   :  { %5270 = vmatpush3.bf16.msra.mxu0 %v7347_v40  ;;  %5290 = vmatpush3.bf16.msra.mxu1 %v7353_v35 }
 0x91b   :  { %5271 = vmatprep.subr.bf16.mxu0 %v7831_v43  ;;  %5291 = vmatprep.subr.bf16.mxu1 %v7831_v43 }
 0x91e   :  { %5272 = vmatpush3.bf16.msra.mxu0 %v7361_v8  ;;  %5292 = vmatpush3.bf16.msra.mxu1 %v7367_v31 }
 0x91f   :  { %5273 = vmatprep.subr.bf16.mxu0 %v7831_v43  ;;  %5293 = vmatprep.subr.bf16.mxu1 %v7831_v43 }
 0x922   :  { %5274 = vmatpush3.bf16.msra.mxu0 %v7375_v0  ;;  %5294 = vmatpush3.bf16.msra.mxu1 %v7381_v18 }
 0x923   :  { %5275 = vmatprep.subr.bf16.mxu0 %v7831_v43  ;;  %5295 = vmatprep.subr.bf16.mxu1 %v7831_v43 }
 0x926   :  { %5276 = vmatpush3.bf16.msra.mxu0 %v7389_v30  ;;  %5296 = vmatpush3.bf16.msra.mxu1 %v7395_v24 }
 0x927   :  { %5277 = vmatprep.subr.bf16.mxu0 %v7831_v43  ;;  %5297 = vmatprep.subr.bf16.mxu1 %v7831_v43 }
 0x92a   :  { %5278 = vmatpush3.bf16.msra.mxu0 %v7403_v50  ;;  %5298 = vmatpush3.bf16.msra.mxu1 %v7409_v25 }
 0x92b   :  { %5279 = vmatprep.subr.bf16.mxu0 %v7831_v43  ;;  %5299 = vmatprep.subr.bf16.mxu1 %v7831_v43 }
 0x92e   :  { %5280 = vmatpush3.bf16.msra.mxu0 %v7417_v39  ;;  %5300 = vmatpush3.bf16.msra.mxu1 %v7423_v44 }
 0x92f   :  { %5305 = vmatprep.subr.bf16.mxu0 %v7831_v43  ;;  %5325 = vmatprep.subr.bf16.mxu1 %v7831_v43 }
 0x991   :  { %v2729_v28 = vpop.f32.mrf.mxu0  ;;  %v2769_v49 = vpop.f32.mrf.mxu1 }
 0x992   :  { %v2770_v60 = vadd.f32 %v7853_v34, %v2769_v49  ;;  %v2730_v62 = vadd.f32 %v7854_v4, %v2729_v28 }
 0x993   :  { %v5155_v52 = vpop.f32.mrf.mxu0  ;;  %v5175_v53 = vpop.f32.mrf.mxu1 }
 0x994   :  { %v2856_v61 = vmul.f32 0.5, %v2770_v60  ;;  %v2855_v45 = vmul.f32 0.5, %v2730_v62 }
 0x995   :  { %v2732_v55 = vpop.f32.mrf.mxu0  ;;  %v2772_v56 = vpop.f32.mrf.mxu1 }
 0x996   :  { %v2859_v33 = vrot.slane %v2856_v61, 6 }
 0x997   :  { %v5156_v57 = vpop.f32.mrf.mxu0  ;;  %v5176_v59 = vpop.f32.mrf.mxu1 }
 0x998   :  { %v2867_v52 = vsel %vm440_vm1, %v2855_v45, %v2859_v33 }
 0x9b1   :  { %v2809_v63 = vpop.f32.mrf.mxu0  ;;  %v2849_v11 = vpop.f32.mrf.mxu1 }
 0x9b2   :  { %v2850_v38 = vadd.f32 %v7855_v5, %v2849_v11  ;;  %v2810_v32 = vadd.f32 %v7856_v54, %v2809_v63  ;;  %v2888_v5 = vld [vmem:[%s7793_s0 + $0xc] sm:$0x3]  ;;  %v3977_v54 = vld [vmem:[%s7793_s0 + $0x1c] sm:$0x3] }
 0x9b3   :  { %v5195_v41 = vpop.f32.mrf.mxu0  ;;  %v5215_v48 = vpop.f32.mrf.mxu1 }
 0x9b4   :  { %v2857_v14 = vmul.f32 0.5, %v2850_v38  ;;  %v2865_v34 = vrot.slane %v2810_v32, 2 }
 0x9b5   :  { %v2812_v51 = vpop.f32.mrf.mxu0  ;;  %v2852_v9 = vpop.f32.mrf.mxu1 }
 0x9b6   :  { %v2862_v12 = vrot.slane %v2857_v14, 4 }
 0x9b7   :  { %v5196_v49 = vpop.f32.mrf.mxu0  ;;  %v5216_v53 = vpop.f32.mrf.mxu1 }
 0x9b8   :  { %v2868_v4 = vsel %vm442_vm2, %v2867_v52, %v2862_v12  ;;  %v3981_v49 = vld [vmem:[%s7793_s0 + $0x3c] sm:$0x3]  ;;  %v3979_v53 = vld [vmem:[%s7793_s0 + $0x2c] sm:$0x3] }
 0x9b9   :  { %v2869_v28 = vsel %vm444_vm3, %v2868_v4, %v2865_v34 }
 0x9ba   :  { %5585 = vtanh.f32 %v2869_v28 }
 0x9c1   :  { %v2928_v55 = vpop.f32.mrf.mxu0  ;;  %v2970_v56 = vpop.f32.mrf.mxu1 }
 0x9c2   :  { %v2934_v57 = vadd.f32 %v2928_v55, %v2888_v5  ;;  %v2976_v59 = vadd.f32 %v3977_v54, %v2970_v56 }
 0x9c3   :  { %v5227_v60 = vpop.f32.mrf.mxu0  ;;  %v5239_v61 = vpop.f32.mrf.mxu1 }
 0x9c4   :  { %v3062_v62 = vmul.f32 0.5, %v2976_v59  ;;  %v3061_v38 = vmul.f32 0.5, %v2934_v57 }
 0x9c5   :  { %v2931_v63 = vpop.f32.mrf.mxu0  ;;  %v2973_v11 = vpop.f32.mrf.mxu1 }
 0x9c6   :  { %v3065_v33 = vrot.slane %v3062_v62, 6 }
 0x9c7   :  { %v5586_v32 = vpop.eup %5585  ;;  %v5228_v41 = vpop.f32.mrf.mxu0 }
 0x9c8   :  { %v5240_v48 = vpop.f32.mrf.mxu1  ;;  %v3073_v14 = vsel %vm440_vm1, %v3061_v38, %v3065_v33  ;;  %v2871_v45 = vmul.f32 0.5, %v5586_v32  ;;  %v2875_v9 = vrot.slane %v5586_v32, 6 }
 0x9ca   :  { %v2872_v51 = vadd.f32 0.5, %v2871_v45  ;;  %v3707_v45 = vrot.slane %v7163_v58, 4 }
 0x9cc   :  { %v2877_v12 = vmul.f32 %v2875_v9, %v2872_v51  ;;  %v2873_v52 = vmul.f32 %v2872_v51, %v7158_v37 }
 0x9ce   :  { %v2879_v34 = vrot.slane %v2877_v12, 6 }
 0x9d0   :  { %v7449_v4 = vadd.f32 %v2879_v34, %v2873_v52 }
 0x9d1   :  { %v3012_v28 = vpop.f32.mrf.mxu0  ;;  %v3054_v5 = vpop.f32.mrf.mxu1 }
 0x9d2   :  { %v3060_v54 = vadd.f32 %v3981_v49, %v3054_v5  ;;  %5587 = vtanh.f32 %v7449_v4  ;;  %v3018_v55 = vadd.f32 %v3979_v53, %v3012_v28 }
 0x9d3   :  { %v5251_v56 = vpop.f32.mrf.mxu0  ;;  %v5263_v57 = vpop.f32.mrf.mxu1 }
 0x9d4   :  { %v3063_v37 = vmul.f32 0.5, %v3060_v54  ;;  %v3071_v62 = vrot.slane %v3018_v55, 2 }
 0x9d5   :  { %v3015_v59 = vpop.f32.mrf.mxu0  ;;  %v3057_v60 = vpop.f32.mrf.mxu1 }
 0x9d6   :  { %v3068_v61 = vrot.slane %v3063_v37, 4  ;;  %v7476_v60 = vld [vmem:[%s7792_s2 + $0xf8] sm:$0xff]  }
 0x9d7   :  { %v5252_v63 = vpop.f32.mrf.mxu0  ;;  %v5264_v11 = vpop.f32.mrf.mxu1 }
 0x9d8   :  { %v3074_v38 = vsel %vm442_vm2, %v3073_v14, %v3068_v61  ;;  %v7488_v61 = vld [vmem:[%s7792_s2 + $0xb0] sm:$0xff]   ;;  %v7502_v63 = vld [vmem:[%s7792_s2 + $0xa8] sm:$0xff]  }
 0x9d9   :  { %v3075_v33 = vsel %vm444_vm3, %v3074_v38, %v3071_v62  ;;  %v7494_v62 = vld [vmem:[%s7792_s2 + $0xf0] sm:$0xff]   ;;  %v7508_v11 = vld [vmem:[%s7792_s2 + $0xe8] sm:$0xff]   ;;  %v7516_v38 = vld [vmem:[%s7792_s2 + $0xa0] sm:$0xff]  }
 0x9da   :  { %5589 = vtanh.f32 %v3075_v33  ;;  %v7522_v33 = vld [vmem:[%s7792_s2 + $0xe0] sm:$0xff]  }
 0x9df   :  { %v5588_v32 = vpop.eup %5587 }
 0x9e0   :  { %v2884_v41 = vrot.slane %v5588_v32, 6  ;;  %v7530_v32 = vld [vmem:[%s7792_s2 + $0x98] sm:$0xff]  }
 0x9e2   :  { %v2886_v48 = vmul.f32 %v2884_v41, %v2872_v51  ;;  %v7536_v41 = vld [vmem:[%s7792_s2 + $0xd8] sm:$0xff]  }
 0x9e4   :  { %3094 = vrot.lane.b32.xlu1 %v2886_v48, %s5712_s21  ;;  %v3709_v9 = vrot.slane %v2886_v48, 2  ;;  %v7544_v48 = vld [vmem:[%s7792_s2 + $0x90] sm:$0xff]  }
 0x9e6   :  { %v7457_v12 = vsel %vm440_vm1, %v3707_v45, %v3709_v9  ;;  %v7550_v45 = vld [vmem:[%s7792_s2 + $0xd0] sm:$0xff]   ;;  %v7558_v9 = vld [vmem:[%s7792_s2 + $0x88] sm:$0xff]  }
 0x9e7   :  { %v5590_v52 = vpop.eup %5589 }
 0x9e8   :  { %v3077_v34 = vmul.f32 0.5, %v5590_v52  ;;  %v3081_v53 = vrot.slane %v5590_v52, 6  ;;  %v7564_v52 = vld [vmem:[%s7792_s2 + $0xc8] sm:$0xff]  }
 0x9ea   :  { %v3078_v49 = vadd.f32 0.5, %v3077_v34  ;;  %v7572_v34 = vld [vmem:[%s7792_s2 + $0x80] sm:$0xff]  }
 0x9ec   :  { %v3083_v28 = vmul.f32 %v3081_v53, %v3078_v49  ;;  %v3079_v5 = vmul.f32 %v3078_v49, %v7168_v2  ;;  %v7470_v2 = vld [vmem:[%s7792_s2 + $0xb8] sm:$0xff]  }
 0x9ee   :  { %v3085_v14 = vrot.slane %v3083_v28, 6 }
 0x9f0   :  { %v7460_v54 = vadd.f32 %v3085_v14, %v3079_v5  ;;  %v3295_v5 = vld [vmem:[%s7793_s0 + $0xe] sm:$0x3] }
 0x9f2   :  { %5591 = vtanh.f32 %v7460_v54 }
 0x9ff   :  { %v5592_v58 = vpop.eup %5591 }
 0xa00   :  { %v3090_v51 = vrot.slane %v5592_v58, 6  ;;  %v3984_v58 = vld [vmem:[%s7793_s0 + $0x1e] sm:$0x3] }
 0xa02   :  { %v7463_v55 = vmul.f32 %v3090_v51, %v3078_v49  ;;  %v7578_v49 = vld [vmem:[%s7792_s2 + $0xc0] sm:$0xff]  }
 0xa56   :  { %v3095_v56 = vpop.permute.xlu1 %3094 }
 0xa57   :  { %v3097_v57 = vsel %vm182_vm4, %v7463_v55, %v3095_v56 }
 0xa58   :  { %v3098_v37 = vpack.c.bf16 %v3097_v57, %v3097_v57 }
 0xa5a   :  { %v3100_v59 = vrot.slane %v3098_v37, 2 }
 0xa5c   :  { %5282 = vmatmul.mubr.bf16.vlgmr.msra.gmra.mxu0 %v3100_v59  ;;  %5302 = vmatmul.mubr.bf16.vlgmr.msra.gmra.mxu1 %v3100_v59 }
 0xa5d   :  { %5306 = vmatpush3.bf16.msra.mxu0 %v7470_v2  ;;  %5326 = vmatpush3.bf16.msra.mxu1 %v7476_v60 }
 0xa5e   :  { %5307 = vmatprep.subr.bf16.mxu0 %v7831_v43  ;;  %5327 = vmatprep.subr.bf16.mxu1 %v7831_v43 }
 0xa5f   :  { %5321 = vmatprep.mubr.msk.bf16.mxu0 %vm5710_vm0, %v7831_v43  ;;  %5341 = vmatprep.mubr.msk.bf16.mxu1 %vm5710_vm0, %v7831_v43 }
 0xa61   :  { %5308 = vmatpush3.bf16.msra.mxu0 %v7488_v61  ;;  %5328 = vmatpush3.bf16.msra.mxu1 %v7494_v62 }
 0xa62   :  { %5309 = vmatprep.subr.bf16.mxu0 %v7831_v43  ;;  %5329 = vmatprep.subr.bf16.mxu1 %v7831_v43 }
 0xa65   :  { %5310 = vmatpush3.bf16.msra.mxu0 %v7502_v63  ;;  %5330 = vmatpush3.bf16.msra.mxu1 %v7508_v11 }
 0xa66   :  { %5311 = vmatprep.subr.bf16.mxu0 %v7831_v43  ;;  %5331 = vmatprep.subr.bf16.mxu1 %v7831_v43 }
 0xa69   :  { %5312 = vmatpush3.bf16.msra.mxu0 %v7516_v38  ;;  %5332 = vmatpush3.bf16.msra.mxu1 %v7522_v33 }
 0xa6a   :  { %5313 = vmatprep.subr.bf16.mxu0 %v7831_v43  ;;  %5333 = vmatprep.subr.bf16.mxu1 %v7831_v43 }
 0xa6d   :  { %5314 = vmatpush3.bf16.msra.mxu0 %v7530_v32  ;;  %5334 = vmatpush3.bf16.msra.mxu1 %v7536_v41 }
 0xa6e   :  { %5315 = vmatprep.subr.bf16.mxu0 %v7831_v43  ;;  %5335 = vmatprep.subr.bf16.mxu1 %v7831_v43 }
 0xa71   :  { %5316 = vmatpush3.bf16.msra.mxu0 %v7544_v48  ;;  %5336 = vmatpush3.bf16.msra.mxu1 %v7550_v45 }
 0xa72   :  { %5317 = vmatprep.subr.bf16.mxu0 %v7831_v43  ;;  %5337 = vmatprep.subr.bf16.mxu1 %v7831_v43 }
 0xa75   :  { %5318 = vmatpush3.bf16.msra.mxu0 %v7558_v9  ;;  %5338 = vmatpush3.bf16.msra.mxu1 %v7564_v52 }
 0xa76   :  { %5319 = vmatprep.subr.bf16.mxu0 %v7831_v43  ;;  %5339 = vmatprep.subr.bf16.mxu1 %v7831_v43 }
 0xa79   :  { %5320 = vmatpush3.bf16.msra.mxu0 %v7572_v34  ;;  %5340 = vmatpush3.bf16.msra.mxu1 %v7578_v49 }
 0xa7a   :  { %5345 = vmatprep.subr.bf16.mxu0 %v7831_v43  ;;  %5357 = vmatprep.subr.bf16.mxu1 %v7831_v43 }
 0xa7c   :  { %5322 = vmatmul.mubr.bf16.vlgmr.msra.gmra.mxu0 %v3100_v59  ;;  %5342 = vmatmul.mubr.bf16.vlgmr.msra.gmra.mxu1 %v3100_v59 }
 0xa7d   :  { %5346 = vmatpush3.bf16.msra.mxu0 %v7033_v6  ;;  %5358 = vmatpush3.bf16.msra.mxu1 %v7039_v42  ;;  %v3294_v6 = vpack.c.bf16 %v7463_v55, %v7463_v55 }
 0xa7e   :  { %5347 = vmatprep.subr.bf16.mxu0 %v7831_v43  ;;  %5359 = vmatprep.subr.bf16.mxu1 %v7831_v43 }
 0xa7f   :  { %5353 = vmatprep.mubr.msk.bf16.mxu0 %vm5710_vm0, %v7831_v43  ;;  %5365 = vmatprep.mubr.msk.bf16.mxu1 %vm5710_vm0, %v7831_v43  ;;  %v3297_v42 = vrot.slane %v3294_v6, 2 }
 0xa81   :  { %5348 = vmatpush3.bf16.msra.mxu0 %v7051_v27  ;;  %5360 = vmatpush3.bf16.msra.mxu1 %v7057_v46 }
 0xa82   :  { %5349 = vmatprep.subr.bf16.mxu0 %v7831_v43  ;;  %5361 = vmatprep.subr.bf16.mxu1 %v7831_v43 }
 0xa85   :  { %5350 = vmatpush3.bf16.msra.mxu0 %v7065_v21  ;;  %5362 = vmatpush3.bf16.msra.mxu1 %v7227_v26 }
 0xa86   :  { %5351 = vmatprep.subr.bf16.mxu0 %v7831_v43  ;;  %5363 = vmatprep.subr.bf16.mxu1 %v7831_v43 }
 0xa89   :  { %5352 = vmatpush3.bf16.msra.mxu0 %v7237_v1  ;;  %5364 = vmatpush3.bf16.msra.mxu1 %v7243_v10 }
 0xa8a   :  { %5369 = vmatprep.subr.bf16.mxu0 %v7831_v43  ;;  %5381 = vmatprep.subr.bf16.mxu1 %v7831_v43 }
 0xa8c   :  { %5354 = vmatmul.mubr.msk.bf16.vlgmr.msra.gmra.mxu0 %vm182_vm4, %v3297_v42  ;;  %5366 = vmatmul.mubr.msk.bf16.vlgmr.msra.gmra.mxu1 %vm182_vm4, %v3297_v42 }
 0xa8d   :  { %5370 = vmatpush3.bf16.msra.mxu0 %v7253_v13  ;;  %5382 = vmatpush3.bf16.msra.mxu1 %v7259_v15 }
 0xa8e   :  { %5371 = vmatprep.subr.bf16.mxu0 %v7831_v43  ;;  %5383 = vmatprep.subr.bf16.mxu1 %v7831_v43 }
 0xa8f   :  { %5377 = vmatprep.mubr.msk.bf16.mxu0 %vm5710_vm0, %v7831_v43  ;;  %5389 = vmatprep.mubr.msk.bf16.mxu1 %vm5710_vm0, %v7831_v43 }
 0xa91   :  { %5372 = vmatpush3.bf16.msra.mxu0 %v7271_v16  ;;  %5384 = vmatpush3.bf16.msra.mxu1 %v7277_v17  ;;  %v7668_v16 = vld [vmem:[%s7794_s3 + $0x1] ss:$0 sm:$0xff] }
 0xa92   :  { %5373 = vmatprep.subr.bf16.mxu0 %v7831_v43  ;;  %5385 = vmatprep.subr.bf16.mxu1 %v7831_v43 }
 0xa95   :  { %5374 = vmatpush3.bf16.msra.mxu0 %v7285_v19  ;;  %5386 = vmatpush3.bf16.msra.mxu1 %v7291_v20  ;;  %v7674_v20 = vld [vmem:[%s7794_s3] ss:$0 sm:$0xff] }
 0xa96   :  { %5375 = vmatprep.subr.bf16.mxu0 %v7831_v43  ;;  %5387 = vmatprep.subr.bf16.mxu1 %v7831_v43 }
 0xa99   :  { %5376 = vmatpush3.bf16.msra.mxu0 %v7299_v22  ;;  %5388 = vmatpush3.bf16.msra.mxu1 %v7305_v23 }
 0xa9a   :  { %5393 = vmatprep.subr.bf16.mxu0 %v7831_v43  ;;  %5413 = vmatprep.subr.bf16.mxu1 %v7831_v43 }
 0xa9c   :  { %5378 = vmatmul.mubr.msk.bf16.vlgmr.msra.gmra.mxu0 %vm182_vm4, %v3297_v42  ;;  %5390 = vmatmul.mubr.msk.bf16.vlgmr.msra.gmra.mxu1 %vm182_vm4, %v3297_v42 }
 0xa9d   :  { %5394 = vmatpush3.bf16.msra.mxu0 %v7315_v3  ;;  %5414 = vmatpush3.bf16.msra.mxu1 %v7321_v29  ;;  %v7680_v29 = vld [vmem:[%s7794_s3 + $0x3] ss:$0 sm:$0xff] }
 0xa9e   :  { %5395 = vmatprep.subr.bf16.mxu0 %v7831_v43  ;;  %5415 = vmatprep.subr.bf16.mxu1 %v7831_v43 }
 0xa9f   :  { %5409 = vmatprep.mubr.msk.bf16.mxu0 %vm5710_vm0, %v7831_v43  ;;  %5429 = vmatprep.mubr.msk.bf16.mxu1 %vm5710_vm0, %v7831_v43 }
 0xaa1   :  { %5396 = vmatpush3.bf16.msra.mxu0 %v7333_v47  ;;  %5416 = vmatpush3.bf16.msra.mxu1 %v7339_v7 }
 0xaa2   :  { %5397 = vmatprep.subr.bf16.mxu0 %v7831_v43  ;;  %5417 = vmatprep.subr.bf16.mxu1 %v7831_v43 }
 0xaa5   :  { %5398 = vmatpush3.bf16.msra.mxu0 %v7347_v40  ;;  %5418 = vmatpush3.bf16.msra.mxu1 %v7353_v35  ;;  %v7686_v40 = vld [vmem:[%s7794_s3 + $0x2] ss:$0 sm:$0xff] }
 0xaa6   :  { %5399 = vmatprep.subr.bf16.mxu0 %v7831_v43  ;;  %5419 = vmatprep.subr.bf16.mxu1 %v7831_v43 }
 0xaa9   :  { %5400 = vmatpush3.bf16.msra.mxu0 %v7361_v8  ;;  %5420 = vmatpush3.bf16.msra.mxu1 %v7367_v31 }
 0xaaa   :  { %5401 = vmatprep.subr.bf16.mxu0 %v7831_v43  ;;  %5421 = vmatprep.subr.bf16.mxu1 %v7831_v43 }
 0xaad   :  { %5402 = vmatpush3.bf16.msra.mxu0 %v7375_v0  ;;  %5422 = vmatpush3.bf16.msra.mxu1 %v7381_v18 }
 0xaae   :  { %5403 = vmatprep.subr.bf16.mxu0 %v7831_v43  ;;  %5423 = vmatprep.subr.bf16.mxu1 %v7831_v43 }
 0xab1   :  { %5404 = vmatpush3.bf16.msra.mxu0 %v7389_v30  ;;  %5424 = vmatpush3.bf16.msra.mxu1 %v7395_v24 }
 0xab2   :  { %5405 = vmatprep.subr.bf16.mxu0 %v7831_v43  ;;  %5425 = vmatprep.subr.bf16.mxu1 %v7831_v43 }
 0xab5   :  { %5406 = vmatpush3.bf16.msra.mxu0 %v7403_v50  ;;  %5426 = vmatpush3.bf16.msra.mxu1 %v7409_v25 }
 0xab6   :  { %5407 = vmatprep.subr.bf16.mxu0 %v7831_v43  ;;  %5427 = vmatprep.subr.bf16.mxu1 %v7831_v43 }
 0xab9   :  { %5408 = vmatpush3.bf16.msra.mxu0 %v7417_v39  ;;  %5428 = vmatpush3.bf16.msra.mxu1 %v7423_v44 }
 0xaba   :  { %5433 = vmatprep.subr.bf16.mxu0 %v7831_v43  ;;  %5453 = vmatprep.subr.bf16.mxu1 %v7831_v43 }
 0xb1c   :  { %v3136_v27 = vpop.f32.mrf.mxu0  ;;  %v3176_v46 = vpop.f32.mrf.mxu1 }
 0xb1d   :  { %v3177_v17 = vadd.f32 %v7668_v16, %v3176_v46  ;;  %v3137_v22 = vadd.f32 %v7674_v20, %v3136_v27 }
 0xb1e   :  { %v5283_v21 = vpop.f32.mrf.mxu0  ;;  %v5303_v26 = vpop.f32.mrf.mxu1 }
 0xb1f   :  { %v3263_v19 = vmul.f32 0.5, %v3177_v17  ;;  %v3262_v18 = vmul.f32 0.5, %v3137_v22 }
 0xb20   :  { %v3139_v1 = vpop.f32.mrf.mxu0  ;;  %v3179_v10 = vpop.f32.mrf.mxu1 }
 0xb21   :  { %v3266_v7 = vrot.slane %v3263_v19, 6 }
 0xb22   :  { %v5284_v13 = vpop.f32.mrf.mxu0  ;;  %v5304_v15 = vpop.f32.mrf.mxu1 }
 0xb23   :  { %v3274_v25 = vsel %vm440_vm1, %v3262_v18, %v3266_v7  ;;  %v3986_v7 = vld [vmem:[%s7793_s0 + $0x2e] sm:$0x3] }
 0xb3c   :  { %v3216_v23 = vpop.f32.mrf.mxu0  ;;  %v3256_v3 = vpop.f32.mrf.mxu1 }
 0xb3d   :  { %v3257_v47 = vadd.f32 %v7680_v29, %v3256_v3  ;;  %v3217_v35 = vadd.f32 %v7686_v40, %v3216_v23 }
 0xb3e   :  { %v5323_v8 = vpop.f32.mrf.mxu0  ;;  %v5343_v31 = vpop.f32.mrf.mxu1 }
 0xb3f   :  { %v3264_v0 = vmul.f32 0.5, %v3257_v47  ;;  %v3272_v39 = vrot.slane %v3217_v35, 2  ;;  %v3988_v47 = vld [vmem:[%s7793_s0 + $0x3e] sm:$0x3] }
 0xb40   :  { %v3219_v30 = vpop.f32.mrf.mxu0  ;;  %v3259_v24 = vpop.f32.mrf.mxu1 }
 0xb41   :  { %v3269_v50 = vrot.slane %v3264_v0, 4 }
 0xb42   :  { %v5324_v44 = vpop.f32.mrf.mxu0  ;;  %v5344_v53 = vpop.f32.mrf.mxu1 }
 0xb43   :  { %v3275_v28 = vsel %vm442_vm2, %v3274_v25, %v3269_v50 }
 0xb44   :  { %v3276_v14 = vsel %vm444_vm3, %v3275_v28, %v3272_v39 }
 0xb45   :  { %5593 = vtanh.f32 %v3276_v14 }
 0xb4c   :  { %v3335_v51 = vpop.f32.mrf.mxu0  ;;  %v3377_v55 = vpop.f32.mrf.mxu1 }
 0xb4d   :  { %v3341_v56 = vadd.f32 %v3335_v51, %v3295_v5  ;;  %v3383_v57 = vadd.f32 %v3984_v58, %v3377_v55 }
 0xb4e   :  { %v5355_v37 = vpop.f32.mrf.mxu0  ;;  %v5367_v59 = vpop.f32.mrf.mxu1 }
 0xb4f   :  { %v3469_v6 = vmul.f32 0.5, %v3383_v57  ;;  %v3468_v46 = vmul.f32 0.5, %v3341_v56 }
 0xb50   :  { %v3338_v42 = vpop.f32.mrf.mxu0  ;;  %v3380_v27 = vpop.f32.mrf.mxu1 }
 0xb51   :  { %v3472_v21 = vrot.slane %v3469_v6, 6 }
 0xb52   :  { %v5594_v26 = vpop.eup %5593  ;;  %v5356_v1 = vpop.f32.mrf.mxu0 }
 0xb53   :  { %v5368_v10 = vpop.f32.mrf.mxu1  ;;  %v3480_v13 = vsel %vm440_vm1, %v3468_v46, %v3472_v21  ;;  %v3278_v15 = vmul.f32 0.5, %v5594_v26  ;;  %v3282_v19 = vrot.slane %v5594_v26, 6 }
 0xb55   :  { %v3279_v17 = vadd.f32 0.5, %v3278_v15 }
 0xb57   :  { %v3284_v22 = vmul.f32 %v3282_v19, %v3279_v17  ;;  %v3280_v23 = vmul.f32 %v3279_v17, %v7449_v4 }
 0xb59   :  { %v3286_v3 = vrot.slane %v3284_v22, 6 }
 0xb5b   :  { %v7706_v35 = vadd.f32 %v3286_v3, %v3280_v23 }
 0xb5c   :  { %v3419_v8 = vpop.f32.mrf.mxu0  ;;  %v3461_v31 = vpop.f32.mrf.mxu1 }
 0xb5d   :  { %v3467_v0 = vadd.f32 %v3988_v47, %v3461_v31  ;;  %5595 = vtanh.f32 %v7706_v35  ;;  %v3425_v18 = vadd.f32 %v3986_v7, %v3419_v8 }
 0xb5e   :  { %v5379_v30 = vpop.f32.mrf.mxu0  ;;  %v5391_v24 = vpop.f32.mrf.mxu1 }
 0xb5f   :  { %v3470_v4 = vmul.f32 0.5, %v3467_v0  ;;  %v3478_v44 = vrot.slane %v3425_v18, 2 }
 0xb60   :  { %v3422_v50 = vpop.f32.mrf.mxu0  ;;  %v3464_v25 = vpop.f32.mrf.mxu1 }
 0xb61   :  { %v3475_v39 = vrot.slane %v3470_v4, 4 }
 0xb62   :  { %v5380_v53 = vpop.f32.mrf.mxu0  ;;  %v5392_v28 = vpop.f32.mrf.mxu1 }
 0xb63   :  { %v3481_v14 = vsel %vm442_vm2, %v3480_v13, %v3475_v39 }
 0xb64   :  { %v3482_v5 = vsel %vm444_vm3, %v3481_v14, %v3478_v44 }
 0xb65   :  { %5597 = vtanh.f32 %v3482_v5 }
 0xb6a   :  { %v5596_v58 = vpop.eup %5595 }
 0xb6b   :  { %v3291_v51 = vrot.slane %v5596_v58, 6 }
 0xb6d   :  { %v3293_v55 = vmul.f32 %v3291_v51, %v3279_v17 }
 0xb6f   :  { %3501 = vrot.lane.b32.xlu0 %v3293_v55, %s5712_s21  ;;  %v7714_v56 = vsel %vm442_vm2, %v7457_v12, %v3293_v55 }
 0xb72   :  { %v5598_v57 = vpop.eup %5597 }
 0xb73   :  { %v3484_v37 = vmul.f32 0.5, %v5598_v57  ;;  %v3488_v6 = vrot.slane %v5598_v57, 6 }
 0xb75   :  { %v3485_v59 = vadd.f32 0.5, %v3484_v37  ;;  %v3990_v37 = vld [vmem:[%s7796_s5] ss:$0 sm:$0xff] }
 0xb77   :  { %v3490_v42 = vmul.f32 %v3488_v6, %v3485_v59  ;;  %v3486_v46 = vmul.f32 %v3485_v59, %v7460_v54  ;;  %v5537_v54 = vld [vmem:[%s7795_s4 + $0x18] sm:$0xff]  }
 0xb79   :  { %v3492_v27 = vrot.slane %v3490_v42, 6 }
 0xb7b   :  { %v3494_v21 = vadd.f32 %v3492_v27, %v3486_v46 }
 0xb7d   :  { %5599 = vtanh.f32 %v3494_v21 }
 0xb8a   :  { %v5600_v26 = vpop.eup %5599 }
 0xb8b   :  { %v3497_v1 = vrot.slane %v5600_v26, 6 }
 0xb8d   :  { %v3499_v10 = vmul.f32 %v3497_v1, %v3485_v59 }
 0xbe1   :  { %v3502_v13 = vpop.permute.xlu0 %3501 }
 0xbe2   :  { %v3504_v15 = vsel %vm182_vm4, %v3499_v10, %v3502_v13 }
 0xbe3   :  { %v3505_v17 = vpack.c.bf16 %v3504_v15, %v3504_v15 }
 0xbe5   :  { %v3507_v12 = vrot.slane %v3505_v17, 2 }
 0xbe7   :  { %5410 = vmatmul.mubr.bf16.vlgmr.msra.gmra.mxu0 %v3507_v12  ;;  %5430 = vmatmul.mubr.bf16.vlgmr.msra.gmra.mxu1 %v3507_v12 }
 0xbe8   :  { %5434 = vmatpush3.bf16.msra.mxu0 %v7470_v2  ;;  %5454 = vmatpush3.bf16.msra.mxu1 %v7476_v60  ;;  %v5538_v2 = vld [vmem:[%s7795_s4 + $0x10] sm:$0xff]   ;;  %v5539_v60 = vld [vmem:[%s7795_s4 + $0x8] sm:$0xff]  }
 0xbe9   :  { %5435 = vmatprep.subr.bf16.mxu0 %v7831_v43  ;;  %5455 = vmatprep.subr.bf16.mxu1 %v7831_v43 }
 0xbea   :  { %5449 = vmatprep.mubr.msk.bf16.mxu0 %vm5710_vm0, %v7831_v43  ;;  %5469 = vmatprep.mubr.msk.bf16.mxu1 %vm5710_vm0, %v7831_v43 }
 0xbec   :  { %5436 = vmatpush3.bf16.msra.mxu0 %v7488_v61  ;;  %5456 = vmatpush3.bf16.msra.mxu1 %v7494_v62  ;;  %v5540_v61 = vld [vmem:[%s7795_s4] sm:$0xff]  }
 0xbed   :  { %5437 = vmatprep.subr.bf16.mxu0 %v7831_v43  ;;  %5457 = vmatprep.subr.bf16.mxu1 %v7831_v43 }
 0xbf0   :  { %5438 = vmatpush3.bf16.msra.mxu0 %v7502_v63  ;;  %5458 = vmatpush3.bf16.msra.mxu1 %v7508_v11 }
 0xbf1   :  { %5439 = vmatprep.subr.bf16.mxu0 %v7831_v43  ;;  %5459 = vmatprep.subr.bf16.mxu1 %v7831_v43 }
 0xbf4   :  { %5440 = vmatpush3.bf16.msra.mxu0 %v7516_v38  ;;  %5460 = vmatpush3.bf16.msra.mxu1 %v7522_v33 }
 0xbf5   :  { %5441 = vmatprep.subr.bf16.mxu0 %v7831_v43  ;;  %5461 = vmatprep.subr.bf16.mxu1 %v7831_v43 }
 0xbf8   :  { %5442 = vmatpush3.bf16.msra.mxu0 %v7530_v32  ;;  %5462 = vmatpush3.bf16.msra.mxu1 %v7536_v41 }
 0xbf9   :  { %5443 = vmatprep.subr.bf16.mxu0 %v7831_v43  ;;  %5463 = vmatprep.subr.bf16.mxu1 %v7831_v43 }
 0xbfc   :  { %5444 = vmatpush3.bf16.msra.mxu0 %v7544_v48  ;;  %5464 = vmatpush3.bf16.msra.mxu1 %v7550_v45 }
 0xbfd   :  { %5445 = vmatprep.subr.bf16.mxu0 %v7831_v43  ;;  %5465 = vmatprep.subr.bf16.mxu1 %v7831_v43 }
 0xc00   :  { %5446 = vmatpush3.bf16.msra.mxu0 %v7558_v9  ;;  %5466 = vmatpush3.bf16.msra.mxu1 %v7564_v52 }
 0xc01   :  { %5447 = vmatprep.subr.bf16.mxu0 %v7831_v43  ;;  %5467 = vmatprep.subr.bf16.mxu1 %v7831_v43 }
 0xc04   :  { %5448 = vmatpush3.bf16.msra.mxu0 %v7572_v34  ;;  %5468 = vmatpush3.bf16.msra.mxu1 %v7578_v49 }
 0xc05   :  { %5473 = vmatprep.subr.bf16.mxu0 %v7831_v43 }
 0xc07   :  { %5450 = vmatmul.mubr.bf16.vlgmr.msra.gmra.mxu0 %v3507_v12  ;;  %5470 = vmatmul.mubr.bf16.vlgmr.msra.gmra.mxu1 %v3507_v12 }
 0xc08   :  { %5481 = vmatprep.mubr.msk.bf16.mxu0 %vm5710_vm0, %v7831_v43  ;;  %5474 = vmatpush3.bf16.msra.mxu0 %v5537_v54 }
 0xc09   :  { %5475 = vmatprep.subr.bf16.mxu0 %v7831_v43 }
 0xc0c   :  { %5476 = vmatpush3.bf16.msra.mxu0 %v5538_v2 }
 0xc0d   :  { %5477 = vmatprep.subr.bf16.mxu0 %v7831_v43 }
 0xc10   :  { %5478 = vmatpush3.bf16.msra.mxu0 %v5539_v60 }
 0xc11   :  { %5479 = vmatprep.subr.bf16.mxu0 %v7831_v43 }
 0xc14   :  { %5480 = vmatpush3.bf16.msra.mxu0 %v5540_v61 }
 0xca7   :  { %v3543_v62 = vpop.f32.mrf.mxu0  ;;  %v3583_v63 = vpop.f32.mrf.mxu1 }
 0xca8   :  { %v3584_v45 = vadd.f32 %v7668_v16, %v3583_v63  ;;  %v3544_v52 = vadd.f32 %v7674_v20, %v3543_v62 }
 0xca9   :  { %v5411_v11 = vpop.f32.mrf.mxu0  ;;  %v5431_v38 = vpop.f32.mrf.mxu1 }
 0xcaa   :  { %v3670_v9 = vmul.f32 0.5, %v3584_v45  ;;  %v3669_v7 = vmul.f32 0.5, %v3544_v52 }
 0xcab   :  { %v3546_v33 = vpop.f32.mrf.mxu0  ;;  %v3586_v32 = vpop.f32.mrf.mxu1 }
 0xcac   :  { %v3673_v22 = vrot.slane %v3670_v9, 6 }
 0xcad   :  { %v5412_v41 = vpop.f32.mrf.mxu0  ;;  %v5432_v48 = vpop.f32.mrf.mxu1 }
 0xcae   :  { %v3681_v18 = vsel %vm440_vm1, %v3669_v7, %v3673_v22 }
 0xcc7   :  { %v3623_v34 = vpop.f32.mrf.mxu0  ;;  %v3663_v49 = vpop.f32.mrf.mxu1 }
 0xcc8   :  { %v3664_v19 = vadd.f32 %v7680_v29, %v3663_v49  ;;  %v3624_v43 = vadd.f32 %v7686_v40, %v3623_v34 }
 0xcc9   :  { %v5451_v23 = vpop.f32.mrf.mxu0  ;;  %v5471_v3 = vpop.f32.mrf.mxu1 }
 0xcca   :  { %v3671_v47 = vmul.f32 0.5, %v3664_v19  ;;  %v3679_v16 = vrot.slane %v3624_v43, 2 }
 0xccb   :  { %v3626_v8 = vpop.f32.mrf.mxu0  ;;  %v3666_v31 = vpop.f32.mrf.mxu1 }
 0xccc   :  { %v3676_v0 = vrot.slane %v3671_v47, 4 }
 0xccd   :  { %v5452_v30 = vpop.f32.mrf.mxu0  ;;  %v5472_v24 = vpop.f32.mrf.mxu1 }
 0xcce   :  { %v3682_v20 = vsel %vm442_vm2, %v3681_v18, %v3676_v0 }
 0xccf   :  { %v3683_v4 = vsel %vm444_vm3, %v3682_v20, %v3679_v16 }
 0xcd0   :  { %5601 = vtanh.f32 %v3683_v4 }
 0xcdd   :  { %v5602_v29 = vpop.eup %5601 }
 0xcde   :  { %v3685_v50 = vmul.f32 0.5, %v5602_v29  ;;  %v3689_v25 = vrot.slane %v5602_v29, 6 }
 0xce0   :  { %v3686_v40 = vadd.f32 0.5, %v3685_v50 }
 0xce2   :  { %v3691_v39 = vmul.f32 %v3689_v25, %v3686_v40  ;;  %v3687_v44 = vmul.f32 %v3686_v40, %v7706_v35 }
 0xce4   :  { %v3693_v53 = vrot.slane %v3691_v39, 6 }
 0xce6   :  { %v3695_v28 = vadd.f32 %v3693_v53, %v3687_v44 }
 0xce8   :  { %5603 = vtanh.f32 %v3695_v28 }
 0xcf5   :  { %v5604_v14 = vpop.eup %5603 }
 0xcf6   :  { %v3698_v5 = vrot.slane %v5604_v14, 6 }
 0xcf8   :  { %v3700_v58 = vmul.f32 %v3698_v5, %v3686_v40 }
 0xcfa   :  { %v3712_v51 = vrot.slane %v3700_v58, 6 }
 0xcfc   :  { %v3719_v55 = vsel %vm444_vm3, %v7714_v56, %v3712_v51 }
 0xcfd   :  { %v3720_v57 = vpack.c.bf16 %v3719_v55, %v6984_v36 }
 0xcff   :  { %5482 = vmatmul.mubr.msk.bf16.vlgmr.msra.gmra.mxu0 %vm182_vm4, %v3720_v57 }
 0xdbf   :  { %v3797_v59 = vpop.f32.mrf.mxu0 }
 0xdc0   :  { %v3798_v35 = vadd.f32 %v3990_v37, %v3797_v59 }
 0xdc1   :  { %v5483_v6 = vpop.f32.mrf.mxu0 }
 0xdc2   :  { %3805 = vst.msk [vmem:[%s7797_s6] sm:$0xff] %vm3804_vm5, %v3798_v35 }
 0xdc3   :  { %v3800_v42 = vpop.f32.mrf.mxu0 }
 0xdc4   :  { %v3801_v27 = vadd.f32 %v3990_v37, %v3800_v42 }
 0xdc5   :  { %v5484_v46 = vpop.f32.mrf.mxu0 }
 0xdc6   :  { %3806 = vst.msk [vmem:[%s7797_s6 + $0x8] sm:$0xff] %vm3804_vm5, %v3801_v27 }

</bundles_post_ra>
